<compile_context>
chip_gen: v6e
topology: v6e:2x2x1
jax: 0.10.0
libtpu: 0.0.40
codegen_flags: <defaults>
</compile_context>

<pallas_src>
import functools
import math

import jax
import jax.numpy as jnp
from jax.experimental import pallas as pl
from jax.experimental.pallas import tpu as pltpu

# ----- model hyper-parameters (consistent with the module) ------------------
EMBED = 32        # embedding_dim
HEAD_NUM = 4      # head_num
QKV_DIM = 8       # qkv_dim        (head_num * qkv_dim == embedding_dim)
FF_DIM = 64       # ff_hidden_dim
EPS = 1e-5        # InstanceNorm1d default eps
HD = HEAD_NUM * QKV_DIM   # 32


# ----------------------------- Pallas kernel --------------------------------
def _encoder_layer_kernel(x_ref, w_ref, w2_ref, b_ref, out_ref, oc_ref,
                          *, n_tok, b_blk):
    """One batch block: b_blk batch elements, n_tok tokens each, E channels.

    x_ref   : (b_blk*n_tok, E)
    w_ref   : (E, 4*HD + E + FF_DIM) = [Wq1|Wk1|Wv1|Wv2|Wo|W1]
    w2_ref  : (FF_DIM, E)
    b_ref   : (1, 256)               = [bo|g1|be1|b1|b2|g2|be2]
    out_ref : (b_blk*n_tok, E)
    oc_ref  : VMEM scratch (b_blk, n_tok, HD) -- concatenated head outputs
    """
    N, E, H, D = n_tok, EMBED, HEAD_NUM, QKV_DIM
    scale = 1.0 / math.sqrt(D)

    xf = x_ref[...]                                   # (b_blk*N, E)
    x3 = xf.reshape(b_blk, N, E)

    # --- fused projection: one lane-dense (E, 128) matmul gives q1|k1|v1|v2 ---
    w_proj = w_ref[:, 0:4 * HD]                       # (E, 128)
    qkvv = jnp.dot(xf, w_proj, preferred_element_type=jnp.float32)   # (b_blk*N, 128)
    qkvv3 = qkvv.reshape(b_blk, N, 4 * HD)

    # --- first multi-head self-attention (batched over the block) ---
    for h in range(H):                                # static unroll, H=4
        qh = qkvv3[:, :, h * D:(h + 1) * D]                           # (b_blk, N, D)
        kh = qkvv3[:, :, HD + h * D:HD + (h + 1) * D]
        vh = qkvv3[:, :, 2 * HD + h * D:2 * HD + (h + 1) * D]
        s = jnp.einsum("bnd,bmd->bnm", qh, kh,
                       preferred_element_type=jnp.float32) * scale    # (b_blk, N, N)
        m = jnp.max(s, axis=-1, keepdims=True)
        e = jnp.exp(s - m)
        p = e * pl.reciprocal(jnp.sum(e, axis=-1, keepdims=True), approx=True)
        oh = jnp.einsum("bnm,bmd->bnd", p, vh,
                        preferred_element_type=jnp.float32)           # (b_blk, N, D)
        oc_ref[:, :, h * D:(h + 1) * D] = oh          # static lane-offset write

    # --- second attention: single key => softmax == 1, output is Wv2(pref) ---
    # (broadcast to the N-1 node rows; exact, no softmax/q2/k2 needed)
    v2_pref = qkvv3[:, N - 1:N, 3 * HD:4 * HD]                        # (b_blk, 1, HD)
    row_ids = jax.lax.broadcasted_iota(jnp.int32, (1, N, HD), 1)
    node_mask = (row_ids < (N - 1)).astype(jnp.float32)               # (1, N, HD)
    oc = oc_ref[...] + node_mask * v2_pref                            # (b_blk, N, HD)

    # --- multi_head_combine ---
    wo = w_ref[:, 4 * HD:4 * HD + E]                                  # (HD, E)
    bo = b_ref[:, 0:E]                                                # (1, E)
    mho = jnp.dot(oc.reshape(b_blk * N, HD), wo,
                  preferred_element_type=jnp.float32) + bo            # (b_blk*N, E)

    # --- Add & InstanceNorm1d (per batch element, stats over the token axis) ---
    def add_norm(a3, b3, g, be):
        s = a3 + b3
        mean = jnp.mean(s, axis=1, keepdims=True)
        var = jnp.mean(jnp.square(s - mean), axis=1, keepdims=True)   # biased var
        return (s - mean) * jax.lax.rsqrt(var + EPS) * g[:, None, :] + be[:, None, :]

    g1, be1 = b_ref[:, E:2 * E], b_ref[:, 2 * E:3 * E]
    out1 = add_norm(x3, mho.reshape(b_blk, N, E), g1, be1)            # (b_blk, N, E)

    # --- feed forward: W2(gelu(W1(x))), tanh GELU -> EUP ---
    w1 = w_ref[:, 4 * HD + E:4 * HD + E + FF_DIM]                     # (E, FF)
    b1 = b_ref[:, 3 * E:3 * E + FF_DIM]                               # (1, FF)
    b2 = b_ref[:, 3 * E + FF_DIM:4 * E + FF_DIM]                      # (1, E)
    h1 = jnp.dot(out1.reshape(b_blk * N, E), w1,
                 preferred_element_type=jnp.float32) + b1
    h1 = jax.nn.gelu(h1, approximate=True)
    ff = jnp.dot(h1, w2_ref[...], preferred_element_type=jnp.float32) + b2

    g2 = b_ref[:, 4 * E + FF_DIM:5 * E + FF_DIM]
    be2 = b_ref[:, 5 * E + FF_DIM:6 * E + FF_DIM]
    out3 = add_norm(out1, ff.reshape(b_blk, N, E), g2, be2)           # (b_blk, N, E)

    out_ref[...] = out3.reshape(b_blk * N, E)


# ------------------------------ wrapper --------------------------------------
def encoder_layer_pallas(x, params, b_blk=None):
    B, N, E = x.shape
    assert E == EMBED

    if b_blk is None:  # largest divisor of B keeping the row block reasonable
        cap = max(1, 2048 // N)
        b_blk = max(d for d in range(1, min(B, cap) + 1) if B % d == 0)
    assert B % b_blk == 0
    assert (b_blk * N) % 8 == 0, "block row count must be a multiple of 8"

    f32 = jnp.float32
    # weight slab: [Wq1|Wk1|Wv1|Wv2|Wo|W1]  -> (E, 4*HD + E + FF) = (32, 224)
    w_slab = jnp.concatenate(
        [params["wq1"], params["wk1"], params["wv1"], params["wv2"],
         params["wo"], params["w1"]], axis=1).astype(f32)
    # bias/affine slab: [bo|g1|be1|b1|b2|g2|be2] -> (1, 256)
    b_slab = jnp.concatenate(
        [params["bo"], params["g1"], params["be1"], params["b1"],
         params["b2"], params["g2"], params["be2"]], axis=1).astype(f32)
    w2 = params["w2"].astype(f32)

    x2 = x.reshape(B * N, E).astype(f32)
    rows_blk = b_blk * N

    kernel = functools.partial(_encoder_layer_kernel, n_tok=N, b_blk=b_blk)

    out = pl.pallas_call(
        kernel,
        out_shape=jax.ShapeDtypeStruct((B * N, E), jnp.float32),
        grid=(B // b_blk,),
        in_specs=[
            pl.BlockSpec((rows_blk, E), lambda i: (i, 0)),
            pl.BlockSpec(w_slab.shape, lambda i: (0, 0)),
            pl.BlockSpec(w2.shape, lambda i: (0, 0)),
            pl.BlockSpec(b_slab.shape, lambda i: (0, 0)),
        ],
        out_specs=pl.BlockSpec((rows_blk, E), lambda i: (i, 0)),
        scratch_shapes=[pltpu.VMEM((b_blk, N, HD), jnp.float32)],
        compiler_params=pltpu.CompilerParams(
            dimension_semantics=("parallel",)),
    )(x2, w_slab, w2, b_slab)
    return out.reshape(B, N, E)


# -------------------------- parameter init -----------------------------------
def init_params(key):
    E, F = EMBED, FF_DIM
    ks = jax.random.split(key, 12)

    def lin(k, fan_in, shape):
        bound = 1.0 / math.sqrt(fan_in)
        return jax.random.uniform(k, shape, jnp.float32, -bound, bound)

    return {
        "wq1": lin(ks[0], E, (E, HD)),
        "wk1": lin(ks[1], E, (E, HD)),
        "wv1": lin(ks[2], E, (E, HD)),
        "wq2": lin(ks[3], E, (E, HD)),    # only used by the reference (dead in kernel)
        "wk2": lin(ks[4], E, (E, HD)),    # only used by the reference (dead in kernel)
        "wv2": lin(ks[5], E, (E, HD)),
        "wo": lin(ks[6], HD, (HD, E)),
        "bo": lin(ks[7], HD, (1, E)),
        "g1": jnp.ones((1, E), jnp.float32),   # InstanceNorm affine defaults
        "be1": jnp.zeros((1, E), jnp.float32),
        "w1": lin(ks[8], E, (E, F)),
        "b1": lin(ks[9], E, (1, F)),
        "w2": lin(ks[10], F, (F, E)),
        "b2": lin(ks[11], F, (1, E)),
        "g2": jnp.ones((1, E), jnp.float32),
        "be2": jnp.zeros((1, E), jnp.float32),
    }


# --------------------------- pure-JAX reference -------------------------------
def reference_forward(x, p):
    H, D = HEAD_NUM, QKV_DIM
    B, N, E = x.shape
    hi = jax.lax.Precision.HIGHEST

    def heads(t):
        b, n, _ = t.shape
        return t.reshape(b, n, H, D).transpose(0, 2, 1, 3)

    def mha(q, k, v):
        s = jnp.einsum("bhnd,bhmd->bhnm", q, k, precision=hi) / jnp.sqrt(
            jnp.float32(D))
        w = jax.nn.softmax(s, axis=-1)
        o = jnp.einsum("bhnm,bhmd->bhnd", w, v, precision=hi)
        return o.transpose(0, 2, 1, 3).reshape(B, -1, H * D)

    mm = lambda a, b: jnp.matmul(a, b, precision=hi)

    q1 = heads(mm(x, p["wq1"]))
    k1 = heads(mm(x, p["wk1"]))
    v1 = heads(mm(x, p["wv1"]))
    xn, xp = x[:, :-1], x[:, -1:, :]
    q2 = heads(mm(xn, p["wq2"]))
    k2 = heads(mm(xp, p["wk2"]))
    v2 = heads(mm(xp, p["wv2"]))

    oc = mha(q1, k1, v1)
    ac = mha(q2, k2, v2)
    oc = oc.at[:, :-1].add(ac)

    mho = mm(oc, p["wo"]) + p["bo"]

    def add_norm(a, b, g, be):
        s = a + b
        mean = s.mean(axis=1, keepdims=True)
        var = ((s - mean) ** 2).mean(axis=1, keepdims=True)
        return (s - mean) * jax.lax.rsqrt(var + EPS) * g + be

    out1 = add_norm(x, mho, p["g1"], p["be1"])
    ff = mm(jax.nn.gelu(mm(out1, p["w1"]) + p["b1"], approximate=False),
            p["w2"]) + p["b2"]
    return add_norm(out1, ff, p["g2"], p["be2"])


# ------------------------------- main -----------------------------------------
if __name__ == "__main__":
    key = jax.random.PRNGKey(0)
    kx, kp = jax.random.split(key)

    B, N = 16, 8                      # N includes the preference node (last row)
    x = jax.random.normal(kx, (B, N, EMBED), jnp.float32)
    params = init_params(kp)

    out = encoder_layer_pallas(x, params, b_blk=8)   # grid = (2,), 64 rows/step
    out = jax.block_until_ready(out)

    ref = reference_forward(x, params)
    assert out.shape == ref.shape == (B, N, EMBED)
    assert bool(jnp.allclose(out, ref, atol=2e-2, rtol=2e-2)), "mismatch vs reference"

    print("KERNEL_OK")
</pallas_src>

<mosaic_0001>
module attributes {stable_mosaic.version = 11 : i64} {
  func.func @_encoder_layer_kernel(%arg0: i32, %arg1: memref<64x32xf32, #tpu.memory_space<vmem>>, %arg2: memref<32x224xf32, #tpu.memory_space<vmem>>, %arg3: memref<64x32xf32, #tpu.memory_space<vmem>>, %arg4: memref<1x256xf32, #tpu.memory_space<vmem>>, %arg5: memref<64x32xf32, #tpu.memory_space<vmem>>, %arg6: memref<8x8x32xf32, #tpu.memory_space<vmem>>) attributes {dimension_semantics = [#tpu.dimension_semantics<parallel>], iteration_bounds = array<i64: 2>, scalar_prefetch = 0 : i64, scratch_operands = 1 : i64, tpu.core_type = #tpu.core_type<tc>, window_params = [{transform_indices = @transform_0, window_bounds = array<i64: 64, 32>}, {pipeline_mode = #tpu.pipeline_mode<synchronous>, transform_indices = @transform_1, window_bounds = array<i64: 32, 224>}, {pipeline_mode = #tpu.pipeline_mode<synchronous>, transform_indices = @transform_2, window_bounds = array<i64: 64, 32>}, {pipeline_mode = #tpu.pipeline_mode<synchronous>, transform_indices = @transform_3, window_bounds = array<i64: 1, 256>}, {transform_indices = @transform_4, window_bounds = array<i64: 64, 32>}]} {
    %c0 = arith.constant 0 : index
    %c0_0 = arith.constant 0 : index
    %0 = vector.load %arg1[%c0, %c0_0] : memref<64x32xf32, #tpu.memory_space<vmem>>, vector<64x32xf32>
    %1 = vector.shape_cast %0 : vector<64x32xf32> to vector<8x8x32xf32>
    %c0_1 = arith.constant 0 : index
    %c0_2 = arith.constant 0 : index
    %2 = vector.load %arg2[%c0_1, %c0_2] : memref<32x224xf32, #tpu.memory_space<vmem>>, vector<32x128xf32>
    %cst = arith.constant dense<0.000000e+00> : vector<64x128xf32>
    %3 = tpu.matmul %0, %2, %cst {dimension_numbers = #tpu.dot_dimension_numbers<[1], [0], [0], [1], [0, 0, 1, 1], [], []>} : vector<64x32xf32>, vector<32x128xf32>, vector<64x128xf32> -> vector<64x128xf32>
    %4 = vector.shape_cast %3 : vector<64x128xf32> to vector<8x8x128xf32>
    %5 = vector.extract_strided_slice %4 {offsets = [0, 0, 0], sizes = [8, 8, 8], strides = [1, 1, 1]} : vector<8x8x128xf32> to vector<8x8x8xf32>
    %6 = vector.extract_strided_slice %4 {offsets = [0, 0, 32], sizes = [8, 8, 8], strides = [1, 1, 1]} : vector<8x8x128xf32> to vector<8x8x8xf32>
    %7 = vector.extract_strided_slice %4 {offsets = [0, 0, 64], sizes = [8, 8, 8], strides = [1, 1, 1]} : vector<8x8x128xf32> to vector<8x8x8xf32>
    "tpu.trace_start"() <{level = 10 : i32, message = "bnd,bmd->bnm"}> : () -> ()
    %cst_3 = arith.constant dense<0.000000e+00> : vector<8x8x8xf32>
    %8 = tpu.matmul %5, %6, %cst_3 {dimension_numbers = #tpu.dot_dimension_numbers<[2], [2], [1], [1], [0, 0, 0, 1, 1, 1], [0], [0]>} : vector<8x8x8xf32>, vector<8x8x8xf32>, vector<8x8x8xf32> -> vector<8x8x8xf32>
    "tpu.trace_stop"() : () -> ()
    %cst_4 = arith.constant 0.353553385 : f32
    %9 = vector.broadcast %cst_4 : f32 to vector<8x8x8xf32>
    %10 = arith.mulf %8, %9 : vector<8x8x8xf32>
    %cst_5 = arith.constant dense<0xFF800000> : vector<8x8xf32>
    %11 = vector.multi_reduction <maximumf>, %10, %cst_5 [2] : vector<8x8x8xf32> to vector<8x8xf32>
    %12 = vector.shape_cast %11 : vector<8x8xf32> to vector<8x8x1xf32>
    %13 = vector.broadcast %12 : vector<8x8x1xf32> to vector<8x8x8xf32>
    %14 = arith.subf %10, %13 : vector<8x8x8xf32>
    %15 = math.exp %14 : vector<8x8x8xf32>
    %cst_6 = arith.constant dense<0.000000e+00> : vector<8x8xf32>
    %16 = vector.multi_reduction <add>, %15, %cst_6 [2] : vector<8x8x8xf32> to vector<8x8xf32>
    %17 = vector.shape_cast %16 : vector<8x8xf32> to vector<8x8x1xf32>
    %18 = tpu.reciprocal %17 {approx = true} : vector<8x8x1xf32> -> vector<8x8x1xf32>
    %19 = vector.broadcast %18 : vector<8x8x1xf32> to vector<8x8x8xf32>
    %20 = arith.mulf %15, %19 : vector<8x8x8xf32>
    "tpu.trace_start"() <{level = 10 : i32, message = "bnm,bmd->bnd"}> : () -> ()
    %cst_7 = arith.constant dense<0.000000e+00> : vector<8x8x8xf32>
    %21 = tpu.matmul %20, %7, %cst_7 {dimension_numbers = #tpu.dot_dimension_numbers<[2], [1], [1], [2], [0, 0, 0, 1, 1, 2], [0], [0]>} : vector<8x8x8xf32>, vector<8x8x8xf32>, vector<8x8x8xf32> -> vector<8x8x8xf32>
    "tpu.trace_stop"() : () -> ()
    %c0_8 = arith.constant 0 : index
    %c0_9 = arith.constant 0 : index
    %c0_10 = arith.constant 0 : index
    %22 = vector.load %arg6[%c0_8, %c0_9, %c0_10] : memref<8x8x32xf32, #tpu.memory_space<vmem>>, vector<8x8x8xf32>
    tpu.vector_store %arg6[%c0_8, %c0_9, %c0_10], %21 {strides = array<i32>} : memref<8x8x32xf32, #tpu.memory_space<vmem>>, vector<8x8x8xf32>,
    %23 = vector.extract_strided_slice %4 {offsets = [0, 0, 8], sizes = [8, 8, 8], strides = [1, 1, 1]} : vector<8x8x128xf32> to vector<8x8x8xf32>
    %24 = vector.extract_strided_slice %4 {offsets = [0, 0, 40], sizes = [8, 8, 8], strides = [1, 1, 1]} : vector<8x8x128xf32> to vector<8x8x8xf32>
    %25 = vector.extract_strided_slice %4 {offsets = [0, 0, 72], sizes = [8, 8, 8], strides = [1, 1, 1]} : vector<8x8x128xf32> to vector<8x8x8xf32>
    "tpu.trace_start"() <{level = 10 : i32, message = "bnd,bmd->bnm"}> : () -> ()
    %cst_11 = arith.constant dense<0.000000e+00> : vector<8x8x8xf32>
    %26 = tpu.matmul %23, %24, %cst_11 {dimension_numbers = #tpu.dot_dimension_numbers<[2], [2], [1], [1], [0, 0, 0, 1, 1, 1], [0], [0]>} : vector<8x8x8xf32>, vector<8x8x8xf32>, vector<8x8x8xf32> -> vector<8x8x8xf32>
    "tpu.trace_stop"() : () -> ()
    %cst_12 = arith.constant 0.353553385 : f32
    %27 = vector.broadcast %cst_12 : f32 to vector<8x8x8xf32>
    %28 = arith.mulf %26, %27 : vector<8x8x8xf32>
    %cst_13 = arith.constant dense<0xFF800000> : vector<8x8xf32>
    %29 = vector.multi_reduction <maximumf>, %28, %cst_13 [2] : vector<8x8x8xf32> to vector<8x8xf32>
    %30 = vector.shape_cast %29 : vector<8x8xf32> to vector<8x8x1xf32>
    %31 = vector.broadcast %30 : vector<8x8x1xf32> to vector<8x8x8xf32>
    %32 = arith.subf %28, %31 : vector<8x8x8xf32>
    %33 = math.exp %32 : vector<8x8x8xf32>
    %cst_14 = arith.constant dense<0.000000e+00> : vector<8x8xf32>
    %34 = vector.multi_reduction <add>, %33, %cst_14 [2] : vector<8x8x8xf32> to vector<8x8xf32>
    %35 = vector.shape_cast %34 : vector<8x8xf32> to vector<8x8x1xf32>
    %36 = tpu.reciprocal %35 {approx = true} : vector<8x8x1xf32> -> vector<8x8x1xf32>
    %37 = vector.broadcast %36 : vector<8x8x1xf32> to vector<8x8x8xf32>
    %38 = arith.mulf %33, %37 : vector<8x8x8xf32>
    "tpu.trace_start"() <{level = 10 : i32, message = "bnm,bmd->bnd"}> : () -> ()
    %cst_15 = arith.constant dense<0.000000e+00> : vector<8x8x8xf32>
    %39 = tpu.matmul %38, %25, %cst_15 {dimension_numbers = #tpu.dot_dimension_numbers<[2], [1], [1], [2], [0, 0, 0, 1, 1, 2], [0], [0]>} : vector<8x8x8xf32>, vector<8x8x8xf32>, vector<8x8x8xf32> -> vector<8x8x8xf32>
    "tpu.trace_stop"() : () -> ()
    %c0_16 = arith.constant 0 : index
    %c0_17 = arith.constant 0 : index
    %c8 = arith.constant 8 : index
    %40 = vector.load %arg6[%c0_16, %c0_17, %c8] : memref<8x8x32xf32, #tpu.memory_space<vmem>>, vector<8x8x8xf32>
    tpu.vector_store %arg6[%c0_16, %c0_17, %c8], %39 {strides = array<i32>} : memref<8x8x32xf32, #tpu.memory_space<vmem>>, vector<8x8x8xf32>,
    %41 = vector.extract_strided_slice %4 {offsets = [0, 0, 16], sizes = [8, 8, 8], strides = [1, 1, 1]} : vector<8x8x128xf32> to vector<8x8x8xf32>
    %42 = vector.extract_strided_slice %4 {offsets = [0, 0, 48], sizes = [8, 8, 8], strides = [1, 1, 1]} : vector<8x8x128xf32> to vector<8x8x8xf32>
    %43 = vector.extract_strided_slice %4 {offsets = [0, 0, 80], sizes = [8, 8, 8], strides = [1, 1, 1]} : vector<8x8x128xf32> to vector<8x8x8xf32>
    "tpu.trace_start"() <{level = 10 : i32, message = "bnd,bmd->bnm"}> : () -> ()
    %cst_18 = arith.constant dense<0.000000e+00> : vector<8x8x8xf32>
    %44 = tpu.matmul %41, %42, %cst_18 {dimension_numbers = #tpu.dot_dimension_numbers<[2], [2], [1], [1], [0, 0, 0, 1, 1, 1], [0], [0]>} : vector<8x8x8xf32>, vector<8x8x8xf32>, vector<8x8x8xf32> -> vector<8x8x8xf32>
    "tpu.trace_stop"() : () -> ()
    %cst_19 = arith.constant 0.353553385 : f32
    %45 = vector.broadcast %cst_19 : f32 to vector<8x8x8xf32>
    %46 = arith.mulf %44, %45 : vector<8x8x8xf32>
    %cst_20 = arith.constant dense<0xFF800000> : vector<8x8xf32>
    %47 = vector.multi_reduction <maximumf>, %46, %cst_20 [2] : vector<8x8x8xf32> to vector<8x8xf32>
    %48 = vector.shape_cast %47 : vector<8x8xf32> to vector<8x8x1xf32>
    %49 = vector.broadcast %48 : vector<8x8x1xf32> to vector<8x8x8xf32>
    %50 = arith.subf %46, %49 : vector<8x8x8xf32>
    %51 = math.exp %50 : vector<8x8x8xf32>
    %cst_21 = arith.constant dense<0.000000e+00> : vector<8x8xf32>
    %52 = vector.multi_reduction <add>, %51, %cst_21 [2] : vector<8x8x8xf32> to vector<8x8xf32>
    %53 = vector.shape_cast %52 : vector<8x8xf32> to vector<8x8x1xf32>
    %54 = tpu.reciprocal %53 {approx = true} : vector<8x8x1xf32> -> vector<8x8x1xf32>
    %55 = vector.broadcast %54 : vector<8x8x1xf32> to vector<8x8x8xf32>
    %56 = arith.mulf %51, %55 : vector<8x8x8xf32>
    "tpu.trace_start"() <{level = 10 : i32, message = "bnm,bmd->bnd"}> : () -> ()
    %cst_22 = arith.constant dense<0.000000e+00> : vector<8x8x8xf32>
    %57 = tpu.matmul %56, %43, %cst_22 {dimension_numbers = #tpu.dot_dimension_numbers<[2], [1], [1], [2], [0, 0, 0, 1, 1, 2], [0], [0]>} : vector<8x8x8xf32>, vector<8x8x8xf32>, vector<8x8x8xf32> -> vector<8x8x8xf32>
    "tpu.trace_stop"() : () -> ()
    %c0_23 = arith.constant 0 : index
    %c0_24 = arith.constant 0 : index
    %c16 = arith.constant 16 : index
    %58 = vector.load %arg6[%c0_23, %c0_24, %c16] : memref<8x8x32xf32, #tpu.memory_space<vmem>>, vector<8x8x8xf32>
    tpu.vector_store %arg6[%c0_23, %c0_24, %c16], %57 {strides = array<i32>} : memref<8x8x32xf32, #tpu.memory_space<vmem>>, vector<8x8x8xf32>,
    %59 = vector.extract_strided_slice %4 {offsets = [0, 0, 24], sizes = [8, 8, 8], strides = [1, 1, 1]} : vector<8x8x128xf32> to vector<8x8x8xf32>
    %60 = vector.extract_strided_slice %4 {offsets = [0, 0, 56], sizes = [8, 8, 8], strides = [1, 1, 1]} : vector<8x8x128xf32> to vector<8x8x8xf32>
    %61 = vector.extract_strided_slice %4 {offsets = [0, 0, 88], sizes = [8, 8, 8], strides = [1, 1, 1]} : vector<8x8x128xf32> to vector<8x8x8xf32>
    "tpu.trace_start"() <{level = 10 : i32, message = "bnd,bmd->bnm"}> : () -> ()
    %cst_25 = arith.constant dense<0.000000e+00> : vector<8x8x8xf32>
    %62 = tpu.matmul %59, %60, %cst_25 {dimension_numbers = #tpu.dot_dimension_numbers<[2], [2], [1], [1], [0, 0, 0, 1, 1, 1], [0], [0]>} : vector<8x8x8xf32>, vector<8x8x8xf32>, vector<8x8x8xf32> -> vector<8x8x8xf32>
    "tpu.trace_stop"() : () -> ()
    %cst_26 = arith.constant 0.353553385 : f32
    %63 = vector.broadcast %cst_26 : f32 to vector<8x8x8xf32>
    %64 = arith.mulf %62, %63 : vector<8x8x8xf32>
    %cst_27 = arith.constant dense<0xFF800000> : vector<8x8xf32>
    %65 = vector.multi_reduction <maximumf>, %64, %cst_27 [2] : vector<8x8x8xf32> to vector<8x8xf32>
    %66 = vector.shape_cast %65 : vector<8x8xf32> to vector<8x8x1xf32>
    %67 = vector.broadcast %66 : vector<8x8x1xf32> to vector<8x8x8xf32>
    %68 = arith.subf %64, %67 : vector<8x8x8xf32>
    %69 = math.exp %68 : vector<8x8x8xf32>
    %cst_28 = arith.constant dense<0.000000e+00> : vector<8x8xf32>
    %70 = vector.multi_reduction <add>, %69, %cst_28 [2] : vector<8x8x8xf32> to vector<8x8xf32>
    %71 = vector.shape_cast %70 : vector<8x8xf32> to vector<8x8x1xf32>
    %72 = tpu.reciprocal %71 {approx = true} : vector<8x8x1xf32> -> vector<8x8x1xf32>
    %73 = vector.broadcast %72 : vector<8x8x1xf32> to vector<8x8x8xf32>
    %74 = arith.mulf %69, %73 : vector<8x8x8xf32>
    "tpu.trace_start"() <{level = 10 : i32, message = "bnm,bmd->bnd"}> : () -> ()
    %cst_29 = arith.constant dense<0.000000e+00> : vector<8x8x8xf32>
    %75 = tpu.matmul %74, %61, %cst_29 {dimension_numbers = #tpu.dot_dimension_numbers<[2], [1], [1], [2], [0, 0, 0, 1, 1, 2], [0], [0]>} : vector<8x8x8xf32>, vector<8x8x8xf32>, vector<8x8x8xf32> -> vector<8x8x8xf32>
    "tpu.trace_stop"() : () -> ()
    %c0_30 = arith.constant 0 : index
    %c0_31 = arith.constant 0 : index
    %c24 = arith.constant 24 : index
    %76 = vector.load %arg6[%c0_30, %c0_31, %c24] : memref<8x8x32xf32, #tpu.memory_space<vmem>>, vector<8x8x8xf32>
    tpu.vector_store %arg6[%c0_30, %c0_31, %c24], %75 {strides = array<i32>} : memref<8x8x32xf32, #tpu.memory_space<vmem>>, vector<8x8x8xf32>,
    %77 = vector.extract_strided_slice %4 {offsets = [0, 7, 96], sizes = [8, 1, 32], strides = [1, 1, 1]} : vector<8x8x128xf32> to vector<8x1x32xf32>
    %78 = tpu.iota {dimensions = array<i32: 1>} : vector<1x8x32xi32>
    %c7_i32 = arith.constant 7 : i32
    %79 = vector.broadcast %c7_i32 : i32 to vector<1x8x32xi32>
    %80 = arith.cmpi slt, %78, %79 : vector<1x8x32xi32>
    %81 = arith.extui %80 : vector<1x8x32xi1> to vector<1x8x32xi32>
    %82 = arith.sitofp %81 : vector<1x8x32xi32> to vector<1x8x32xf32>
    %c0_32 = arith.constant 0 : index
    %c0_33 = arith.constant 0 : index
    %c0_34 = arith.constant 0 : index
    %83 = vector.load %arg6[%c0_32, %c0_33, %c0_34] : memref<8x8x32xf32, #tpu.memory_space<vmem>>, vector<8x8x32xf32>
    %84 = vector.broadcast %82 : vector<1x8x32xf32> to vector<8x8x32xf32>
    %85 = vector.broadcast %77 : vector<8x1x32xf32> to vector<8x8x32xf32>
    %86 = arith.mulf %84, %85 : vector<8x8x32xf32>
    %87 = arith.addf %83, %86 : vector<8x8x32xf32>
    %c0_35 = arith.constant 0 : index
    %c128 = arith.constant 128 : index
    %88 = vector.load %arg2[%c0_35, %c128] : memref<32x224xf32, #tpu.memory_space<vmem>>, vector<32x32xf32>
    %c0_36 = arith.constant 0 : index
    %c0_37 = arith.constant 0 : index
    %89 = vector.load %arg4[%c0_36, %c0_37] : memref<1x256xf32, #tpu.memory_space<vmem>>, vector<1x32xf32>
    %90 = vector.shape_cast %87 : vector<8x8x32xf32> to vector<64x32xf32>
    %cst_38 = arith.constant dense<0.000000e+00> : vector<64x32xf32>
    %91 = tpu.matmul %90, %88, %cst_38 {dimension_numbers = #tpu.dot_dimension_numbers<[1], [0], [0], [1], [0, 0, 1, 1], [], []>} : vector<64x32xf32>, vector<32x32xf32>, vector<64x32xf32> -> vector<64x32xf32>
    %92 = vector.broadcast %89 : vector<1x32xf32> to vector<64x32xf32>
    %93 = arith.addf %91, %92 : vector<64x32xf32>
    %c0_39 = arith.constant 0 : index
    %c32 = arith.constant 32 : index
    %94 = vector.load %arg4[%c0_39, %c32] : memref<1x256xf32, #tpu.memory_space<vmem>>, vector<1x32xf32>
    %c0_40 = arith.constant 0 : index
    %c64 = arith.constant 64 : index
    %95 = vector.load %arg4[%c0_40, %c64] : memref<1x256xf32, #tpu.memory_space<vmem>>, vector<1x32xf32>
    %96 = vector.shape_cast %93 : vector<64x32xf32> to vector<8x8x32xf32>
    %97 = arith.addf %1, %96 : vector<8x8x32xf32>
    %cst_41 = arith.constant dense<0.000000e+00> : vector<8x32xf32>
    %98 = vector.multi_reduction <add>, %97, %cst_41 [1] : vector<8x8x32xf32> to vector<8x32xf32>
    %99 = vector.shape_cast %98 : vector<8x32xf32> to vector<8x1x32xf32>
    %cst_42 = arith.constant 8.000000e+00 : f32
    %100 = vector.broadcast %cst_42 : f32 to vector<8x1x32xf32>
    %101 = arith.divf %99, %100 : vector<8x1x32xf32>
    %102 = vector.broadcast %101 : vector<8x1x32xf32> to vector<8x8x32xf32>
    %103 = arith.subf %97, %102 : vector<8x8x32xf32>
    %104 = arith.mulf %103, %103 : vector<8x8x32xf32>
    %cst_43 = arith.constant dense<0.000000e+00> : vector<8x32xf32>
    %105 = vector.multi_reduction <add>, %104, %cst_43 [1] : vector<8x8x32xf32> to vector<8x32xf32>
    %106 = vector.shape_cast %105 : vector<8x32xf32> to vector<8x1x32xf32>
    %cst_44 = arith.constant 8.000000e+00 : f32
    %107 = vector.broadcast %cst_44 : f32 to vector<8x1x32xf32>
    %108 = arith.divf %106, %107 : vector<8x1x32xf32>
    %109 = vector.broadcast %101 : vector<8x1x32xf32> to vector<8x8x32xf32>
    %110 = arith.subf %97, %109 : vector<8x8x32xf32>
    %cst_45 = arith.constant 9.99999974E-6 : f32
    %111 = vector.broadcast %cst_45 : f32 to vector<8x1x32xf32>
    %112 = arith.addf %108, %111 : vector<8x1x32xf32>
    %113 = math.rsqrt %112 : vector<8x1x32xf32>
    %114 = vector.broadcast %113 : vector<8x1x32xf32> to vector<8x8x32xf32>
    %115 = arith.mulf %110, %114 : vector<8x8x32xf32>
    %116 = vector.shape_cast %94 : vector<1x32xf32> to vector<1x1x32xf32>
    %117 = vector.broadcast %116 : vector<1x1x32xf32> to vector<8x8x32xf32>
    %118 = arith.mulf %115, %117 : vector<8x8x32xf32>
    %119 = vector.shape_cast %95 : vector<1x32xf32> to vector<1x1x32xf32>
    %120 = vector.broadcast %119 : vector<1x1x32xf32> to vector<8x8x32xf32>
    %121 = arith.addf %118, %120 : vector<8x8x32xf32>
    %c0_46 = arith.constant 0 : index
    %c160 = arith.constant 160 : index
    %122 = vector.load %arg2[%c0_46, %c160] : memref<32x224xf32, #tpu.memory_space<vmem>>, vector<32x64xf32>
    %c0_47 = arith.constant 0 : index
    %c96 = arith.constant 96 : index
    %123 = vector.load %arg4[%c0_47, %c96] : memref<1x256xf32, #tpu.memory_space<vmem>>, vector<1x64xf32>
    %c0_48 = arith.constant 0 : index
    %c160_49 = arith.constant 160 : index
    %124 = vector.load %arg4[%c0_48, %c160_49] : memref<1x256xf32, #tpu.memory_space<vmem>>, vector<1x32xf32>
    %125 = vector.shape_cast %121 : vector<8x8x32xf32> to vector<64x32xf32>
    %cst_50 = arith.constant dense<0.000000e+00> : vector<64x64xf32>
    %126 = tpu.matmul %125, %122, %cst_50 {dimension_numbers = #tpu.dot_dimension_numbers<[1], [0], [0], [1], [0, 0, 1, 1], [], []>} : vector<64x32xf32>, vector<32x64xf32>, vector<64x64xf32> -> vector<64x64xf32>
    %127 = vector.broadcast %123 : vector<1x64xf32> to vector<64x64xf32>
    %128 = arith.addf %126, %127 : vector<64x64xf32>
    %129 = arith.mulf %128, %128 : vector<64x64xf32>
    %130 = arith.mulf %128, %129 : vector<64x64xf32>
    %cst_51 = arith.constant 4.471500e-02 : f32
    %131 = vector.broadcast %cst_51 : f32 to vector<64x64xf32>
    %132 = arith.mulf %131, %130 : vector<64x64xf32>
    %133 = arith.addf %128, %132 : vector<64x64xf32>
    %cst_52 = arith.constant 0.797884583 : f32
    %134 = vector.broadcast %cst_52 : f32 to vector<64x64xf32>
    %135 = arith.mulf %134, %133 : vector<64x64xf32>
    %136 = math.tanh %135 : vector<64x64xf32>
    %cst_53 = arith.constant 1.000000e+00 : f32
    %137 = vector.broadcast %cst_53 : f32 to vector<64x64xf32>
    %138 = arith.addf %137, %136 : vector<64x64xf32>
    %cst_54 = arith.constant 5.000000e-01 : f32
    %139 = vector.broadcast %cst_54 : f32 to vector<64x64xf32>
    %140 = arith.mulf %139, %138 : vector<64x64xf32>
    %141 = arith.mulf %128, %140 : vector<64x64xf32>
    %c0_55 = arith.constant 0 : index
    %c0_56 = arith.constant 0 : index
    %142 = vector.load %arg3[%c0_55, %c0_56] : memref<64x32xf32, #tpu.memory_space<vmem>>, vector<64x32xf32>
    %cst_57 = arith.constant dense<0.000000e+00> : vector<64x32xf32>
    %143 = tpu.matmul %141, %142, %cst_57 {dimension_numbers = #tpu.dot_dimension_numbers<[1], [0], [0], [1], [0, 0, 1, 1], [], []>} : vector<64x64xf32>, vector<64x32xf32>, vector<64x32xf32> -> vector<64x32xf32>
    %144 = vector.broadcast %124 : vector<1x32xf32> to vector<64x32xf32>
    %145 = arith.addf %143, %144 : vector<64x32xf32>
    %c0_58 = arith.constant 0 : index
    %c192 = arith.constant 192 : index
    %146 = vector.load %arg4[%c0_58, %c192] : memref<1x256xf32, #tpu.memory_space<vmem>>, vector<1x32xf32>
    %c0_59 = arith.constant 0 : index
    %c224 = arith.constant 224 : index
    %147 = vector.load %arg4[%c0_59, %c224] : memref<1x256xf32, #tpu.memory_space<vmem>>, vector<1x32xf32>
    %148 = vector.shape_cast %145 : vector<64x32xf32> to vector<8x8x32xf32>
    %149 = arith.addf %121, %148 : vector<8x8x32xf32>
    %cst_60 = arith.constant dense<0.000000e+00> : vector<8x32xf32>
    %150 = vector.multi_reduction <add>, %149, %cst_60 [1] : vector<8x8x32xf32> to vector<8x32xf32>
    %151 = vector.shape_cast %150 : vector<8x32xf32> to vector<8x1x32xf32>
    %cst_61 = arith.constant 8.000000e+00 : f32
    %152 = vector.broadcast %cst_61 : f32 to vector<8x1x32xf32>
    %153 = arith.divf %151, %152 : vector<8x1x32xf32>
    %154 = vector.broadcast %153 : vector<8x1x32xf32> to vector<8x8x32xf32>
    %155 = arith.subf %149, %154 : vector<8x8x32xf32>
    %156 = arith.mulf %155, %155 : vector<8x8x32xf32>
    %cst_62 = arith.constant dense<0.000000e+00> : vector<8x32xf32>
    %157 = vector.multi_reduction <add>, %156, %cst_62 [1] : vector<8x8x32xf32> to vector<8x32xf32>
    %158 = vector.shape_cast %157 : vector<8x32xf32> to vector<8x1x32xf32>
    %cst_63 = arith.constant 8.000000e+00 : f32
    %159 = vector.broadcast %cst_63 : f32 to vector<8x1x32xf32>
    %160 = arith.divf %158, %159 : vector<8x1x32xf32>
    %161 = vector.broadcast %153 : vector<8x1x32xf32> to vector<8x8x32xf32>
    %162 = arith.subf %149, %161 : vector<8x8x32xf32>
    %cst_64 = arith.constant 9.99999974E-6 : f32
    %163 = vector.broadcast %cst_64 : f32 to vector<8x1x32xf32>
    %164 = arith.addf %160, %163 : vector<8x1x32xf32>
    %165 = math.rsqrt %164 : vector<8x1x32xf32>
    %166 = vector.broadcast %165 : vector<8x1x32xf32> to vector<8x8x32xf32>
    %167 = arith.mulf %162, %166 : vector<8x8x32xf32>
    %168 = vector.shape_cast %146 : vector<1x32xf32> to vector<1x1x32xf32>
    %169 = vector.broadcast %168 : vector<1x1x32xf32> to vector<8x8x32xf32>
    %170 = arith.mulf %167, %169 : vector<8x8x32xf32>
    %171 = vector.shape_cast %147 : vector<1x32xf32> to vector<1x1x32xf32>
    %172 = vector.broadcast %171 : vector<1x1x32xf32> to vector<8x8x32xf32>
    %173 = arith.addf %170, %172 : vector<8x8x32xf32>
    %174 = vector.shape_cast %173 : vector<8x8x32xf32> to vector<64x32xf32>
    %c0_65 = arith.constant 0 : index
    %c0_66 = arith.constant 0 : index
    %175 = vector.load %arg5[%c0_65, %c0_66] : memref<64x32xf32, #tpu.memory_space<vmem>>, vector<64x32xf32>
    tpu.vector_store %arg5[%c0_65, %c0_66], %174 {strides = array<i32>} : memref<64x32xf32, #tpu.memory_space<vmem>>, vector<64x32xf32>,
    return
  }
  func.func @transform_0(%arg0: i32) -> (i32, i32) {
    %c0_i32 = arith.constant 0 : i32
    %c0_i32_0 = arith.constant 0 : i32
    return %arg0, %c0_i32 : i32, i32
  }
  func.func @transform_1(%arg0: i32) -> (i32, i32) {
    %c0_i32 = arith.constant 0 : i32
    %c0_i32_0 = arith.constant 0 : i32
    %c0_i32_1 = arith.constant 0 : i32
    return %c0_i32, %c0_i32_0 : i32, i32
  }
  func.func @transform_2(%arg0: i32) -> (i32, i32) {
    %c0_i32 = arith.constant 0 : i32
    %c0_i32_0 = arith.constant 0 : i32
    %c0_i32_1 = arith.constant 0 : i32
    return %c0_i32, %c0_i32_0 : i32, i32
  }
  func.func @transform_3(%arg0: i32) -> (i32, i32) {
    %c0_i32 = arith.constant 0 : i32
    %c0_i32_0 = arith.constant 0 : i32
    %c0_i32_1 = arith.constant 0 : i32
    return %c0_i32, %c0_i32_0 : i32, i32
  }
  func.func @transform_4(%arg0: i32) -> (i32, i32) {
    %c0_i32 = arith.constant 0 : i32
    %c0_i32_0 = arith.constant 0 : i32
    return %arg0, %c0_i32 : i32, i32
  }
}

</mosaic_0001>

<bundles_post_ra>
// kernel: tpu_custom_call.1
= control target key start
LH: loop header
LB: loop body
LE: loop exit
PB: predicated region body
PF: predicated region fallthrough
CT: control target
= control target key end

     0   :  { %s7842_s15 = smov 0   ;;  %s9163_s0 = inlined_call_operand.vmem [shape: f32[128,32], index: 0, kind: input, shape index: {}]   ;;  %s9164_s1 = inlined_call_operand.vmem [shape: f32[32,224], index: 1, kind: input, shape index: {}]   ;;  %s9165_s2 = inlined_call_operand.vmem [shape: f32[64,32], index: 2, kind: input, shape index: {}]   ;;  %s9166_s3 = inlined_call_operand.vmem [shape: f32[1,256], index: 3, kind: input, shape index: {}]   ;;  %s9167_s4 = inlined_call_operand.vmem [shape: f32[128,32], index: 4, kind: output, shape index: {}]  }
   0x1 LB: > { %s6853_s16 = sadd.s32 4294967295, %s7798_s15   ;;  %p6857_p0 = scmp.ge.s32.totalorder %s7798_s15, 1  ;;  %s7798_s15 = sphi %s7842_s15, %s14_s15  }
   0x2   : > { %p163_p1 = scmp.lt.s32.totalorder %s7798_s15, 3 }
   0x4   : > { %p164_p2 = pnand %p6857_p0, %p163_p1 }
   0x5   : > { %s6858_s21 = sshll.u32 (!%p164_p2), %s6853_s16, 3  ;;  %s7802_s30 = smov (!%p164_p2), 96  }
   0x6   : > { %167 = sbr.rel (%p164_p2) target bundleno = 3556 (0xde4), region = 36  ;;  %p190_p3 = scmp.lt.s32.totalorder (!%p164_p2), %s6858_s21, 15 }
   0x7   : > { %s7803_s5 = smov (!%p164_p2), 64   ;;  %s7804_s6 = smov (!%p164_p2), 88  }
   0x8   : > { %s7805_s7 = smov (!%p164_p2), 120   ;;  %s7806_s8 = smov (!%p164_p2), 56  }
   0x9   : > { %s7807_s9 = smov (!%p164_p2), 80   ;;  %s7808_s10 = smov (!%p164_p2), 112  }
   0xa   : > { %s7809_s11 = smov (!%p164_p2), 48   ;;  %s7810_s12 = smov (!%p164_p2), 72  }
   0xb   : > { %v212_v0 = vld [vmem:[%s9164_s1 + $0x30] sm:$0xff]  ;;  %v211_v1 = vld [vmem:[%s9164_s1 + $0x20] sm:$0xff]  ;;  %s9169_s21 = smov (!%p190_p3, %s6858_s21), 15  ;;  %vm213_vm0 = vcmask 261120   ;;  %v7800_v12 = vmov 0.0   ;;  %vm7801_vm1 = vmmov 0   ;;  %v5779_v13 = vlaneseq }
   0xc   : > { %7175 = vmatprep.subr.mxu0 %v212_v0  ;;  %v210_v2 = vld [vmem:[%s9164_s1 + $0x10] sm:$0xff]  ;;  %v209_v3 = vld [vmem:[%s9164_s1] sm:$0xff]  ;;  %s6859_s26 = sshll.u32 %s9169_s21, 3  ;;  %7200 = vmatprep.subr.mxu1 %v7800_v12  ;;  %vm346_vm3 = vcmask 64512   ;;  %s7811_s13 = smov 104   ;;  %vm3032_vm4 = vcmask 130112  }
   0xd   : > { %7176 = vmatpush3.msra.mxu0 %v212_v0  ;;  %s7870_s29 = scalar_lea.vmem %s9163_s0, %s6859_s26  ;;  %7202 = vmatprep.mubr.msk.f32.mxu1 %vm7801_vm1, %v7800_v12  ;;  %v7894_v14 = vshrl.u32 %v5779_v13, 7  ;;  %s7812_s14 = smov 40   ;;  %vm4401_vm5 = vcmask 195712   ;;  %vm5770_vm6 = vcmask 261312   ;;  %vm6461_vm7 = vcmask 523264  }
   0xe   : > { %7177 = vmatprep.subr.mxu0 %v211_v1  ;;  %v201_v4 = vld [vmem:[%s7870_s29] sm:$0xff]  ;;  %v202_v5 = vld [vmem:[%s7870_s29 + $0x8] sm:$0xff]  ;;  %v203_v6 = vld [vmem:[%s7870_s29 + $0x10] sm:$0xff]  ;;  %s7813_s16 = smov 8   ;;  %s7814_s17 = smov 16  }
   0xf   : > { %7178 = vmatpush3.msra.mxu0 %v211_v1  ;;  %7183 = vmatprep.mubr.msk.f32.mxu0 %vm213_vm0, %v201_v4  ;;  %v204_v7 = vld [vmem:[%s7870_s29 + $0x18] sm:$0xff]  ;;  %v205_v8 = vld [vmem:[%s7870_s29 + $0x20] sm:$0xff]  ;;  %v206_v9 = vld [vmem:[%s7870_s29 + $0x28] sm:$0xff]  ;;  %vm5781_vm2 = vcmp.lt.s32.totalorder %v7894_v14, 7  ;;  %v7904_v17 = vsub.s32 7, %v7894_v14  ;;  %s7815_s18 = smov 32  }
  0x10   : > { %7179 = vmatprep.subr.mxu0 %v210_v2  ;;  %v207_v10 = vld [vmem:[%s7870_s29 + $0x30] sm:$0xff]  ;;  %v208_v11 = vld [vmem:[%s7870_s29 + $0x38] sm:$0xff]  ;;  %v7915_v21 = vsel %vm5781_vm2, 1.0, %v7800_v12  ;;  %s7816_s27 = smov 24  }
  0x11   : > { %7180 = vmatpush3.msra.mxu0 %v210_v2 }
  0x12   : > { %7181 = vmatprep.subr.mxu0 %v209_v3 }
  0x13   : > { %7182 = vmatpush3.msra.mxu0 %v209_v3 }
  0x14   : > { %7184 = vmatmul.mubr.msk.f32.vlgmr.msra.gmra.mxu0 %vm213_vm0, %v202_v5  ;;  %7195 = vmatprep.subr.mxu0 %v7800_v12 }
  0x15   : > { %7186 = vmatprep.mubr.msk.f32.mxu0 %vm213_vm0, %v203_v6 }
  0x18   : > { %7187 = vmatmul.mubr.msk.f32.gmra.mxu0 %vm213_vm0, %v204_v7 }
  0x19   : > { %7189 = vmatprep.mubr.msk.f32.mxu0 %vm213_vm0, %v205_v8 }
  0x1c   : > { %7190 = vmatmul.mubr.msk.f32.gmra.mxu0 %vm213_vm0, %v206_v9 }
  0x1d   : > { %7192 = vmatprep.mubr.msk.f32.mxu0 %vm213_vm0, %v207_v10 }
  0x20   : > { %7193 = vmatmul.mubr.msk.f32.gmra.mxu0 %vm213_vm0, %v208_v11 }
  0x21   : > { %7197 = vmatprep.mubr.msk.f32.mxu0 %vm7801_vm1, %v7800_v12 }
  0xd4   : > { %v7896_v15 = vpop.f32.mrf.mxu0 }
  0xd5   : > { %422 = vrot.lane.b32.xlu0 %v7896_v15, %s7802_s30 }
  0xd6   : > { %v7900_v16 = vpop.f32.mrf.mxu0 }
  0xd8   : > { %v7906_v18 = vpop.f32.mrf.mxu0 }
  0xd9   : > { %344 = vrot.lane.b32.xlu0 %v7900_v16, %s7802_s30  ;;  %v5807_v19 = vrot.slane %v7906_v18, %v7904_v17 }
  0xda   : > { %v7912_v20 = vpop.f32.mrf.mxu0 }
  0xdb   : > { %499 = vrot.lane.b32.xlu1 %v7912_v20, %s7802_s30  ;;  %v5803_v22 = vrot.slane %v7912_v20, %v7904_v17  ;;  %v7922_v23 = vmul.f32 %v7915_v21, %v5807_v19 }
  0xdc   : > { %v7924_v24 = vpop.f32.mrf.mxu0 }
  0xdd   : > { %v7927_v25 = vmul.f32 %v7915_v21, %v5803_v22  ;;  %v5815_v26 = vrot.slane %v7924_v24, %v7904_v17 }
  0xde   : > { %v7931_v27 = vpop.f32.mrf.mxu0 }
  0xdf   : > { %576 = vrot.lane.b32.xlu1 %v7906_v18, %s7802_s30  ;;  %653 = vrot.lane.b32.xlu0 %v7931_v27, %s7802_s30  ;;  %v7938_v28 = vmul.f32 %v7915_v21, %v5815_v26  ;;  %v5811_v29 = vrot.slane %v7931_v27, %v7904_v17 }
  0xe0   : > { %v7942_v30 = vpop.f32.mrf.mxu0 }
  0xe1   : > { %v5823_v31 = vrot.slane %v7942_v30, %v7904_v17  ;;  %v7947_v32 = vmul.f32 %v7915_v21, %v5811_v29 }
  0xe2   : > { %v7949_v33 = vpop.f32.mrf.mxu0 }
  0xe3   : > { %730 = vrot.lane.b32.xlu1 %v7924_v24, %s7802_s30  ;;  %807 = vrot.lane.b32.xlu0 %v7949_v33, %s7802_s30  ;;  %v7956_v34 = vmul.f32 %v7915_v21, %v5823_v31  ;;  %v5819_v35 = vrot.slane %v7949_v33, %v7904_v17 }
  0xe5   : > { %v7961_v36 = vmul.f32 %v7915_v21, %v5819_v35 }
  0xe7   : > { %884 = vrot.lane.b32.xlu1 %v7942_v30, %s7802_s30  ;;  %1132 = vrot.lane.b32.xlu0 %v7896_v15, %s7803_s5 }
  0xeb   : > { %1056 = vrot.lane.b32.xlu1 %v7900_v16, %s7803_s5  ;;  %1360 = vrot.lane.b32.xlu0 %v7931_v27, %s7803_s5 }
  0xef   : > { %1208 = vrot.lane.b32.xlu1 %v7912_v20, %s7803_s5  ;;  %1674 = vrot.lane.b32.xlu0 %v7900_v16, %s7804_s6 }
  0xf3   : > { %1284 = vrot.lane.b32.xlu1 %v7906_v18, %s7803_s5  ;;  %1672 = vrot.lane.b32.xlu0 %v7900_v16, %s7805_s7 }
  0xf7   : > { %1436 = vrot.lane.b32.xlu1 %v7924_v24, %s7803_s5  ;;  %1512 = vrot.lane.b32.xlu0 %v7949_v33, %s7803_s5 }
  0xfb   : > { %1588 = vrot.lane.b32.xlu1 %v7942_v30, %s7803_s5 }
  0xff   : > { %1752 = vrot.lane.b32.xlu1 %v7896_v15, %s7804_s6 }
 0x103   : > { %1750 = vrot.lane.b32.xlu1 %v7896_v15, %s7805_s7 }
 0x147   : > { %v423_v37 = vpop.permute.xlu0 %422 }
 0x148   : > { %7201 = vmatpush3.xpose.msk.msra.mxu1 %vm346_vm3, %v423_v37 }
 0x149   : > { %7205 = vmatprep.subr.mxu1 %v7800_v12 }
 0x14b   : > { %7203 = vmatmul.mubr.msk.f32.vlgmr.msra.gmra.mxu1 %vm346_vm3, %v7896_v15  ;;  %v345_v38 = vpop.permute.xlu0 %344 }
 0x14c   : > { %7196 = vmatpush3.xpose.msk.msra.mxu0 %vm346_vm3, %v345_v38  ;;  %7207 = vmatprep.mubr.msk.f32.mxu1 %vm7801_vm1, %v7800_v12 }
 0x14d   : > { %v500_v39 = vpop.permute.xlu1 %499  ;;  %7220 = vmatprep.subr.mxu0 %v7800_v12 }
 0x14e   : > { %7206 = vmatpush3.xpose.msk.msra.mxu1 %vm346_vm3, %v500_v39 }
 0x14f   : > { %7198 = vmatmul.mubr.msk.f32.vlgmr.msra.gmra.mxu0 %vm346_vm3, %v7900_v16  ;;  %7210 = vmatprep.subr.mxu1 %v7800_v12 }
 0x150   : > { %7222 = vmatprep.mubr.msk.f32.mxu0 %vm7801_vm1, %v7800_v12 }
 0x151   : > { %7208 = vmatmul.mubr.msk.f32.vlgmr.msra.gmra.mxu1 %vm346_vm3, %v7912_v20  ;;  %v577_v40 = vpop.permute.xlu1 %576  ;;  %v654_v41 = vpop.permute.xlu0 %653 }
 0x152   : > { %7211 = vmatpush3.xpose.msk.msra.mxu1 %vm346_vm3, %v577_v40  ;;  %7212 = vmatprep.mubr.msk.f32.mxu1 %vm7801_vm1, %v7800_v12 }
 0x153   : > { %7215 = vmatprep.subr.mxu1 %v7800_v12 }
 0x155   : > { %7213 = vmatmul.mubr.msk.f32.vlgmr.msra.gmra.mxu1 %vm346_vm3, %v7906_v18  ;;  %v731_v42 = vpop.permute.xlu1 %730  ;;  %v808_v43 = vpop.permute.xlu0 %807 }
 0x156   : > { %7216 = vmatpush3.xpose.msk.msra.mxu1 %vm346_vm3, %v654_v41  ;;  %7221 = vmatpush3.xpose.msk.msra.mxu0 %vm346_vm3, %v731_v42 }
 0x157   : > { %7217 = vmatprep.mubr.msk.f32.mxu1 %vm7801_vm1, %v7800_v12  ;;  %7225 = vmatprep.subr.mxu1 %v7800_v12 }
 0x158   : > { %7230 = vmatprep.subr.mxu0 %v7800_v12 }
 0x159   : > { %7218 = vmatmul.mubr.msk.f32.vlgmr.msra.gmra.mxu1 %vm346_vm3, %v7931_v27  ;;  %7223 = vmatmul.mubr.msk.f32.vlgmr.msra.gmra.mxu0 %vm346_vm3, %v7924_v24  ;;  %v885_v44 = vpop.permute.xlu1 %884  ;;  %v1133_v45 = vpop.permute.xlu0 %1132 }
 0x15a   : > { %7226 = vmatpush3.xpose.msk.msra.mxu1 %vm346_vm3, %v808_v43  ;;  %7231 = vmatpush3.xpose.msk.msra.mxu0 %vm346_vm3, %v885_v44 }
 0x15b   : > { %7227 = vmatprep.mubr.msk.f32.mxu1 %vm7801_vm1, %v7800_v12  ;;  %7232 = vmatprep.mubr.msk.f32.mxu0 %vm7801_vm1, %v7800_v12 }
 0x15c   : > { %7240 = vmatprep.subr.mxu0 %v7800_v12  ;;  %7235 = vmatprep.subr.mxu1 %v7800_v12 }
 0x15d   : > { %7233 = vmatmul.mubr.msk.f32.vlgmr.msra.gmra.mxu0 %vm346_vm3, %v7942_v30  ;;  %v1057_v46 = vpop.permute.xlu1 %1056  ;;  %7228 = vmatmul.mubr.msk.f32.vlgmr.msra.gmra.mxu1 %vm346_vm3, %v7949_v33  ;;  %v8066_v35 = vpop.permute.xlu0 %1360 }
 0x15e   : > { %7236 = vmatpush3.msra.mxu1 %v1057_v46  ;;  %7241 = vmatpush3.msra.mxu0 %v1133_v45 }
 0x15f   : > { %7242 = vmatprep.mubr.msk.f32.mxu0 %vm7801_vm1, %v7800_v12  ;;  %7250 = vmatprep.subr.mxu0 %v7800_v12 }
 0x160   : > { %7237 = vmatprep.mubr.msk.f32.mxu1 %vm7801_vm1, %v7800_v12  ;;  %7245 = vmatprep.subr.mxu1 %v7800_v12 }
 0x161   : > { %v8060_v26 = vpop.permute.xlu1 %1208  ;;  %v8070_v38 = vpop.permute.xlu0 %1674 }
 0x165   : > { %v8062_v29 = vpop.permute.xlu1 %1284  ;;  %v8074_v40 = vpop.permute.xlu0 %1672 }
 0x169   : > { %v8064_v31 = vpop.permute.xlu1 %1436  ;;  %v8078_v42 = vpop.permute.xlu0 %1512 }
 0x16d   : > { %v8068_v37 = vpop.permute.xlu1 %1588 }
 0x171   : > { %v8072_v39 = vpop.permute.xlu1 %1752 }
 0x175   : > { %v8076_v41 = vpop.permute.xlu1 %1750 }
 0x20b   : > { %v494_v47 = vpop.f32.mrf.mxu1 }
 0x20c   : > { %v961_v48 = vmul.f32 0.35355338, %v494_v47 }
 0x20d   : > { %v7204_v49 = vpop.f32.mrf.mxu1 }
 0x20e   : > { %v971_v50 = vsel %vm346_vm3, %v961_v48, -inf }
 0x20f   : > { %972 = vmax.xlane.f32.xlu1 %v971_v50  ;;  %v417_v51 = vpop.f32.mrf.mxu0 }
 0x210   : > { %v960_v52 = vmul.f32 0.35355338, %v417_v51 }
 0x211   : > { %v7199_v53 = vpop.f32.mrf.mxu0  ;;  %v571_v54 = vpop.f32.mrf.mxu1 }
 0x212   : > { %v962_v55 = vmul.f32 0.35355338, %v571_v54  ;;  %v968_v56 = vsel %vm346_vm3, %v960_v52, -inf }
 0x213   : > { %v7209_v57 = vpop.f32.mrf.mxu1  ;;  %969 = vmax.xlane.f32.xlu0 %v968_v56 }
 0x214   : > { %v974_v59 = vsel %vm346_vm3, %v962_v55, -inf }
 0x215   : > { %v648_v58 = vpop.f32.mrf.mxu1 }
 0x216   : > { %v963_v3 = vmul.f32 0.35355338, %v648_v58 }
 0x217   : > { %v7214_v60 = vpop.f32.mrf.mxu1  ;;  %975 = vmax.xlane.f32.xlu0 %v974_v59 }
 0x218   : > { %v977_v19 = vsel %vm346_vm3, %v963_v3, -inf }
 0x219   : > { %v725_v61 = vpop.f32.mrf.mxu1  ;;  %v802_v62 = vpop.f32.mrf.mxu0 }
 0x21a   : > { %v8042_v63 = vmul.f32 0.35355338, %v725_v61  ;;  %v965_v0 = vmul.f32 0.35355338, %v802_v62 }
 0x21b   : > { %v7219_v1 = vpop.f32.mrf.mxu1  ;;  %v7224_v2 = vpop.f32.mrf.mxu0 }
 0x21c   : > { %v980_v4 = vsel %vm346_vm3, %v8042_v63, -inf  ;;  %v983_v5 = vsel %vm346_vm3, %v965_v0, -inf }
 0x21d   : > { %981 = vmax.xlane.f32.xlu1 %v980_v4  ;;  %v879_v6 = vpop.f32.mrf.mxu1  ;;  %984 = vmax.xlane.f32.xlu0 %v983_v5  ;;  %v956_v7 = vpop.f32.mrf.mxu0 }
 0x21e   : > { %v8047_v8 = vmul.f32 0.35355338, %v879_v6  ;;  %v8049_v11 = vmul.f32 0.35355338, %v956_v7 }
 0x21f   : > { %v7229_v9 = vpop.f32.mrf.mxu1  ;;  %v7234_v10 = vpop.f32.mrf.mxu0 }
 0x220   : > { %v986_v13 = vsel %vm346_vm3, %v8047_v8, -inf  ;;  %v989_v22 = vsel %vm346_vm3, %v8049_v11, -inf }
 0x221   : > { %987 = vmax.xlane.f32.xlu1 %v986_v13  ;;  %978 = vmax.xlane.f32.xlu0 %v977_v19 }
 0x225   : > { %990 = vmax.xlane.f32.xlu0 %v989_v22 }
 0x232   : > { %1908 = vrot.lane.b32.xlu1 %v7906_v18, %s7804_s6 }
 0x23b   : > { %1830 = vrot.lane.b32.xlu0 %v7912_v20, %s7804_s6 }
 0x298   : > { %v973_v43 = vpop.xlane.xlu1 %972 }
 0x299   : > { %v993_v44 = vsub.f32 %v961_v48, %v973_v43 }
 0x29b   : > { %v1002_v45 = vmul.f32 1.442695, %v993_v44 }
 0x29c   : > { %v970_v46 = vpop.xlane.xlu0 %969 }
 0x29d   : > { %7608 = vpow2.f32 %v1002_v45  ;;  %v992_v47 = vsub.f32 %v960_v52, %v970_v46 }
 0x29f   : > { %v1000_v49 = vmul.f32 1.442695, %v992_v47 }
 0x2a0   : > { %v976_v50 = vpop.xlane.xlu0 %975 }
 0x2a1   : > { %7610 = vpow2.f32 %v1000_v49  ;;  %v994_v51 = vsub.f32 %v962_v55, %v976_v50 }
 0x2a3   : > { %v1004_v53 = vmul.f32 1.442695, %v994_v51 }
 0x2a5   : > { %7612 = vpow2.f32 %v1004_v53 }
 0x2a6   : > { %v985_v54 = vpop.xlane.xlu0 %984  ;;  %v982_v5 = vpop.xlane.xlu1 %981 }
 0x2a7   : > { %v997_v56 = vsub.f32 %v965_v0, %v985_v54  ;;  %v996_v6 = vsub.f32 %v8042_v63, %v982_v5 }
 0x2a9   : > { %v1010_v57 = vmul.f32 1.442695, %v997_v56  ;;  %v1008_v9 = vmul.f32 1.442695, %v996_v6 }
 0x2aa   : > { %v8080_v58 = vpop.eup %7608  ;;  %v979_v59 = vpop.xlane.xlu0 %978 }
 0x2ab   : > { %v995_v60 = vsub.f32 %v963_v3, %v979_v59  ;;  %v1019_v48 = vsel %vm346_vm3, %v8080_v58, 0.0  ;;  %7614 = vpow2.f32 %v1010_v57  ;;  %v988_v7 = vpop.xlane.xlu1 %987 }
 0x2ac   : > { %1020 = vadd.xlane.f32.xlu0 %v1019_v48  ;;  %v998_v10 = vsub.f32 %v8047_v8, %v988_v7 }
 0x2ad   : > { %v1006_v61 = vmul.f32 1.442695, %v995_v60 }
 0x2ae   : > { %v7611_v52 = vpop.eup %7610  ;;  %v1012_v13 = vmul.f32 1.442695, %v998_v10  ;;  %v991_v19 = vpop.xlane.xlu0 %990 }
 0x2af   : > { %v1016_v62 = vsel %vm346_vm3, %v7611_v52, 0.0  ;;  %7616 = vpow2.f32 %v1006_v61  ;;  %v999_v22 = vsub.f32 %v8049_v11, %v991_v19  ;;  %v8136_v49 = vpop.permute.xlu1 %1908 }
 0x2b0   : > { %1017 = vadd.xlane.f32.xlu1 %v1016_v62  ;;  %7618 = vpow2.f32 %v1008_v9 }
 0x2b1   : > { %7620 = vpow2.f32 %v1012_v13  ;;  %v1014_v43 = vmul.f32 1.442695, %v999_v22 }
 0x2b2   : > { %v8085_v55 = vpop.eup %7612  ;;  %v8134_v47 = vpop.permute.xlu0 %1830 }
 0x2b3   : > { %v1022_v0 = vsel %vm346_vm3, %v8085_v55, 0.0  ;;  %7622 = vpow2.f32 %v1014_v43 }
 0x2b4   : > { %1023 = vadd.xlane.f32.xlu1 %v1022_v0 }
 0x2b8   : > { %v8089_v1 = vpop.eup %7614 }
 0x2b9   : > { %v1031_v2 = vsel %vm346_vm3, %v8089_v1, 0.0 }
 0x2ba   : > { %1032 = vadd.xlane.f32.xlu0 %v1031_v2 }
 0x2bc   : > { %v8093_v3 = vpop.eup %7616 }
 0x2bd   : > { %v1025_v4 = vsel %vm346_vm3, %v8093_v3, 0.0  ;;  %v8104_v44 = vpop.eup %7618 }
 0x2be   : > { %1026 = vadd.xlane.f32.xlu0 %v1025_v4  ;;  %v1028_v63 = vsel %vm346_vm3, %v8104_v44, 0.0  ;;  %v8108_v45 = vpop.eup %7620 }
 0x2bf   : > { %v1034_v8 = vsel %vm346_vm3, %v8108_v45, 0.0 }
 0x2c0   : > { %v8112_v46 = vpop.eup %7622 }
 0x2c1   : > { %v1037_v11 = vsel %vm346_vm3, %v8112_v46, 0.0 }
 0x2c5   : > { %1906 = vrot.lane.b32.xlu1 %v7906_v18, %s7805_s7 }
 0x2d4   : > { %1828 = vrot.lane.b32.xlu0 %v7912_v20, %s7805_s7 }
 0x2e9   : > { %1029 = vadd.xlane.f32.xlu1 %v1028_v63 }
 0x2ed   : > { %1035 = vadd.xlane.f32.xlu1 %v1034_v8 }
 0x2f3   : > { %1038 = vadd.xlane.f32.xlu0 %v1037_v11 }
 0x2fe   : > { %2064 = vrot.lane.b32.xlu1 %v7924_v24, %s7804_s6 }
 0x302   : > { %2062 = vrot.lane.b32.xlu1 %v7924_v24, %s7805_s7 }
 0x306   : > { %2220 = vrot.lane.b32.xlu1 %v7942_v30, %s7804_s6 }
 0x309   : > { %1986 = vrot.lane.b32.xlu0 %v7931_v27, %s7804_s6 }
 0x30a   : > { %2218 = vrot.lane.b32.xlu1 %v7942_v30, %s7805_s7 }
 0x30d   : > { %1984 = vrot.lane.b32.xlu0 %v7931_v27, %s7805_s7 }
 0x30e   : > { %2392 = vrot.lane.b32.xlu1 %v7900_v16, %s7806_s8 }
 0x311   : > { %2142 = vrot.lane.b32.xlu0 %v7949_v33, %s7804_s6 }
 0x315   : > { %2140 = vrot.lane.b32.xlu0 %v7949_v33, %s7805_s7 }
 0x335   : > { %v1021_v50 = vpop.xlane.xlu0 %1020 }
 0x336   : > { %7624 = vrcp.f32 %v1021_v50 }
 0x339   : > { %v1018_v51 = vpop.xlane.xlu1 %1017 }
 0x33a   : > { %7626 = vrcp.f32 %v1018_v51 }
 0x33d   : > { %v1024_v53 = vpop.xlane.xlu1 %1023 }
 0x33e   : > { %7628 = vrcp.f32 %v1024_v53 }
 0x341   : > { %v1907_v62 = vpop.permute.xlu1 %1906 }
 0x343   : > { %v7625_v54 = vpop.eup %7624  ;;  %v1033_v56 = vpop.xlane.xlu0 %1032 }
 0x344   : > { %v1049_v57 = vmul.f32 %v7625_v54, %v8080_v58 }
 0x346   : > { %7243 = vmatmul.mubr.msk.f32.vlgmr.msra.gmra.mxu0 %vm346_vm3, %v1049_v57 }
 0x347   : > { %v7627_v59 = vpop.eup %7626  ;;  %7251 = vmatpush3.msra.mxu0 %v8062_v29  ;;  %7252 = vmatprep.mubr.msk.f32.mxu0 %vm7801_vm1, %v7800_v12  ;;  %v1027_v60 = vpop.xlane.xlu0 %1026 }
 0x348   : > { %v1048_v48 = vmul.f32 %v7627_v59, %v7611_v52  ;;  %7260 = vmatprep.subr.mxu0 %v7800_v12  ;;  %7630 = vrcp.f32 %v1027_v60 }
 0x349   : > { %7632 = vrcp.f32 %v1033_v56 }
 0x34a   : > { %7238 = vmatmul.mubr.msk.f32.vlgmr.msra.gmra.mxu1 %vm346_vm3, %v1048_v48 }
 0x34b   : > { %v7629_v61 = vpop.eup %7628  ;;  %7246 = vmatpush3.msra.mxu1 %v8060_v26  ;;  %7247 = vmatprep.mubr.msk.f32.mxu1 %vm7801_vm1, %v7800_v12  ;;  %v1829_v0 = vpop.permute.xlu0 %1828 }
 0x34c   : > { %7255 = vmatprep.subr.mxu1 %v7800_v12  ;;  %v1050_v29 = vmul.f32 %v7629_v61, %v8085_v55 }
 0x34e   : > { %7248 = vmatmul.mubr.msk.f32.vlgmr.msra.gmra.mxu1 %vm346_vm3, %v1050_v29 }
 0x34f   : > { %7256 = vmatpush3.msra.mxu1 %v8066_v35  ;;  %7257 = vmatprep.mubr.msk.f32.mxu1 %vm7801_vm1, %v7800_v12 }
 0x350   : > { %7265 = vmatprep.subr.mxu1 %v7800_v12 }
 0x355   : > { %v7631_v58 = vpop.eup %7630 }
 0x356   : > { %v1051_v52 = vmul.f32 %v7631_v58, %v8093_v3  ;;  %v7633_v26 = vpop.eup %7632 }
 0x357   : > { %v1053_v35 = vmul.f32 %v7633_v26, %v8089_v1 }
 0x358   : > { %7253 = vmatmul.mubr.msk.f32.vlgmr.msra.gmra.mxu0 %vm346_vm3, %v1051_v52 }
 0x359   : > { %7261 = vmatpush3.msra.mxu0 %v8064_v31  ;;  %7262 = vmatprep.mubr.msk.f32.mxu0 %vm7801_vm1, %v7800_v12 }
 0x35a   : > { %7270 = vmatprep.subr.mxu0 %v7800_v12 }
 0x35c   : > { %7263 = vmatmul.mubr.msk.f32.vlgmr.msra.gmra.mxu0 %vm346_vm3, %v1053_v35 }
 0x35d   : > { %7271 = vmatpush3.msra.mxu0 %v8068_v37  ;;  %7272 = vmatprep.mubr.msk.f32.mxu0 %vm7801_vm1, %v7800_v12 }
 0x35e   : > { %7280 = vmatprep.subr.mxu0 %v7800_v12 }
 0x372   : > { %v1030_v55 = vpop.xlane.xlu1 %1029 }
 0x373   : > { %7634 = vrcp.f32 %v1030_v55 }
 0x376   : > { %v1036_v31 = vpop.xlane.xlu1 %1035 }
 0x377   : > { %7636 = vrcp.f32 %v1036_v31 }
 0x37a   : > { %v2065_v3 = vpop.permute.xlu1 %2064 }
 0x37c   : > { %v1039_v2 = vpop.xlane.xlu0 %1038 }
 0x37d   : > { %7638 = vrcp.f32 %v1039_v2 }
 0x37e   : > { %v2063_v6 = vpop.permute.xlu1 %2062 }
 0x380   : > { %v7635_v4 = vpop.eup %7634  ;;  %v1987_v5 = vpop.permute.xlu0 %1986 }
 0x381   : > { %v1052_v1 = vmul.f32 %v7635_v4, %v8104_v44 }
 0x382   : > { %v2221_v10 = vpop.permute.xlu1 %2220 }
 0x383   : > { %7258 = vmatmul.mubr.msk.f32.vlgmr.msra.gmra.mxu1 %vm346_vm3, %v1052_v1 }
 0x384   : > { %v7637_v37 = vpop.eup %7636  ;;  %7266 = vmatpush3.msra.mxu1 %v8078_v42  ;;  %7267 = vmatprep.mubr.msk.f32.mxu1 %vm7801_vm1, %v7800_v12  ;;  %v1985_v9 = vpop.permute.xlu0 %1984 }
 0x385   : > { %7275 = vmatprep.subr.mxu1 %v7800_v12  ;;  %v1054_v7 = vmul.f32 %v7637_v37, %v8108_v45 }
 0x387   : > { %7268 = vmatmul.mubr.msk.f32.vlgmr.msra.gmra.mxu1 %vm346_vm3, %v1054_v7 }
 0x388   : > { %7276 = vmatpush3.xpose.msk.msra.mxu1 %vm346_vm3, %v8070_v38  ;;  %7277 = vmatprep.mubr.msk.f32.mxu1 %vm7801_vm1, %v7800_v12  ;;  %v2143_v38 = vpop.permute.xlu0 %2142 }
 0x389   : > { %7285 = vmatprep.subr.mxu1 %v7800_v12 }
 0x38a   : > { %v7639_v42 = vpop.eup %7638 }
 0x38b   : > { %7278 = vmatmul.mubr.msk.f32.vlgmr.msra.gmra.mxu1 %vm346_vm3, %v8074_v40  ;;  %v1055_v13 = vmul.f32 %v7639_v42, %v8112_v46  ;;  %v2219_v40 = vpop.permute.xlu1 %2218 }
 0x38c   : > { %7286 = vmatpush3.xpose.msk.msra.mxu1 %vm346_vm3, %v8134_v47  ;;  %7287 = vmatprep.mubr.msk.f32.mxu1 %vm7801_vm1, %v7800_v12 }
 0x38d   : > { %7295 = vmatprep.subr.mxu1 %v7800_v12  ;;  %7273 = vmatmul.mubr.msk.f32.vlgmr.msra.gmra.mxu0 %vm346_vm3, %v1055_v13 }
 0x38e   : > { %7281 = vmatpush3.xpose.msk.msra.mxu0 %vm346_vm3, %v8072_v39  ;;  %7282 = vmatprep.mubr.msk.f32.mxu0 %vm7801_vm1, %v7800_v12  ;;  %v2141_v39 = vpop.permute.xlu0 %2140 }
 0x38f   : > { %7288 = vmatmul.mubr.msk.f32.vlgmr.msra.gmra.mxu1 %vm346_vm3, %v1829_v0  ;;  %7290 = vmatprep.subr.mxu0 %v7800_v12 }
 0x390   : > { %7296 = vmatpush3.xpose.msk.msra.mxu1 %vm346_vm3, %v1987_v5  ;;  %7297 = vmatprep.mubr.msk.f32.mxu1 %vm7801_vm1, %v7800_v12 }
 0x391   : > { %7283 = vmatmul.mubr.msk.f32.vlgmr.msra.gmra.mxu0 %vm346_vm3, %v8076_v41  ;;  %7305 = vmatprep.subr.mxu1 %v7800_v12  ;;  %v2393_v41 = vpop.permute.xlu1 %2392 }
 0x392   : > { %7291 = vmatpush3.xpose.msk.msra.mxu0 %vm346_vm3, %v8136_v49  ;;  %7292 = vmatprep.mubr.msk.f32.mxu0 %vm7801_vm1, %v7800_v12 }
 0x393   : > { %7298 = vmatmul.mubr.msk.f32.vlgmr.msra.gmra.mxu1 %vm346_vm3, %v1985_v9  ;;  %7300 = vmatprep.subr.mxu0 %v7800_v12 }
 0x394   : > { %7306 = vmatpush3.xpose.msk.msra.mxu1 %vm346_vm3, %v2143_v38  ;;  %7307 = vmatprep.mubr.msk.f32.mxu1 %vm7801_vm1, %v7800_v12 }
 0x395   : > { %7293 = vmatmul.mubr.msk.f32.vlgmr.msra.gmra.mxu0 %vm346_vm3, %v1907_v62  ;;  %7315 = vmatprep.subr.mxu1 %v7800_v12 }
 0x396   : > { %7301 = vmatpush3.xpose.msk.msra.mxu0 %vm346_vm3, %v2065_v3  ;;  %7302 = vmatprep.mubr.msk.f32.mxu0 %vm7801_vm1, %v7800_v12 }
 0x397   : > { %7308 = vmatmul.mubr.msk.f32.vlgmr.msra.gmra.mxu1 %vm346_vm3, %v2141_v39  ;;  %7310 = vmatprep.subr.mxu0 %v7800_v12 }
 0x398   : > { %7316 = vmatpush3.msra.mxu1 %v2393_v41  ;;  %7317 = vmatprep.mubr.msk.f32.mxu1 %vm7801_vm1, %v7800_v12 }
 0x399   : > { %7303 = vmatmul.mubr.msk.f32.vlgmr.msra.gmra.mxu0 %vm346_vm3, %v2063_v6  ;;  %7325 = vmatprep.subr.mxu1 %v7800_v12 }
 0x39a   : > { %7311 = vmatpush3.xpose.msk.msra.mxu0 %vm346_vm3, %v2221_v10  ;;  %7312 = vmatprep.mubr.msk.f32.mxu0 %vm7801_vm1, %v7800_v12 }
 0x39b   : > { %7320 = vmatprep.subr.mxu0 %v7800_v12 }
 0x39d   : > { %7313 = vmatmul.mubr.msk.f32.vlgmr.msra.gmra.mxu0 %vm346_vm3, %v2219_v40 }
 0x39e   : > { %7322 = vmatprep.mubr.msk.f32.mxu0 %vm7801_vm1, %v7800_v12 }
 0x406   : > { %v1204_v19 = vpop.f32.mrf.mxu0 }
 0x407   : > { %1665 = vst.msk [vmem:[#allocation2 + $0x8] sm:$0xff] %vm346_vm3, %v1204_v19 }
 0x408   : > { %v7244_v22 = vpop.f32.mrf.mxu0 }
 0x40a   : > { %v1128_v43 = vpop.f32.mrf.mxu1 }
 0x40b   : > { %1664 = vst.msk [vmem:[#allocation2] sm:$0xff] %vm346_vm3, %v1128_v43 }
 0x40c   : > { %v7239_v44 = vpop.f32.mrf.mxu1 }
 0x40e   : > { %v1280_v63 = vpop.f32.mrf.mxu1 }
 0x40f   : > { %1666 = vst.msk [vmem:[#allocation2 + $0x10] sm:$0xff] %vm346_vm3, %v1280_v63 }
 0x410   : > { %v7249_v45 = vpop.f32.mrf.mxu1 }
 0x418   : > { %v1356_v8 = vpop.f32.mrf.mxu0 }
 0x419   : > { %1667 = vst.msk [vmem:[#allocation2 + $0x18] sm:$0xff] %vm346_vm3, %v1356_v8 }
 0x41a   : > { %v7254_v46 = vpop.f32.mrf.mxu0 }
 0x41c   : > { %v1508_v11 = vpop.f32.mrf.mxu0 }
 0x41d   : > { %1669 = vst.msk [vmem:[#allocation2 + $0x28] sm:$0xff] %vm346_vm3, %v1508_v11 }
 0x41e   : > { %v7264_v47 = vpop.f32.mrf.mxu0 }
 0x443   : > { %v1432_v49 = vpop.f32.mrf.mxu1 }
 0x444   : > { %1668 = vst.msk [vmem:[#allocation2 + $0x20] sm:$0xff] %vm346_vm3, %v1432_v49 }
 0x445   : > { %v7259_v50 = vpop.f32.mrf.mxu1 }
 0x447   : > { %v1584_v51 = vpop.f32.mrf.mxu1 }
 0x448   : > { %1670 = vst.msk [vmem:[#allocation2 + $0x30] sm:$0xff] %vm346_vm3, %v1584_v51 }
 0x449   : > { %v7269_v53 = vpop.f32.mrf.mxu1 }
 0x44b   : > { %v1746_v54 = vpop.f32.mrf.mxu1 }
 0x44c   : > { %v2296_v56 = vmul.f32 0.35355338, %v1746_v54 }
 0x44d   : > { %v7279_v57 = vpop.f32.mrf.mxu1  ;;  %v1660_v59 = vpop.f32.mrf.mxu0 }
 0x44e   : > { %v2304_v60 = vsel %vm346_vm3, %v2296_v56, -inf  ;;  %1671 = vst.msk [vmem:[#allocation2 + $0x38] sm:$0xff] %vm346_vm3, %v1660_v59 }
 0x44f   : > { %2305 = vmax.xlane.f32.xlu0 %v2304_v60  ;;  %v1902_v48 = vpop.f32.mrf.mxu1  ;;  %v7274_v61 = vpop.f32.mrf.mxu0 }
 0x450   : > { %v2298_v29 = vmul.f32 0.35355338, %v1902_v48 }
 0x451   : > { %v7289_v58 = vpop.f32.mrf.mxu1  ;;  %v1824_v52 = vpop.f32.mrf.mxu0 }
 0x452   : > { %v2310_v26 = vsel %vm346_vm3, %v2298_v29, -inf  ;;  %v2297_v35 = vmul.f32 0.35355338, %v1824_v52 }
 0x453   : > { %2311 = vmax.xlane.f32.xlu0 %v2310_v26  ;;  %v2058_v62 = vpop.f32.mrf.mxu1  ;;  %v7284_v55 = vpop.f32.mrf.mxu0 }
 0x454   : > { %v2300_v31 = vmul.f32 0.35355338, %v2058_v62  ;;  %v2307_v2 = vsel %vm346_vm3, %v2297_v35, -inf }
 0x455   : > { %v7299_v0 = vpop.f32.mrf.mxu1  ;;  %2308 = vmax.xlane.f32.xlu1 %v2307_v2  ;;  %v1980_v3 = vpop.f32.mrf.mxu0 }
 0x456   : > { %v2299_v4 = vmul.f32 0.35355338, %v1980_v3  ;;  %v2316_v7 = vsel %vm346_vm3, %v2300_v31, -inf }
 0x457   : > { %v2214_v1 = vpop.f32.mrf.mxu1  ;;  %v7294_v37 = vpop.f32.mrf.mxu0 }
 0x458   : > { %v2302_v5 = vmul.f32 0.35355338, %v2214_v1  ;;  %v2313_v9 = vsel %vm346_vm3, %v2299_v4, -inf }
 0x459   : > { %v7309_v6 = vpop.f32.mrf.mxu1  ;;  %2317 = vmax.xlane.f32.xlu1 %v2316_v7  ;;  %2314 = vmax.xlane.f32.xlu0 %v2313_v9  ;;  %v2136_v42 = vpop.f32.mrf.mxu0 }
 0x45a   : > { %v2301_v10 = vmul.f32 0.35355338, %v2136_v42  ;;  %v2322_v38 = vsel %vm346_vm3, %v2302_v5, -inf }
 0x45b   : > { %v7304_v13 = vpop.f32.mrf.mxu0 }
 0x45c   : > { %v2319_v40 = vsel %vm346_vm3, %v2301_v10, -inf }
 0x45d   : > { %2323 = vmax.xlane.f32.xlu1 %v2322_v38  ;;  %2320 = vmax.xlane.f32.xlu0 %v2319_v40  ;;  %v2292_v39 = vpop.f32.mrf.mxu0 }
 0x45e   : > { %v2303_v41 = vmul.f32 0.35355338, %v2292_v39 }
 0x45f   : > { %v7314_v19 = vpop.f32.mrf.mxu0 }
 0x460   : > { %v2325_v22 = vsel %vm346_vm3, %v2303_v41, -inf }
 0x461   : > { %2326 = vmax.xlane.f32.xlu0 %v2325_v22 }
 0x46e   : > { %2544 = vrot.lane.b32.xlu1 %v7912_v20, %s7806_s8 }
 0x472   : > { %2620 = vrot.lane.b32.xlu1 %v7906_v18, %s7806_s8 }
 0x476   : > { %2772 = vrot.lane.b32.xlu1 %v7924_v24, %s7806_s8 }
 0x477   : > { %2468 = vrot.lane.b32.xlu0 %v7896_v15, %s7806_s8 }
 0x47a   : > { %2924 = vrot.lane.b32.xlu1 %v7942_v30, %s7806_s8 }
 0x47b   : > { %2696 = vrot.lane.b32.xlu0 %v7931_v27, %s7806_s8 }
 0x47e   : > { %3121 = vrot.lane.b32.xlu1 %v7896_v15, %s7807_s9 }
 0x47f   : > { %2848 = vrot.lane.b32.xlu0 %v7949_v33, %s7806_s8 }
 0x482   : > { %3119 = vrot.lane.b32.xlu1 %v7896_v15, %s7808_s10 }
 0x483   : > { %3043 = vrot.lane.b32.xlu0 %v7900_v16, %s7807_s9 }
 0x486   : > { %3277 = vrot.lane.b32.xlu1 %v7906_v18, %s7807_s9 }
 0x487   : > { %3041 = vrot.lane.b32.xlu0 %v7900_v16, %s7808_s10 }
 0x48a   : > { %3275 = vrot.lane.b32.xlu1 %v7906_v18, %s7808_s10 }
 0x48b   : > { %3199 = vrot.lane.b32.xlu0 %v7912_v20, %s7807_s9 }
 0x48f   : > { %3197 = vrot.lane.b32.xlu0 %v7912_v20, %s7808_s10 }
 0x4d8   : > { %v2306_v43 = vpop.xlane.xlu0 %2305 }
 0x4d9   : > { %v2328_v44 = vsub.f32 %v2296_v56, %v2306_v43 }
 0x4db   : > { %v2336_v63 = vmul.f32 1.442695, %v2328_v44 }
 0x4dc   : > { %v2312_v45 = vpop.xlane.xlu0 %2311 }
 0x4dd   : > { %7640 = vpow2.f32 %v2336_v63  ;;  %v2330_v8 = vsub.f32 %v2298_v29, %v2312_v45 }
 0x4de   : > { %v2309_v11 = vpop.xlane.xlu1 %2308 }
 0x4df   : > { %v2340_v46 = vmul.f32 1.442695, %v2330_v8  ;;  %v2329_v47 = vsub.f32 %v2297_v35, %v2309_v11 }
 0x4e1   : > { %7642 = vpow2.f32 %v2340_v46  ;;  %v2338_v49 = vmul.f32 1.442695, %v2329_v47 }
 0x4e2   : > { %v2318_v50 = vpop.xlane.xlu1 %2317  ;;  %v2315_v51 = vpop.xlane.xlu0 %2314 }
 0x4e3   : > { %7644 = vpow2.f32 %v2338_v49  ;;  %v2332_v53 = vsub.f32 %v2300_v31, %v2318_v50  ;;  %v2331_v54 = vsub.f32 %v2299_v4, %v2315_v51 }
 0x4e5   : > { %v2344_v57 = vmul.f32 1.442695, %v2332_v53  ;;  %v2342_v59 = vmul.f32 1.442695, %v2331_v54 }
 0x4e6   : > { %v2324_v60 = vpop.xlane.xlu1 %2323  ;;  %v2321_v48 = vpop.xlane.xlu0 %2320 }
 0x4e7   : > { %7646 = vpow2.f32 %v2344_v57  ;;  %v2334_v56 = vsub.f32 %v2302_v5, %v2324_v60  ;;  %v2333_v61 = vsub.f32 %v2301_v10, %v2321_v48 }
 0x4e8   : > { %7648 = vpow2.f32 %v2342_v59 }
 0x4e9   : > { %v2348_v29 = vmul.f32 1.442695, %v2334_v56  ;;  %v2346_v52 = vmul.f32 1.442695, %v2333_v61 }
 0x4ea   : > { %v8274_v58 = vpop.eup %7640  ;;  %v2327_v26 = vpop.xlane.xlu0 %2326 }
 0x4eb   : > { %v2352_v35 = vsel %vm346_vm3, %v8274_v58, 0.0  ;;  %7650 = vpow2.f32 %v2348_v29  ;;  %v2335_v62 = vsub.f32 %v2303_v41, %v2327_v26  ;;  %v2545_v40 = vpop.permute.xlu1 %2544 }
 0x4ec   : > { %2353 = vadd.xlane.f32.xlu1 %v2352_v35  ;;  %7652 = vpow2.f32 %v2346_v52 }
 0x4ed   : > { %v2350_v31 = vmul.f32 1.442695, %v2335_v62 }
 0x4ee   : > { %v8278_v55 = vpop.eup %7642  ;;  %v2469_v0 = vpop.permute.xlu0 %2468 }
 0x4ef   : > { %v2358_v2 = vsel %vm346_vm3, %v8278_v55, 0.0  ;;  %7654 = vpow2.f32 %v2350_v31  ;;  %7321 = vmatpush3.msra.mxu0 %v2469_v0  ;;  %v2621_v39 = vpop.permute.xlu1 %2620 }
 0x4f0   : > { %2359 = vadd.xlane.f32.xlu1 %v2358_v2  ;;  %v8282_v3 = vpop.eup %7644  ;;  %7330 = vmatprep.subr.mxu0 %v7800_v12 }
 0x4f1   : > { %v2355_v4 = vsel %vm346_vm3, %v8282_v3, 0.0 }
 0x4f2   : > { %2356 = vadd.xlane.f32.xlu0 %v2355_v4  ;;  %v2697_v22 = vpop.permute.xlu0 %2696 }
 0x4f3   : > { %v2773_v41 = vpop.permute.xlu1 %2772 }
 0x4f4   : > { %v8287_v1 = vpop.eup %7646 }
 0x4f5   : > { %v8289_v37 = vpop.eup %7648  ;;  %v2364_v5 = vsel %vm346_vm3, %v8287_v1, 0.0 }
 0x4f6   : > { %2365 = vadd.xlane.f32.xlu1 %v2364_v5  ;;  %v2361_v6 = vsel %vm346_vm3, %v8289_v37, 0.0  ;;  %v2849_v44 = vpop.permute.xlu0 %2848 }
 0x4f7   : > { %2362 = vadd.xlane.f32.xlu0 %v2361_v6  ;;  %v8325_v19 = vpop.permute.xlu1 %2924 }
 0x4f8   : > { %v8295_v7 = vpop.eup %7650 }
 0x4f9   : > { %v8297_v9 = vpop.eup %7652  ;;  %v2370_v42 = vsel %vm346_vm3, %v8295_v7, 0.0 }
 0x4fa   : > { %2371 = vadd.xlane.f32.xlu1 %v2370_v42  ;;  %v2367_v10 = vsel %vm346_vm3, %v8297_v9, 0.0  ;;  %v3044_v45 = vpop.permute.xlu0 %3043 }
 0x4fb   : > { %2368 = vadd.xlane.f32.xlu0 %v2367_v10  ;;  %v8327_v43 = vpop.permute.xlu1 %3121 }
 0x4fc   : > { %v8303_v13 = vpop.eup %7654 }
 0x4fd   : > { %v2373_v38 = vsel %vm346_vm3, %v8303_v13, 0.0 }
 0x4fe   : > { %v8333_v46 = vpop.permute.xlu0 %3041 }
 0x4ff   : > { %2374 = vadd.xlane.f32.xlu0 %v2373_v38  ;;  %v8329_v63 = vpop.permute.xlu1 %3119 }
 0x502   : > { %v8337_v47 = vpop.permute.xlu0 %3199 }
 0x503   : > { %v8331_v8 = vpop.permute.xlu1 %3277 }
 0x506   : > { %v8339_v50 = vpop.permute.xlu0 %3197 }
 0x507   : > { %v8335_v11 = vpop.permute.xlu1 %3275 }
 0x50b   : > { %3433 = vrot.lane.b32.xlu1 %v7924_v24, %s7807_s9 }
 0x50f   : > { %3431 = vrot.lane.b32.xlu1 %v7924_v24, %s7808_s10 }
 0x513   : > { %3589 = vrot.lane.b32.xlu1 %v7942_v30, %s7807_s9 }
 0x515   : > { %3355 = vrot.lane.b32.xlu0 %v7931_v27, %s7807_s9 }
 0x517   : > { %3587 = vrot.lane.b32.xlu1 %v7942_v30, %s7808_s10 }
 0x519   : > { %3353 = vrot.lane.b32.xlu0 %v7931_v27, %s7808_s10 }
 0x51b   : > { %3761 = vrot.lane.b32.xlu1 %v7900_v16, %s7809_s11 }
 0x51d   : > { %3511 = vrot.lane.b32.xlu0 %v7949_v33, %s7807_s9 }
 0x521   : > { %3509 = vrot.lane.b32.xlu0 %v7949_v33, %s7808_s10 }
 0x575   : > { %v2354_v49 = vpop.xlane.xlu1 %2353 }
 0x576   : > { %7656 = vrcp.f32 %v2354_v49 }
 0x579   : > { %v2360_v51 = vpop.xlane.xlu1 %2359 }
 0x57a   : > { %7658 = vrcp.f32 %v2360_v51 }
 0x57b   : > { %v2357_v53 = vpop.xlane.xlu0 %2356 }
 0x57c   : > { %7660 = vrcp.f32 %v2357_v53 }
 0x57f   : > { %v2366_v54 = vpop.xlane.xlu1 %2365 }
 0x580   : > { %7662 = vrcp.f32 %v2366_v54  ;;  %v2363_v57 = vpop.xlane.xlu0 %2362 }
 0x581   : > { %7664 = vrcp.f32 %v2363_v57 }
 0x583   : > { %v7657_v59 = vpop.eup %7656  ;;  %v2372_v60 = vpop.xlane.xlu1 %2371 }
 0x584   : > { %v2384_v48 = vmul.f32 %v7657_v59, %v8274_v58  ;;  %7666 = vrcp.f32 %v2372_v60  ;;  %v2369_v56 = vpop.xlane.xlu0 %2368 }
 0x585   : > { %7668 = vrcp.f32 %v2369_v56 }
 0x586   : > { %7318 = vmatmul.mubr.msk.f32.vlgmr.msra.gmra.mxu1 %vm346_vm3, %v2384_v48 }
 0x587   : > { %v7659_v61 = vpop.eup %7658  ;;  %7326 = vmatpush3.msra.mxu1 %v2545_v40  ;;  %7327 = vmatprep.mubr.msk.f32.mxu1 %vm7801_vm1, %v7800_v12  ;;  %v3434_v35 = vpop.permute.xlu1 %3433 }
 0x588   : > { %7335 = vmatprep.subr.mxu1 %v7800_v12  ;;  %v2386_v29 = vmul.f32 %v7659_v61, %v8278_v55  ;;  %v2375_v52 = vpop.xlane.xlu0 %2374 }
 0x589   : > { %v7661_v26 = vpop.eup %7660  ;;  %7670 = vrcp.f32 %v2375_v52 }
 0x58a   : > { %7328 = vmatmul.mubr.msk.f32.vlgmr.msra.gmra.mxu1 %vm346_vm3, %v2386_v29  ;;  %v2385_v58 = vmul.f32 %v7661_v26, %v8282_v3 }
 0x58b   : > { %7336 = vmatpush3.msra.mxu1 %v2697_v22  ;;  %7337 = vmatprep.mubr.msk.f32.mxu1 %vm7801_vm1, %v7800_v12  ;;  %v3432_v5 = vpop.permute.xlu1 %3431 }
 0x58c   : > { %7345 = vmatprep.subr.mxu1 %v7800_v12  ;;  %7323 = vmatmul.mubr.msk.f32.vlgmr.msra.gmra.mxu0 %vm346_vm3, %v2385_v58  ;;  %v3356_v3 = vpop.permute.xlu0 %3355 }
 0x58d   : > { %v7663_v62 = vpop.eup %7662  ;;  %7331 = vmatpush3.msra.mxu0 %v2621_v39  ;;  %7332 = vmatprep.mubr.msk.f32.mxu0 %vm7801_vm1, %v7800_v12 }
 0x58e   : > { %v7665_v55 = vpop.eup %7664  ;;  %7340 = vmatprep.subr.mxu0 %v7800_v12  ;;  %v2388_v31 = vmul.f32 %v7663_v62, %v8287_v1 }
 0x58f   : > { %v2387_v0 = vmul.f32 %v7665_v55, %v8289_v37  ;;  %v3590_v42 = vpop.permute.xlu1 %3589 }
 0x590   : > { %7338 = vmatmul.mubr.msk.f32.vlgmr.msra.gmra.mxu1 %vm346_vm3, %v2388_v31 }
 0x591   : > { %v7667_v2 = vpop.eup %7666  ;;  %7333 = vmatmul.mubr.msk.f32.vlgmr.msra.gmra.mxu0 %vm346_vm3, %v2387_v0  ;;  %7346 = vmatpush3.msra.mxu1 %v2849_v44 }
 0x592   : > { %v7669_v4 = vpop.eup %7668  ;;  %7341 = vmatpush3.msra.mxu0 %v2773_v41  ;;  %7342 = vmatprep.mubr.msk.f32.mxu0 %vm7801_vm1, %v7800_v12  ;;  %v2390_v6 = vmul.f32 %v7667_v2, %v8295_v7  ;;  %v3354_v7 = vpop.permute.xlu0 %3353 }
 0x593   : > { %7347 = vmatprep.mubr.msk.f32.mxu1 %vm7801_vm1, %v7800_v12  ;;  %7350 = vmatprep.subr.mxu0 %v7800_v12  ;;  %v2389_v1 = vmul.f32 %v7669_v4, %v8297_v9 }
 0x594   : > { %7355 = vmatprep.subr.mxu1 %v7800_v12  ;;  %7348 = vmatmul.mubr.msk.f32.vlgmr.msra.gmra.mxu1 %vm346_vm3, %v2390_v6 }
 0x595   : > { %7343 = vmatmul.mubr.msk.f32.vlgmr.msra.gmra.mxu0 %vm346_vm3, %v2389_v1  ;;  %7356 = vmatpush3.xpose.msk.msra.mxu1 %vm346_vm3, %v3044_v45 }
 0x596   : > { %v7671_v37 = vpop.eup %7670  ;;  %7351 = vmatpush3.msra.mxu0 %v8325_v19  ;;  %7352 = vmatprep.mubr.msk.f32.mxu0 %vm7801_vm1, %v7800_v12  ;;  %v3512_v10 = vpop.permute.xlu0 %3511 }
 0x597   : > { %7357 = vmatprep.mubr.msk.f32.mxu1 %vm7801_vm1, %v7800_v12  ;;  %7360 = vmatprep.subr.mxu0 %v7800_v12  ;;  %v2391_v9 = vmul.f32 %v7671_v37, %v8303_v13  ;;  %v3588_v13 = vpop.permute.xlu1 %3587 }
 0x598   : > { %7365 = vmatprep.subr.mxu1 %v7800_v12  ;;  %7358 = vmatmul.mubr.msk.f32.vlgmr.msra.gmra.mxu1 %vm346_vm3, %v8333_v46 }
 0x599   : > { %7353 = vmatmul.mubr.msk.f32.vlgmr.msra.gmra.mxu0 %vm346_vm3, %v2391_v9  ;;  %7366 = vmatpush3.xpose.msk.msra.mxu1 %vm346_vm3, %v8337_v47 }
 0x59a   : > { %7361 = vmatpush3.xpose.msk.msra.mxu0 %vm346_vm3, %v8327_v43  ;;  %7362 = vmatprep.mubr.msk.f32.mxu0 %vm7801_vm1, %v7800_v12  ;;  %v3510_v38 = vpop.permute.xlu0 %3509 }
 0x59b   : > { %7367 = vmatprep.mubr.msk.f32.mxu1 %vm7801_vm1, %v7800_v12  ;;  %7370 = vmatprep.subr.mxu0 %v7800_v12  ;;  %v3762_v40 = vpop.permute.xlu1 %3761 }
 0x59c   : > { %7375 = vmatprep.subr.mxu1 %v7800_v12  ;;  %7368 = vmatmul.mubr.msk.f32.vlgmr.msra.gmra.mxu1 %vm346_vm3, %v8339_v50 }
 0x59d   : > { %7363 = vmatmul.mubr.msk.f32.vlgmr.msra.gmra.mxu0 %vm346_vm3, %v8329_v63  ;;  %7376 = vmatpush3.xpose.msk.msra.mxu1 %vm346_vm3, %v3356_v3 }
 0x59e   : > { %7371 = vmatpush3.xpose.msk.msra.mxu0 %vm346_vm3, %v8331_v8  ;;  %7372 = vmatprep.mubr.msk.f32.mxu0 %vm7801_vm1, %v7800_v12 }
 0x59f   : > { %7377 = vmatprep.mubr.msk.f32.mxu1 %vm7801_vm1, %v7800_v12  ;;  %7380 = vmatprep.subr.mxu0 %v7800_v12 }
 0x5a0   : > { %7385 = vmatprep.subr.mxu1 %v7800_v12  ;;  %7378 = vmatmul.mubr.msk.f32.vlgmr.msra.gmra.mxu1 %vm346_vm3, %v3354_v7 }
 0x5a1   : > { %7373 = vmatmul.mubr.msk.f32.vlgmr.msra.gmra.mxu0 %vm346_vm3, %v8335_v11  ;;  %7386 = vmatpush3.xpose.msk.msra.mxu1 %vm346_vm3, %v3512_v10 }
 0x5a2   : > { %7381 = vmatpush3.xpose.msk.msra.mxu0 %vm346_vm3, %v3434_v35  ;;  %7382 = vmatprep.mubr.msk.f32.mxu0 %vm7801_vm1, %v7800_v12 }
 0x5a3   : > { %7387 = vmatprep.mubr.msk.f32.mxu1 %vm7801_vm1, %v7800_v12  ;;  %7390 = vmatprep.subr.mxu0 %v7800_v12 }
 0x5a4   : > { %7395 = vmatprep.subr.mxu1 %v7800_v12  ;;  %7388 = vmatmul.mubr.msk.f32.vlgmr.msra.gmra.mxu1 %vm346_vm3, %v3510_v38 }
 0x5a5   : > { %7383 = vmatmul.mubr.msk.f32.vlgmr.msra.gmra.mxu0 %vm346_vm3, %v3432_v5  ;;  %7396 = vmatpush3.msra.mxu1 %v3762_v40 }
 0x5a6   : > { %7391 = vmatpush3.xpose.msk.msra.mxu0 %vm346_vm3, %v3590_v42  ;;  %7392 = vmatprep.mubr.msk.f32.mxu0 %vm7801_vm1, %v7800_v12 }
 0x5a7   : > { %7400 = vmatprep.subr.mxu0 %v7800_v12  ;;  %7397 = vmatprep.mubr.msk.f32.mxu1 %vm7801_vm1, %v7800_v12 }
 0x5a8   : > { %7405 = vmatprep.subr.mxu1 %v7800_v12 }
 0x5a9   : > { %7393 = vmatmul.mubr.msk.f32.vlgmr.msra.gmra.mxu0 %vm346_vm3, %v3588_v13 }
 0x5aa   : > { %7402 = vmatprep.mubr.msk.f32.mxu0 %vm7801_vm1, %v7800_v12 }
 0x646   : > { %v8428_v39 = vpop.f32.mrf.mxu1 }
 0x648   : > { %v7319_v41 = vpop.f32.mrf.mxu1 }
 0x64a   : > { %v8430_v19 = vpop.f32.mrf.mxu1 }
 0x64c   : > { %v7329_v22 = vpop.f32.mrf.mxu1  ;;  %v8432_v43 = vpop.f32.mrf.mxu0 }
 0x64e   : > { %v7324_v44 = vpop.f32.mrf.mxu0 }
 0x650   : > { %v8434_v63 = vpop.f32.mrf.mxu1 }
 0x651   : > { %v8436_v45 = vpop.f32.mrf.mxu0 }
 0x652   : > { %v7339_v8 = vpop.f32.mrf.mxu1 }
 0x653   : > { %v7334_v46 = vpop.f32.mrf.mxu0 }
 0x654   : > { %v8438_v11 = vpop.f32.mrf.mxu1 }
 0x655   : > { %v8440_v47 = vpop.f32.mrf.mxu0 }
 0x656   : > { %v7349_v49 = vpop.f32.mrf.mxu1 }
 0x657   : > { %v7344_v50 = vpop.f32.mrf.mxu0 }
 0x658   : > { %v3115_v51 = vpop.f32.mrf.mxu1 }
 0x659   : > { %v8442_v53 = vpop.f32.mrf.mxu0  ;;  %v3665_v54 = vmul.f32 0.35355338, %v3115_v51 }
 0x65a   : > { %v7359_v57 = vpop.f32.mrf.mxu1 }
 0x65b   : > { %v7354_v59 = vpop.f32.mrf.mxu0  ;;  %v3673_v60 = vsel %vm346_vm3, %v3665_v54, -inf }
 0x65c   : > { %3674 = vmax.xlane.f32.xlu0 %v3673_v60  ;;  %v3271_v48 = vpop.f32.mrf.mxu1 }
 0x65d   : > { %v3193_v56 = vpop.f32.mrf.mxu0  ;;  %v3667_v61 = vmul.f32 0.35355338, %v3271_v48 }
 0x65e   : > { %v3666_v29 = vmul.f32 0.35355338, %v3193_v56  ;;  %v7369_v52 = vpop.f32.mrf.mxu1 }
 0x65f   : > { %v7364_v26 = vpop.f32.mrf.mxu0  ;;  %v3679_v58 = vsel %vm346_vm3, %v3667_v61, -inf }
 0x660   : > { %3680 = vmax.xlane.f32.xlu0 %v3679_v58  ;;  %v3427_v35 = vpop.f32.mrf.mxu1  ;;  %v3676_v62 = vsel %vm346_vm3, %v3666_v29, -inf }
 0x661   : > { %v3669_v55 = vmul.f32 0.35355338, %v3427_v35  ;;  %3677 = vmax.xlane.f32.xlu1 %v3676_v62  ;;  %v3349_v31 = vpop.f32.mrf.mxu0 }
 0x662   : > { %v3668_v0 = vmul.f32 0.35355338, %v3349_v31  ;;  %v7379_v2 = vpop.f32.mrf.mxu1 }
 0x663   : > { %v7374_v3 = vpop.f32.mrf.mxu0  ;;  %v3685_v4 = vsel %vm346_vm3, %v3669_v55, -inf }
 0x664   : > { %v3583_v5 = vpop.f32.mrf.mxu1  ;;  %v3682_v6 = vsel %vm346_vm3, %v3668_v0, -inf }
 0x665   : > { %v3671_v1 = vmul.f32 0.35355338, %v3583_v5  ;;  %3686 = vmax.xlane.f32.xlu1 %v3685_v4  ;;  %3683 = vmax.xlane.f32.xlu0 %v3682_v6  ;;  %v3505_v37 = vpop.f32.mrf.mxu0 }
 0x666   : > { %v3670_v7 = vmul.f32 0.35355338, %v3505_v37  ;;  %v7389_v9 = vpop.f32.mrf.mxu1 }
 0x667   : > { %v7384_v42 = vpop.f32.mrf.mxu0  ;;  %v3691_v10 = vsel %vm346_vm3, %v3671_v1, -inf }
 0x668   : > { %v3688_v13 = vsel %vm346_vm3, %v3670_v7, -inf }
 0x669   : > { %3692 = vmax.xlane.f32.xlu1 %v3691_v10  ;;  %3689 = vmax.xlane.f32.xlu0 %v3688_v13  ;;  %v3661_v38 = vpop.f32.mrf.mxu0 }
 0x66a   : > { %v3672_v40 = vmul.f32 0.35355338, %v3661_v38 }
 0x66b   : > { %v7394_v41 = vpop.f32.mrf.mxu0 }
 0x66c   : > { %v3694_v22 = vsel %vm346_vm3, %v3672_v40, -inf }
 0x66d   : > { %3695 = vmax.xlane.f32.xlu0 %v3694_v22 }
 0x67a   : > { %3913 = vrot.lane.b32.xlu1 %v7912_v20, %s7809_s11 }
 0x67e   : > { %3989 = vrot.lane.b32.xlu1 %v7906_v18, %s7809_s11 }
 0x682   : > { %4141 = vrot.lane.b32.xlu1 %v7924_v24, %s7809_s11 }
 0x683   : > { %3837 = vrot.lane.b32.xlu0 %v7896_v15, %s7809_s11 }
 0x686   : > { %4293 = vrot.lane.b32.xlu1 %v7942_v30, %s7809_s11 }
 0x687   : > { %4065 = vrot.lane.b32.xlu0 %v7931_v27, %s7809_s11 }
 0x68a   : > { %4490 = vrot.lane.b32.xlu1 %v7896_v15, %s7810_s12 }
 0x68b   : > { %4217 = vrot.lane.b32.xlu0 %v7949_v33, %s7809_s11 }
 0x68e   : > { %4488 = vrot.lane.b32.xlu1 %v7896_v15, %s7811_s13 }
 0x68f   : > { %4412 = vrot.lane.b32.xlu0 %v7900_v16, %s7810_s12 }
 0x692   : > { %4646 = vrot.lane.b32.xlu1 %v7906_v18, %s7810_s12 }
 0x693   : > { %4410 = vrot.lane.b32.xlu0 %v7900_v16, %s7811_s13 }
 0x696   : > { %4644 = vrot.lane.b32.xlu1 %v7906_v18, %s7811_s13 }
 0x697   : > { %4568 = vrot.lane.b32.xlu0 %v7912_v20, %s7810_s12 }
 0x69b   : > { %4566 = vrot.lane.b32.xlu0 %v7912_v20, %s7811_s13 }
 0x6e5   : > { %v3675_v44 = vpop.xlane.xlu0 %3674 }
 0x6e6   : > { %v3697_v8 = vsub.f32 %v3665_v54, %v3675_v44 }
 0x6e8   : > { %v3705_v46 = vmul.f32 1.442695, %v3697_v8 }
 0x6e9   : > { %v3681_v49 = vpop.xlane.xlu0 %3680 }
 0x6ea   : > { %7672 = vpow2.f32 %v3705_v46  ;;  %v3699_v50 = vsub.f32 %v3667_v61, %v3681_v49  ;;  %v3678_v51 = vpop.xlane.xlu1 %3677 }
 0x6eb   : > { %v3698_v57 = vsub.f32 %v3666_v29, %v3678_v51 }
 0x6ec   : > { %v3709_v59 = vmul.f32 1.442695, %v3699_v50 }
 0x6ed   : > { %v3707_v60 = vmul.f32 1.442695, %v3698_v57 }
 0x6ee   : > { %7674 = vpow2.f32 %v3709_v59  ;;  %v3687_v48 = vpop.xlane.xlu1 %3686  ;;  %v3684_v56 = vpop.xlane.xlu0 %3683 }
 0x6ef   : > { %7676 = vpow2.f32 %v3707_v60  ;;  %v3701_v52 = vsub.f32 %v3669_v55, %v3687_v48  ;;  %v3700_v26 = vsub.f32 %v3668_v0, %v3684_v56 }
 0x6f1   : > { %v3713_v58 = vmul.f32 1.442695, %v3701_v52  ;;  %v3711_v35 = vmul.f32 1.442695, %v3700_v26 }
 0x6f2   : > { %v3693_v62 = vpop.xlane.xlu1 %3692  ;;  %v3690_v31 = vpop.xlane.xlu0 %3689 }
 0x6f3   : > { %7678 = vpow2.f32 %v3713_v58  ;;  %v3703_v54 = vsub.f32 %v3671_v1, %v3693_v62  ;;  %v3702_v2 = vsub.f32 %v3670_v7, %v3690_v31 }
 0x6f4   : > { %7680 = vpow2.f32 %v3711_v35 }
 0x6f5   : > { %v3717_v3 = vmul.f32 1.442695, %v3703_v54  ;;  %v3715_v61 = vmul.f32 1.442695, %v3702_v2 }
 0x6f6   : > { %v3696_v4 = vpop.xlane.xlu0 %3695  ;;  %v3914_v49 = vpop.permute.xlu1 %3913 }
 0x6f7   : > { %v8482_v29 = vpop.eup %7672  ;;  %7682 = vpow2.f32 %v3717_v3  ;;  %v3704_v5 = vsub.f32 %v3672_v40, %v3696_v4 }
 0x6f8   : > { %7684 = vpow2.f32 %v3715_v61  ;;  %v3721_v55 = vsel %vm346_vm3, %v8482_v29, 0.0 }
 0x6f9   : > { %v3719_v0 = vmul.f32 1.442695, %v3704_v5  ;;  %3722 = vadd.xlane.f32.xlu1 %v3721_v55 }
 0x6fa   : > { %v3838_v6 = vpop.permute.xlu0 %3837  ;;  %v3990_v50 = vpop.permute.xlu1 %3989 }
 0x6fb   : > { %v8486_v37 = vpop.eup %7674  ;;  %7686 = vpow2.f32 %v3719_v0  ;;  %7401 = vmatpush3.msra.mxu0 %v3838_v6 }
 0x6fc   : > { %v8488_v1 = vpop.eup %7676  ;;  %v3727_v7 = vsel %vm346_vm3, %v8486_v37, 0.0  ;;  %7410 = vmatprep.subr.mxu0 %v7800_v12 }
 0x6fd   : > { %3728 = vadd.xlane.f32.xlu1 %v3727_v7  ;;  %v3724_v9 = vsel %vm346_vm3, %v8488_v1, 0.0 }
 0x6fe   : > { %3725 = vadd.xlane.f32.xlu0 %v3724_v9  ;;  %v4142_v51 = vpop.permute.xlu1 %4141  ;;  %v4066_v57 = vpop.permute.xlu0 %4065 }
 0x700   : > { %v8495_v42 = vpop.eup %7678 }
 0x701   : > { %v8497_v10 = vpop.eup %7680  ;;  %v3733_v13 = vsel %vm346_vm3, %v8495_v42, 0.0 }
 0x702   : > { %3734 = vadd.xlane.f32.xlu1 %v3733_v13  ;;  %v3730_v38 = vsel %vm346_vm3, %v8497_v10, 0.0  ;;  %v8531_v59 = vpop.permute.xlu1 %4293  ;;  %v4218_v60 = vpop.permute.xlu0 %4217 }
 0x703   : > { %3731 = vadd.xlane.f32.xlu0 %v3730_v38 }
 0x704   : > { %v8503_v40 = vpop.eup %7682 }
 0x705   : > { %v8505_v41 = vpop.eup %7684  ;;  %v3739_v22 = vsel %vm346_vm3, %v8503_v40, 0.0 }
 0x706   : > { %3740 = vadd.xlane.f32.xlu1 %v3739_v22  ;;  %v3736_v44 = vsel %vm346_vm3, %v8505_v41, 0.0  ;;  %v8533_v48 = vpop.permute.xlu1 %4490  ;;  %v4413_v56 = vpop.permute.xlu0 %4412 }
 0x707   : > { %3737 = vadd.xlane.f32.xlu0 %v3736_v44 }
 0x708   : > { %v8511_v8 = vpop.eup %7686 }
 0x709   : > { %v3742_v46 = vsel %vm346_vm3, %v8511_v8, 0.0 }
 0x70a   : > { %v8535_v52 = vpop.permute.xlu1 %4488  ;;  %v8537_v26 = vpop.permute.xlu0 %4410 }
 0x70b   : > { %3743 = vadd.xlane.f32.xlu0 %v3742_v46 }
 0x70e   : > { %v8539_v58 = vpop.permute.xlu1 %4646  ;;  %v8541_v35 = vpop.permute.xlu0 %4568 }
 0x712   : > { %v8543_v62 = vpop.permute.xlu1 %4644  ;;  %v8545_v54 = vpop.permute.xlu0 %4566 }
 0x717   : > { %4802 = vrot.lane.b32.xlu1 %v7924_v24, %s7810_s12 }
 0x71b   : > { %4800 = vrot.lane.b32.xlu1 %v7924_v24, %s7811_s13 }
 0x71f   : > { %4958 = vrot.lane.b32.xlu1 %v7942_v30, %s7810_s12 }
 0x721   : > { %4724 = vrot.lane.b32.xlu0 %v7931_v27, %s7810_s12 }
 0x723   : > { %4956 = vrot.lane.b32.xlu1 %v7942_v30, %s7811_s13 }
 0x725   : > { %4722 = vrot.lane.b32.xlu0 %v7931_v27, %s7811_s13 }
 0x729   : > { %4880 = vrot.lane.b32.xlu0 %v7949_v33, %s7810_s12 }
 0x72d   : > { %4878 = vrot.lane.b32.xlu0 %v7949_v33, %s7811_s13 }
 0x782   : > { %v3723_v31 = vpop.xlane.xlu1 %3722 }
 0x783   : > { %7688 = vrcp.f32 %v3723_v31 }
 0x786   : > { %v3729_v2 = vpop.xlane.xlu1 %3728 }
 0x787   : > { %7690 = vrcp.f32 %v3729_v2  ;;  %v3726_v3 = vpop.xlane.xlu0 %3725 }
 0x788   : > { %7692 = vrcp.f32 %v3726_v3 }
 0x78b   : > { %v3735_v61 = vpop.xlane.xlu1 %3734 }
 0x78c   : > { %7694 = vrcp.f32 %v3735_v61  ;;  %v3732_v4 = vpop.xlane.xlu0 %3731 }
 0x78d   : > { %7696 = vrcp.f32 %v3732_v4 }
 0x78f   : > { %v3741_v5 = vpop.xlane.xlu1 %3740 }
 0x790   : > { %v7689_v55 = vpop.eup %7688  ;;  %7698 = vrcp.f32 %v3741_v5  ;;  %v3738_v0 = vpop.xlane.xlu0 %3737 }
 0x791   : > { %7700 = vrcp.f32 %v3738_v0  ;;  %v3753_v6 = vmul.f32 %v7689_v55, %v8482_v29 }
 0x793   : > { %7398 = vmatmul.mubr.msk.f32.vlgmr.msra.gmra.mxu1 %vm346_vm3, %v3753_v6 }
 0x794   : > { %v7691_v7 = vpop.eup %7690  ;;  %v3744_v9 = vpop.xlane.xlu0 %3743  ;;  %7406 = vmatpush3.msra.mxu1 %v3914_v49  ;;  %7407 = vmatprep.mubr.msk.f32.mxu1 %vm7801_vm1, %v7800_v12 }
 0x795   : > { %v7693_v13 = vpop.eup %7692  ;;  %7702 = vrcp.f32 %v3744_v9  ;;  %7415 = vmatprep.subr.mxu1 %v7800_v12  ;;  %v3755_v38 = vmul.f32 %v7691_v7, %v8486_v37 }
 0x796   : > { %v3754_v22 = vmul.f32 %v7693_v13, %v8488_v1 }
 0x797   : > { %7408 = vmatmul.mubr.msk.f32.vlgmr.msra.gmra.mxu1 %vm346_vm3, %v3755_v38 }
 0x798   : > { %7403 = vmatmul.mubr.msk.f32.vlgmr.msra.gmra.mxu0 %vm346_vm3, %v3754_v22  ;;  %7416 = vmatpush3.msra.mxu1 %v4066_v57  ;;  %v4725_v49 = vpop.permute.xlu0 %4724 }
 0x799   : > { %v7695_v29 = vpop.eup %7694  ;;  %7411 = vmatpush3.msra.mxu0 %v3990_v50  ;;  %7417 = vmatprep.mubr.msk.f32.mxu1 %vm7801_vm1, %v7800_v12 }
 0x79a   : > { %v7697_v44 = vpop.eup %7696  ;;  %7412 = vmatprep.mubr.msk.f32.mxu0 %vm7801_vm1, %v7800_v12  ;;  %7420 = vmatprep.subr.mxu0 %v7800_v12  ;;  %v3757_v37 = vmul.f32 %v7695_v29, %v8495_v42 }
 0x79b   : > { %7425 = vmatprep.subr.mxu1 %v7800_v12  ;;  %v3756_v1 = vmul.f32 %v7697_v44, %v8497_v10 }
 0x79c   : > { %7418 = vmatmul.mubr.msk.f32.vlgmr.msra.gmra.mxu1 %vm346_vm3, %v3757_v37 }
 0x79d   : > { %v7699_v46 = vpop.eup %7698  ;;  %7413 = vmatmul.mubr.msk.f32.vlgmr.msra.gmra.mxu0 %vm346_vm3, %v3756_v1  ;;  %7426 = vmatpush3.msra.mxu1 %v4218_v60 }
 0x79e   : > { %v7701_v50 = vpop.eup %7700  ;;  %7421 = vmatpush3.msra.mxu0 %v4142_v51  ;;  %7422 = vmatprep.mubr.msk.f32.mxu0 %vm7801_vm1, %v7800_v12  ;;  %v3759_v57 = vmul.f32 %v7699_v46, %v8503_v40  ;;  %v4803_v51 = vpop.permute.xlu1 %4802 }
 0x79f   : > { %7427 = vmatprep.mubr.msk.f32.mxu1 %vm7801_vm1, %v7800_v12  ;;  %7430 = vmatprep.subr.mxu0 %v7800_v12  ;;  %v3758_v42 = vmul.f32 %v7701_v50, %v8505_v41  ;;  %v4723_v40 = vpop.permute.xlu0 %4722 }
 0x7a0   : > { %7435 = vmatprep.subr.mxu1 %v7800_v12  ;;  %7428 = vmatmul.mubr.msk.f32.vlgmr.msra.gmra.mxu1 %vm346_vm3, %v3759_v57 }
 0x7a1   : > { %7423 = vmatmul.mubr.msk.f32.vlgmr.msra.gmra.mxu0 %vm346_vm3, %v3758_v42  ;;  %7436 = vmatpush3.xpose.msk.msra.mxu1 %vm346_vm3, %v4413_v56 }
 0x7a2   : > { %v7703_v10 = vpop.eup %7702  ;;  %7431 = vmatpush3.msra.mxu0 %v8531_v59  ;;  %7432 = vmatprep.mubr.msk.f32.mxu0 %vm7801_vm1, %v7800_v12 }
 0x7a3   : > { %7437 = vmatprep.mubr.msk.f32.mxu1 %vm7801_vm1, %v7800_v12  ;;  %7440 = vmatprep.subr.mxu0 %v7800_v12  ;;  %v3760_v41 = vmul.f32 %v7703_v10, %v8511_v8  ;;  %v4801_v8 = vpop.permute.xlu1 %4800  ;;  %v4881_v59 = vpop.permute.xlu0 %4880 }
 0x7a4   : > { %7445 = vmatprep.subr.mxu1 %v7800_v12  ;;  %7438 = vmatmul.mubr.msk.f32.vlgmr.msra.gmra.mxu1 %vm346_vm3, %v8537_v26 }
 0x7a5   : > { %7433 = vmatmul.mubr.msk.f32.vlgmr.msra.gmra.mxu0 %vm346_vm3, %v3760_v41  ;;  %7446 = vmatpush3.xpose.msk.msra.mxu1 %vm346_vm3, %v8541_v35 }
 0x7a6   : > { %7441 = vmatpush3.xpose.msk.msra.mxu0 %vm346_vm3, %v8533_v48  ;;  %7442 = vmatprep.mubr.msk.f32.mxu0 %vm7801_vm1, %v7800_v12 }
 0x7a7   : > { %7447 = vmatprep.mubr.msk.f32.mxu1 %vm7801_vm1, %v7800_v12  ;;  %7450 = vmatprep.subr.mxu0 %v7800_v12  ;;  %v4959_v60 = vpop.permute.xlu1 %4958  ;;  %v4879_v48 = vpop.permute.xlu0 %4878 }
 0x7a8   : > { %7455 = vmatprep.subr.mxu1 %v7800_v12  ;;  %7448 = vmatmul.mubr.msk.f32.vlgmr.msra.gmra.mxu1 %vm346_vm3, %v8545_v54 }
 0x7a9   : > { %7443 = vmatmul.mubr.msk.f32.vlgmr.msra.gmra.mxu0 %vm346_vm3, %v8535_v52  ;;  %7456 = vmatpush3.xpose.msk.msra.mxu1 %vm346_vm3, %v4725_v49 }
 0x7aa   : > { %7451 = vmatpush3.xpose.msk.msra.mxu0 %vm346_vm3, %v8539_v58  ;;  %7452 = vmatprep.mubr.msk.f32.mxu0 %vm7801_vm1, %v7800_v12 }
 0x7ab   : > { %7457 = vmatprep.mubr.msk.f32.mxu1 %vm7801_vm1, %v7800_v12  ;;  %7460 = vmatprep.subr.mxu0 %v7800_v12  ;;  %v4957_v56 = vpop.permute.xlu1 %4956 }
 0x7ac   : > { %7465 = vmatprep.subr.mxu1 %v7800_v12  ;;  %7458 = vmatmul.mubr.msk.f32.vlgmr.msra.gmra.mxu1 %vm346_vm3, %v4723_v40 }
 0x7ad   : > { %7453 = vmatmul.mubr.msk.f32.vlgmr.msra.gmra.mxu0 %vm346_vm3, %v8543_v62  ;;  %7466 = vmatpush3.xpose.msk.msra.mxu1 %vm346_vm3, %v4881_v59 }
 0x7ae   : > { %7461 = vmatpush3.xpose.msk.msra.mxu0 %vm346_vm3, %v4803_v51  ;;  %7462 = vmatprep.mubr.msk.f32.mxu0 %vm7801_vm1, %v7800_v12 }
 0x7af   : > { %7467 = vmatprep.mubr.msk.f32.mxu1 %vm7801_vm1, %v7800_v12  ;;  %7470 = vmatprep.subr.mxu0 %v7800_v12 }
 0x7b0   : > { %7468 = vmatmul.mubr.msk.f32.vlgmr.msra.gmra.mxu1 %vm346_vm3, %v4879_v48  ;;  %7475 = vmatprep.subr.mxu1 %v7800_v12 }
 0x7b1   : > { %7463 = vmatmul.mubr.msk.f32.vlgmr.msra.gmra.mxu0 %vm346_vm3, %v4801_v8  ;;  %7477 = vmatprep.mubr.msk.f32.mxu1 %vm7801_vm1, %v7800_v12 }
 0x7b2   : > { %7471 = vmatpush3.xpose.msk.msra.mxu0 %vm346_vm3, %v4959_v60  ;;  %7472 = vmatprep.mubr.msk.f32.mxu0 %vm7801_vm1, %v7800_v12 }
 0x7b3   : > { %7480 = vmatprep.subr.mxu0 %v7800_v12 }
 0x7b5   : > { %7473 = vmatmul.mubr.msk.f32.vlgmr.msra.gmra.mxu0 %vm346_vm3, %v4957_v56 }
 0x7b6   : > { %7482 = vmatprep.mubr.msk.f32.mxu0 %vm7801_vm1, %v7800_v12 }
 0x853   : > { %v8633_v52 = vpop.f32.mrf.mxu1 }
 0x855   : > { %v7399_v26 = vpop.f32.mrf.mxu1 }
 0x857   : > { %v8635_v58 = vpop.f32.mrf.mxu1 }
 0x858   : > { %v8637_v35 = vpop.f32.mrf.mxu0 }
 0x859   : > { %v7409_v62 = vpop.f32.mrf.mxu1 }
 0x85a   : > { %v7404_v31 = vpop.f32.mrf.mxu0 }
 0x85c   : > { %v8639_v54 = vpop.f32.mrf.mxu1 }
 0x85d   : > { %v8641_v2 = vpop.f32.mrf.mxu0 }
 0x85e   : > { %v7419_v3 = vpop.f32.mrf.mxu1 }
 0x85f   : > { %v7414_v61 = vpop.f32.mrf.mxu0 }
 0x860   : > { %v8643_v4 = vpop.f32.mrf.mxu1 }
 0x861   : > { %v8645_v5 = vpop.f32.mrf.mxu0 }
 0x862   : > { %v7429_v55 = vpop.f32.mrf.mxu1 }
 0x863   : > { %v7424_v0 = vpop.f32.mrf.mxu0 }
 0x864   : > { %v4484_v6 = vpop.f32.mrf.mxu1 }
 0x865   : > { %v8647_v7 = vpop.f32.mrf.mxu0  ;;  %v5034_v9 = vmul.f32 0.35355338, %v4484_v6 }
 0x866   : > { %v7439_v13 = vpop.f32.mrf.mxu1 }
 0x867   : > { %v7434_v38 = vpop.f32.mrf.mxu0  ;;  %v5042_v22 = vsel %vm346_vm3, %v5034_v9, -inf }
 0x868   : > { %5043 = vmax.xlane.f32.xlu0 %v5042_v22  ;;  %v4640_v29 = vpop.f32.mrf.mxu1 }
 0x869   : > { %v4562_v44 = vpop.f32.mrf.mxu0  ;;  %v5036_v37 = vmul.f32 0.35355338, %v4640_v29 }
 0x86a   : > { %v5035_v1 = vmul.f32 0.35355338, %v4562_v44  ;;  %v7449_v46 = vpop.f32.mrf.mxu1 }
 0x86b   : > { %v7444_v49 = vpop.f32.mrf.mxu0  ;;  %v5048_v50 = vsel %vm346_vm3, %v5036_v37, -inf }
 0x86c   : > { %5049 = vmax.xlane.f32.xlu0 %v5048_v50  ;;  %v4796_v57 = vpop.f32.mrf.mxu1  ;;  %v5045_v42 = vsel %vm346_vm3, %v5035_v1, -inf }
 0x86d   : > { %v5038_v10 = vmul.f32 0.35355338, %v4796_v57  ;;  %5046 = vmax.xlane.f32.xlu1 %v5045_v42  ;;  %v4718_v51 = vpop.f32.mrf.mxu0 }
 0x86e   : > { %v5037_v40 = vmul.f32 0.35355338, %v4718_v51  ;;  %v7459_v41 = vpop.f32.mrf.mxu1 }
 0x86f   : > { %v7454_v8 = vpop.f32.mrf.mxu0  ;;  %v5054_v59 = vsel %vm346_vm3, %v5038_v10, -inf }
 0x870   : > { %v4952_v60 = vpop.f32.mrf.mxu1  ;;  %v5051_v48 = vsel %vm346_vm3, %v5037_v40, -inf }
 0x871   : > { %v5040_v56 = vmul.f32 0.35355338, %v4952_v60  ;;  %5055 = vmax.xlane.f32.xlu1 %v5054_v59  ;;  %5052 = vmax.xlane.f32.xlu0 %v5051_v48  ;;  %v4874_v26 = vpop.f32.mrf.mxu0 }
 0x872   : > { %v5039_v62 = vmul.f32 0.35355338, %v4874_v26  ;;  %v7469_v31 = vpop.f32.mrf.mxu1 }
 0x873   : > { %v7464_v3 = vpop.f32.mrf.mxu0  ;;  %v5060_v61 = vsel %vm346_vm3, %v5040_v56, -inf }
 0x874   : > { %v5057_v55 = vsel %vm346_vm3, %v5039_v62, -inf }
 0x875   : > { %5061 = vmax.xlane.f32.xlu1 %v5060_v61  ;;  %5058 = vmax.xlane.f32.xlu0 %v5057_v55  ;;  %v5030_v0 = vpop.f32.mrf.mxu0 }
 0x876   : > { %v5041_v6 = vmul.f32 0.35355338, %v5030_v0 }
 0x877   : > { %v7474_v13 = vpop.f32.mrf.mxu0 }
 0x878   : > { %v5063_v38 = vsel %vm346_vm3, %v5041_v6, -inf }
 0x879   : > { %5064 = vmax.xlane.f32.xlu0 %v5063_v38 }
 0x886   : > { %5130 = vrot.lane.b32.xlu1 %v7900_v16, %s7812_s14 }
 0x88a   : > { %5282 = vrot.lane.b32.xlu1 %v7912_v20, %s7812_s14 }
 0x88e   : > { %5358 = vrot.lane.b32.xlu1 %v7906_v18, %s7812_s14 }
 0x88f   : > { %5206 = vrot.lane.b32.xlu0 %v7896_v15, %s7812_s14 }
 0x892   : > { %5510 = vrot.lane.b32.xlu1 %v7924_v24, %s7812_s14 }
 0x893   : > { %5434 = vrot.lane.b32.xlu0 %v7931_v27, %s7812_s14 }
 0x8f1   : > { %v5044_v22 = vpop.xlane.xlu0 %5043 }
 0x8f2   : > { %v5066_v29 = vsub.f32 %v5034_v9, %v5044_v22 }
 0x8f4   : > { %v5074_v44 = vmul.f32 1.442695, %v5066_v29 }
 0x8f5   : > { %v5050_v46 = vpop.xlane.xlu0 %5049 }
 0x8f6   : > { %7704 = vpow2.f32 %v5074_v44  ;;  %v5068_v49 = vsub.f32 %v5036_v37, %v5050_v46  ;;  %v5047_v50 = vpop.xlane.xlu1 %5046 }
 0x8f7   : > { %v5067_v20 = vsub.f32 %v5035_v1, %v5047_v50 }
 0x8f8   : > { %v5078_v57 = vmul.f32 1.442695, %v5068_v49 }
 0x8f9   : > { %v5076_v42 = vmul.f32 1.442695, %v5067_v20 }
 0x8fa   : > { %7706 = vpow2.f32 %v5078_v57  ;;  %v5056_v18 = vpop.xlane.xlu1 %5055  ;;  %v5053_v51 = vpop.xlane.xlu0 %5052 }
 0x8fb   : > { %7708 = vpow2.f32 %v5076_v42  ;;  %v5070_v41 = vsub.f32 %v5038_v10, %v5056_v18  ;;  %v5069_v8 = vsub.f32 %v5037_v40, %v5053_v51 }
 0x8fd   : > { %v5082_v24 = vmul.f32 1.442695, %v5070_v41  ;;  %v5080_v59 = vmul.f32 1.442695, %v5069_v8 }
 0x8fe   : > { %v5062_v60 = vpop.xlane.xlu1 %5061  ;;  %v5059_v27 = vpop.xlane.xlu0 %5058 }
 0x8ff   : > { %7710 = vpow2.f32 %v5082_v24  ;;  %v5072_v9 = vsub.f32 %v5040_v56, %v5062_v60  ;;  %v5071_v48 = vsub.f32 %v5039_v62, %v5059_v27 }
 0x900   : > { %7712 = vpow2.f32 %v5080_v59 }
 0x901   : > { %v5086_v26 = vmul.f32 1.442695, %v5072_v9  ;;  %v5084_v37 = vmul.f32 1.442695, %v5071_v48 }
 0x902   : > { %v5131_v31 = vpop.permute.xlu1 %5130  ;;  %v5065_v1 = vpop.xlane.xlu0 %5064 }
 0x903   : > { %v8669_v3 = vpop.eup %7704  ;;  %7714 = vpow2.f32 %v5086_v26  ;;  %v5073_v61 = vsub.f32 %v5041_v6, %v5065_v1  ;;  %7476 = vmatpush3.msra.mxu1 %v5131_v31 }
 0x904   : > { %7716 = vpow2.f32 %v5084_v37  ;;  %v5090_v10 = vsel %vm346_vm3, %v8669_v3, 0.0  ;;  %7485 = vmatprep.subr.mxu1 %v7800_v12 }
 0x905   : > { %v5088_v40 = vmul.f32 1.442695, %v5073_v61  ;;  %5091 = vadd.xlane.f32.xlu1 %v5090_v10 }
 0x906   : > { %v5207_v56 = vpop.permute.xlu0 %5206 }
 0x907   : > { %v8674_v62 = vpop.eup %7706  ;;  %7718 = vpow2.f32 %v5088_v40  ;;  %7481 = vmatpush3.msra.mxu0 %v5207_v56 }
 0x908   : > { %v8676_v55 = vpop.eup %7708  ;;  %v5096_v0 = vsel %vm346_vm3, %v8674_v62, 0.0  ;;  %7490 = vmatprep.subr.mxu0 %v7800_v12 }
 0x909   : > { %5097 = vadd.xlane.f32.xlu1 %v5096_v0  ;;  %v5093_v6 = vsel %vm346_vm3, %v8676_v55, 0.0 }
 0x90a   : > { %5094 = vadd.xlane.f32.xlu0 %v5093_v6 }
 0x90c   : > { %v8683_v13 = vpop.eup %7710 }
 0x90d   : > { %v8685_v38 = vpop.eup %7712  ;;  %v5102_v22 = vsel %vm346_vm3, %v8683_v13, 0.0 }
 0x90e   : > { %5103 = vadd.xlane.f32.xlu1 %v5102_v22  ;;  %v5099_v29 = vsel %vm346_vm3, %v8685_v38, 0.0 }
 0x90f   : > { %5100 = vadd.xlane.f32.xlu0 %v5099_v29 }
 0x910   : > { %v8691_v44 = vpop.eup %7714 }
 0x911   : > { %v8693_v46 = vpop.eup %7716  ;;  %v5108_v49 = vsel %vm346_vm3, %v8691_v44, 0.0 }
 0x912   : > { %5109 = vadd.xlane.f32.xlu1 %v5108_v49  ;;  %v5105_v50 = vsel %vm346_vm3, %v8693_v46, 0.0  ;;  %v5874_v49 = vld [vmem:[%s9164_s1 + $0x28] sm:$0xff] }
 0x913   : > { %5106 = vadd.xlane.f32.xlu0 %v5105_v50  ;;  %v5873_v50 = vld [vmem:[%s9164_s1 + $0x18] sm:$0xff] }
 0x914   : > { %v8699_v20 = vpop.eup %7718 }
 0x915   : > { %v5111_v57 = vsel %vm346_vm3, %v8699_v20, 0.0 }
 0x917   : > { %5112 = vadd.xlane.f32.xlu0 %v5111_v57 }
 0x923   : > { %5662 = vrot.lane.b32.xlu1 %v7942_v30, %s7812_s14  ;;  %v5795_v30 = vrot.slane %v7900_v16, %v7904_v17 }
 0x927   : > { %3010 = vrot.lane.b32.xlu1 %v8432_v43, %s7813_s16 }
 0x92b   : > { %4379 = vrot.lane.b32.xlu1 %v8637_v35, %s7814_s17 }
 0x92d   : > { %5586 = vrot.lane.b32.xlu0 %v7949_v33, %s7812_s14  ;;  %v5824_v33 = vmul.f32 %v7915_v21, %v5795_v30  ;;  %v5872_v30 = vld [vmem:[%s9164_s1 + $0x8] sm:$0xff] }
 0x92f   : > { %3014 = vrot.lane.b32.xlu1 %v8436_v45, %s7813_s16  ;;  %v5435_v45 = vpop.permute.xlu0 %5434 }
 0x931   : > { %3008 = vrot.lane.b32.xlu0 %v8428_v39, %s7813_s16  ;;  %v5799_v39 = vrot.slane %v7896_v15, %v7904_v17  ;;  %v5283_v15 = vpop.permute.xlu1 %5282 }
 0x933   : > { %4383 = vrot.lane.b32.xlu1 %v8641_v2, %s7814_s17  ;;  %v5825_v43 = vmul.f32 %v7915_v21, %v5799_v39 }
 0x935   : > { %4377 = vrot.lane.b32.xlu0 %v8633_v52, %s7814_s17  ;;  %v5359_v16 = vpop.permute.xlu1 %5358 }
 0x937   : > { %3018 = vrot.lane.b32.xlu1 %v8440_v47, %s7813_s16 }
 0x939   : > { %3012 = vrot.lane.b32.xlu0 %v8430_v19, %s7813_s16  ;;  %v5511_v17 = vpop.permute.xlu1 %5510 }
 0x93b   : > { %4387 = vrot.lane.b32.xlu1 %v8645_v5, %s7814_s17 }
 0x93d   : > { %4381 = vrot.lane.b32.xlu0 %v8635_v58, %s7814_s17 }
 0x93f   : > { %5840 = vrot.lane.b32.xlu1 %v5824_v33, %s7815_s18 }
 0x941   : > { %3016 = vrot.lane.b32.xlu0 %v8434_v63, %s7813_s16 }
 0x943   : > { %5842 = vrot.lane.b32.xlu1 %v5825_v43, %s7815_s18 }
 0x945   : > { %4385 = vrot.lane.b32.xlu0 %v8639_v54, %s7814_s17 }
 0x947   : > { %3022 = vrot.lane.b32.xlu1 %v8442_v53, %s7813_s16 }
 0x949   : > { %3020 = vrot.lane.b32.xlu0 %v8438_v11, %s7813_s16 }
 0x94b   : > { %4391 = vrot.lane.b32.xlu1 %v8647_v7, %s7814_s17 }
 0x94d   : > { %4389 = vrot.lane.b32.xlu0 %v8643_v4, %s7814_s17 }
 0x98e   : > { %v5092_v19 = vpop.xlane.xlu1 %5091 }
 0x98f   : > { %7720 = vrcp.f32 %v5092_v19 }
 0x992   : > { %v5098_v63 = vpop.xlane.xlu1 %5097 }
 0x993   : > { %7722 = vrcp.f32 %v5098_v63  ;;  %v5095_v21 = vpop.xlane.xlu0 %5094 }
 0x994   : > { %7724 = vrcp.f32 %v5095_v21 }
 0x997   : > { %v5104_v47 = vpop.xlane.xlu1 %5103 }
 0x998   : > { %7726 = vrcp.f32 %v5104_v47  ;;  %v5101_v52 = vpop.xlane.xlu0 %5100 }
 0x999   : > { %7728 = vrcp.f32 %v5101_v52 }
 0x99b   : > { %v5110_v53 = vpop.xlane.xlu1 %5109 }
 0x99c   : > { %v7721_v11 = vpop.eup %7720  ;;  %7730 = vrcp.f32 %v5110_v53  ;;  %v5107_v58 = vpop.xlane.xlu0 %5106 }
 0x99d   : > { %7732 = vrcp.f32 %v5107_v58  ;;  %v5122_v35 = vmul.f32 %v7721_v11, %v8669_v3 }
 0x99f   : > { %v5663_v54 = vpop.permute.xlu1 %5662  ;;  %7478 = vmatmul.mubr.msk.f32.vlgmr.msra.gmra.mxu1 %vm346_vm3, %v5122_v35 }
 0x9a0   : > { %v7723_v2 = vpop.eup %7722  ;;  %v5113_v4 = vpop.xlane.xlu0 %5112  ;;  %7486 = vmatpush3.msra.mxu1 %v5283_v15  ;;  %7487 = vmatprep.mubr.msk.f32.mxu1 %vm7801_vm1, %v7800_v12 }
 0x9a1   : > { %v7725_v5 = vpop.eup %7724  ;;  %7734 = vrcp.f32 %v5113_v4  ;;  %7495 = vmatprep.subr.mxu1 %v7800_v12  ;;  %v5124_v7 = vmul.f32 %v7723_v2, %v8674_v62 }
 0x9a2   : > { %v5123_v42 = vmul.f32 %v7725_v5, %v8676_v55 }
 0x9a3   : > { %v3011_v18 = vpop.permute.xlu1 %3010  ;;  %7488 = vmatmul.mubr.msk.f32.vlgmr.msra.gmra.mxu1 %vm346_vm3, %v5124_v7 }
 0x9a4   : > { %3034 = vst.msk [vmem:[#allocation2 + $0x8] sm:$0xff] %vm3032_vm4, %v3011_v18  ;;  %v5587_v51 = vpop.permute.xlu0 %5586  ;;  %7483 = vmatmul.mubr.msk.f32.vlgmr.msra.gmra.mxu0 %vm346_vm3, %v5123_v42  ;;  %7496 = vmatpush3.msra.mxu1 %v5435_v45 }
 0x9a5   : > { %v7727_v41 = vpop.eup %7726  ;;  %7491 = vmatpush3.msra.mxu0 %v5359_v16  ;;  %7497 = vmatprep.mubr.msk.f32.mxu1 %vm7801_vm1, %v7800_v12 }
 0x9a6   : > { %v7729_v8 = vpop.eup %7728  ;;  %7492 = vmatprep.mubr.msk.f32.mxu0 %vm7801_vm1, %v7800_v12  ;;  %7500 = vmatprep.subr.mxu0 %v7800_v12  ;;  %v5126_v24 = vmul.f32 %v7727_v41, %v8683_v13 }
 0x9a7   : > { %v4380_v59 = vpop.permute.xlu1 %4379  ;;  %7505 = vmatprep.subr.mxu1 %v7800_v12  ;;  %v5125_v60 = vmul.f32 %v7729_v8, %v8685_v38 }
 0x9a8   : > { %4403 = vst.msk [vmem:[#allocation2 + $0x8] sm:$0xff] %vm4401_vm5, %v4380_v59  ;;  %v3009_v27 = vpop.permute.xlu0 %3008  ;;  %7498 = vmatmul.mubr.msk.f32.vlgmr.msra.gmra.mxu1 %vm346_vm3, %v5126_v24 }
 0x9a9   : > { %v7731_v9 = vpop.eup %7730  ;;  %3033 = vst.msk [vmem:[#allocation2] sm:$0xff] %vm3032_vm4, %v3009_v27  ;;  %7493 = vmatmul.mubr.msk.f32.vlgmr.msra.gmra.mxu0 %vm346_vm3, %v5125_v60  ;;  %7506 = vmatpush3.msra.mxu1 %v5587_v51 }
 0x9aa   : > { %v7733_v48 = vpop.eup %7732  ;;  %7501 = vmatpush3.msra.mxu0 %v5511_v17  ;;  %7502 = vmatprep.mubr.msk.f32.mxu0 %vm7801_vm1, %v7800_v12  ;;  %v5128_v26 = vmul.f32 %v7731_v9, %v8691_v44 }
 0x9ab   : > { %v3015_v37 = vpop.permute.xlu1 %3014  ;;  %7507 = vmatprep.mubr.msk.f32.mxu1 %vm7801_vm1, %v7800_v12  ;;  %7510 = vmatprep.subr.mxu0 %v7800_v12  ;;  %v5127_v31 = vmul.f32 %v7733_v48, %v8693_v46  ;;  %v5875_v46 = vld [vmem:[%s9164_s1 + $0x38] sm:$0xff] }
 0x9ac   : > { %3036 = vst.msk [vmem:[#allocation2 + $0x18] sm:$0xff] %vm3032_vm4, %v3015_v37  ;;  %v4378_v1 = vpop.permute.xlu0 %4377  ;;  %7508 = vmatmul.mubr.msk.f32.vlgmr.msra.gmra.mxu1 %vm346_vm3, %v5128_v26  ;;  %7515 = vmatprep.subr.mxu1 %v5875_v46 }
 0x9ad   : > { %4402 = vst.msk [vmem:[#allocation2] sm:$0xff] %vm4401_vm5, %v4378_v1  ;;  %7503 = vmatmul.mubr.msk.f32.vlgmr.msra.gmra.mxu0 %vm346_vm3, %v5127_v31  ;;  %7516 = vmatpush3.msra.mxu1 %v5875_v46 }
 0x9ae   : > { %v7735_v3 = vpop.eup %7734  ;;  %7511 = vmatpush3.msra.mxu0 %v5663_v54  ;;  %7512 = vmatprep.mubr.msk.f32.mxu0 %vm7801_vm1, %v7800_v12 }
 0x9af   : > { %v4384_v61 = vpop.permute.xlu1 %4383  ;;  %v5129_v10 = vmul.f32 %v7735_v3, %v8699_v20  ;;  %7517 = vmatprep.subr.mxu1 %v5874_v49 }
 0x9b0   : > { %4405 = vst.msk [vmem:[#allocation2 + $0x18] sm:$0xff] %vm4401_vm5, %v4384_v61  ;;  %v3013_v40 = vpop.permute.xlu0 %3012  ;;  %7518 = vmatpush3.msra.mxu1 %v5874_v49 }
 0x9b1   : > { %3035 = vst.msk [vmem:[#allocation2 + $0x10] sm:$0xff] %vm3032_vm4, %v3013_v40  ;;  %7513 = vmatmul.mubr.msk.f32.vlgmr.msra.gmra.mxu0 %vm346_vm3, %v5129_v10  ;;  %7519 = vmatprep.subr.mxu1 %v5873_v50 }
 0x9b2   : > { %7520 = vmatpush3.msra.mxu1 %v5873_v50 }
 0x9b3   : > { %v3019_v56 = vpop.permute.xlu1 %3018  ;;  %7521 = vmatprep.subr.mxu1 %v5872_v30 }
 0x9b4   : > { %3038 = vst.msk [vmem:[#allocation2 + $0x28] sm:$0xff] %vm3032_vm4, %v3019_v56  ;;  %v4382_v62 = vpop.permute.xlu0 %4381  ;;  %7522 = vmatpush3.msra.mxu1 %v5872_v30 }
 0x9b5   : > { %4404 = vst.msk [vmem:[#allocation2 + $0x10] sm:$0xff] %vm4401_vm5, %v4382_v62 }
 0x9b7   : > { %v4388_v55 = vpop.permute.xlu1 %4387 }
 0x9b8   : > { %4407 = vst.msk [vmem:[#allocation2 + $0x28] sm:$0xff] %vm4401_vm5, %v4388_v55  ;;  %v3017_v12 = vpop.permute.xlu0 %3016 }
 0x9b9   : > { %3037 = vst.msk [vmem:[#allocation2 + $0x20] sm:$0xff] %vm3032_vm4, %v3017_v12  ;;  %v6211_v12 = vld [vmem:[%s9166_s3] sm:$0x3] }
 0x9bb   : > { %v8774_v0 = vpop.permute.xlu1 %5840 }
 0x9bc   : > { %v4386_v6 = vpop.permute.xlu0 %4385 }
 0x9bd   : > { %4406 = vst.msk [vmem:[#allocation2 + $0x20] sm:$0xff] %vm4401_vm5, %v4386_v6  ;;  %v6216_v6 = vsub.s32 0, %v7894_v14 }
 0x9bf   : > { %v8777_v13 = vpop.permute.xlu1 %5842 }
 0x9c0   : > { %v3021_v38 = vpop.permute.xlu0 %3020 }
 0x9c1   : > { %3039 = vst.msk [vmem:[#allocation2 + $0x30] sm:$0xff] %vm3032_vm4, %v3021_v38  ;;  %v6217_v38 = vrot.slane %v6211_v12, %v6216_v6 }
 0x9c3   : > { %v3023_v22 = vpop.permute.xlu1 %3022 }
 0x9c4   : > { %3040 = vst.msk [vmem:[#allocation2 + $0x38] sm:$0xff] %vm3032_vm4, %v3023_v22  ;;  %v4390_v29 = vpop.permute.xlu0 %4389 }
 0x9c5   : > { %4408 = vst.msk [vmem:[#allocation2 + $0x30] sm:$0xff] %vm4401_vm5, %v4390_v29 }
 0x9c7   : > { %v4392_v44 = vpop.permute.xlu1 %4391 }
 0x9c8   : > { %4409 = vst.msk [vmem:[#allocation2 + $0x38] sm:$0xff] %vm4401_vm5, %v4392_v44 }
 0xa5f   : > { %v5202_v20 = vpop.f32.mrf.mxu1 }
 0xa60   : > { %5746 = vrot.lane.b32.xlu0 %v5202_v20, %s7816_s27 }
 0xa61   : > { %v7479_v57 = vpop.f32.mrf.mxu1 }
 0xa62   : > { %v7785_v57 = vld [vmem:[%s7870_s29] sm:$0xff] }
 0xa63   : > { %v5354_v33 = vpop.f32.mrf.mxu1 }
 0xa64   : > { %v5278_v39 = vpop.f32.mrf.mxu0  ;;  %5750 = vrot.lane.b32.xlu0 %v5354_v33, %s7816_s27 }
 0xa65   : > { %5748 = vrot.lane.b32.xlu1 %v5278_v39, %s7816_s27  ;;  %v7489_v43 = vpop.f32.mrf.mxu1 }
 0xa66   : > { %v7484_v15 = vpop.f32.mrf.mxu0 }
 0xa68   : > { %v5506_v16 = vpop.f32.mrf.mxu1 }
 0xa69   : > { %v5430_v17 = vpop.f32.mrf.mxu0  ;;  %5754 = vrot.lane.b32.xlu0 %v5506_v16, %s7816_s27 }
 0xa6a   : > { %5752 = vrot.lane.b32.xlu1 %v5430_v17, %s7816_s27  ;;  %v7499_v19 = vpop.f32.mrf.mxu1 }
 0xa6b   : > { %v7494_v45 = vpop.f32.mrf.mxu0  ;;  %v7786_v19 = vld [vmem:[%s7870_s29 + $0x18] sm:$0xff] }
 0xa6c   : > { %v5658_v63 = vpop.f32.mrf.mxu1 }
 0xa6d   : > { %v5582_v21 = vpop.f32.mrf.mxu0 }
 0xa6e   : > { %5844 = vrot.lane.b32.xlu1 %v7927_v25, %s7815_s18  ;;  %5756 = vrot.lane.b32.xlu0 %v5582_v21, %s7816_s27  ;;  %v7509_v47 = vpop.f32.mrf.mxu1 }
 0xa6f   : > { %v7504_v52 = vpop.f32.mrf.mxu0 }
 0xa71   : > { %v5734_v53 = vpop.f32.mrf.mxu0 }
 0xa72   : > { %5846 = vrot.lane.b32.xlu1 %v7922_v23, %s7815_s18  ;;  %5758 = vrot.lane.b32.xlu0 %v5658_v63, %s7816_s27  ;;  %v8821_v23 = vld [vmem:[%s9166_s3] ss:$0 sm:$0xff] }
 0xa73   : > { %v7514_v11 = vpop.f32.mrf.mxu0 }
 0xa76   : > { %5850 = vrot.lane.b32.xlu1 %v7938_v28, %s7815_s18  ;;  %5760 = vrot.lane.b32.xlu0 %v5734_v53, %s7816_s27  ;;  %v7787_v53 = vld [vmem:[%s7870_s29 + $0x10] sm:$0xff] }
 0xa7a   : > { %5854 = vrot.lane.b32.xlu1 %v7956_v34, %s7815_s18  ;;  %5848 = vrot.lane.b32.xlu0 %v7947_v32, %s7815_s18 }
 0xa7e   : > { %5852 = vrot.lane.b32.xlu0 %v7961_v36, %s7815_s18  ;;  %6230 = vrot.lane.b32.xlu1 %v5874_v49, %s7802_s30 }
 0xa82   : > { %6232 = vrot.lane.b32.xlu0 %v5875_v46, %s7802_s30  ;;  %6228 = vrot.lane.b32.xlu1 %v5873_v50, %s7802_s30  ;;  %v7784_v46 = vld [vmem:[%s7870_s29 + $0x8] sm:$0xff] }
 0xa86   : > { %6189 = vrot.lane.b32.xlu0 %v8821_v23, %s7802_s30  ;;  %6226 = vrot.lane.b32.xlu1 %v5872_v30, %s7802_s30 }
 0xa8a   : > { %6200 = vrot.lane.b32.xlu0 %v8821_v23, %s7803_s5 }
 0xa8e   : > { %6238 = vrot.lane.b32.xlu0 %v6217_v38, %s7815_s18 }
 0xad2   : > { %v5747_v25 = vpop.permute.xlu0 %5746 }
 0xad3   : > { %5771 = vst.msk [vmem:[#allocation2] sm:$0xff] %vm5770_vm6, %v5747_v25 }
 0xad6   : > { %v5751_v28 = vpop.permute.xlu0 %5750 }
 0xad7   : > { %5773 = vst.msk [vmem:[#allocation2 + $0x10] sm:$0xff] %vm5770_vm6, %v5751_v28  ;;  %v5749_v32 = vpop.permute.xlu1 %5748 }
 0xad8   : > { %5772 = vst.msk [vmem:[#allocation2 + $0x8] sm:$0xff] %vm5770_vm6, %v5749_v32 }
 0xada   : > { %v5784_v34 = vld [vmem:[#allocation2] sm:$0xff] }
 0xadb   : > { %v5755_v36 = vpop.permute.xlu0 %5754  ;;  %v5864_v58 = vadd.f32 %v8774_v0, %v5784_v34  ;;  %v6220_v0 = vsub.s32 1, %v7894_v14 }
 0xadc   : > { %5775 = vst.msk [vmem:[#allocation2 + $0x20] sm:$0xff] %vm5770_vm6, %v5755_v36  ;;  %v5753_v35 = vpop.permute.xlu1 %5752 }
 0xadd   : > { %5774 = vst.msk [vmem:[#allocation2 + $0x18] sm:$0xff] %vm5770_vm6, %v5753_v35  ;;  %7523 = vmatprep.mubr.msk.f32.mxu1 %vm213_vm0, %v5864_v58 }
 0xade   : > { %v5786_v54 = vld [vmem:[#allocation2 + $0x10] sm:$0xff] }
 0xadf   : > { %v5785_v2 = vld [vmem:[#allocation2 + $0x8] sm:$0xff] }
 0xae0   : > { %v5845_v4 = vpop.permute.xlu1 %5844  ;;  %v5757_v5 = vpop.permute.xlu0 %5756  ;;  %v5865_v7 = vadd.f32 %v8777_v13, %v5785_v2  ;;  %v6221_v13 = vrot.slane %v6211_v12, %v6220_v0 }
 0xae1   : > { %v5866_v42 = vadd.f32 %v5845_v4, %v5786_v54  ;;  %5776 = vst.msk [vmem:[#allocation2 + $0x28] sm:$0xff] %vm5770_vm6, %v5757_v5 }
 0xae2   : > { %7524 = vmatmul.mubr.msk.f32.vlgmr.msra.gmra.mxu1 %vm213_vm0, %v5865_v7  ;;  %6240 = vrot.lane.b32.xlu1 %v6221_v13, %s7815_s18 }
 0xae3   : > { %7526 = vmatprep.mubr.msk.f32.mxu1 %vm213_vm0, %v5866_v42  ;;  %v5788_v27 = vld [vmem:[#allocation2 + $0x20] sm:$0xff] }
 0xae4   : > { %v5787_v18 = vld [vmem:[#allocation2 + $0x18] sm:$0xff]  ;;  %v5847_v51 = vpop.permute.xlu1 %5846  ;;  %v5759_v41 = vpop.permute.xlu0 %5758 }
 0xae5   : > { %v5867_v8 = vadd.f32 %v5847_v51, %v5787_v18  ;;  %5777 = vst.msk [vmem:[#allocation2 + $0x30] sm:$0xff] %vm5770_vm6, %v5759_v41 }
 0xae7   : > { %7527 = vmatmul.mubr.msk.f32.gmra.mxu1 %vm213_vm0, %v5867_v8 }
 0xae8   : > { %v5761_v24 = vpop.permute.xlu0 %5760  ;;  %v5851_v59 = vpop.permute.xlu1 %5850  ;;  %v5789_v60 = vld [vmem:[#allocation2 + $0x28] sm:$0xff] }
 0xae9   : > { %5778 = vst.msk [vmem:[#allocation2 + $0x38] sm:$0xff] %vm5770_vm6, %v5761_v24  ;;  %v5869_v26 = vadd.f32 %v5851_v59, %v5789_v60  ;;  %v7788_v24 = vld [vmem:[%s7870_s29 + $0x28] sm:$0xff] }
 0xaec   : > { %v5849_v9 = vpop.permute.xlu0 %5848  ;;  %v5855_v37 = vpop.permute.xlu1 %5854  ;;  %v5790_v1 = vld [vmem:[#allocation2 + $0x30] sm:$0xff] }
 0xaed   : > { %v5868_v48 = vadd.f32 %v5849_v9, %v5788_v27 }
 0xaef   : > { %7529 = vmatprep.mubr.msk.f32.mxu1 %vm213_vm0, %v5868_v48 }
 0xaf0   : > { %v5791_v31 = vld [vmem:[#allocation2 + $0x38] sm:$0xff]  ;;  %7530 = vmatmul.mubr.msk.f32.gmra.mxu1 %vm213_vm0, %v5869_v26  ;;  %v5853_v3 = vpop.permute.xlu0 %5852  ;;  %v6231_v56 = vpop.permute.xlu1 %6230 }
 0xaf1   : > { %v5871_v61 = vadd.f32 %v5855_v37, %v5791_v31  ;;  %v5870_v10 = vadd.f32 %v5853_v3, %v5790_v1  ;;  %v7789_v1 = vld [vmem:[%s7870_s29 + $0x20] sm:$0xff] }
 0xaf3   : > { %7532 = vmatprep.mubr.msk.f32.mxu1 %vm213_vm0, %v5870_v10 }
 0xaf4   : > { %7533 = vmatmul.mubr.msk.f32.gmra.mxu1 %vm213_vm0, %v5871_v61  ;;  %v6233_v40 = vpop.permute.xlu0 %6232  ;;  %v6229_v62 = vpop.permute.xlu1 %6228 }
 0xaf5   : > { %7535 = vmatprep.subr.mxu0 %v6233_v40 }
 0xaf6   : > { %7536 = vmatpush3.msra.mxu0 %v6233_v40 }
 0xaf7   : > { %7537 = vmatprep.subr.mxu0 %v6231_v56 }
 0xaf8   : > { %7538 = vmatpush3.msra.mxu0 %v6231_v56  ;;  %v6227_v55 = vpop.permute.xlu1 %6226 }
 0xaf9   : > { %7539 = vmatprep.subr.mxu0 %v6229_v62 }
 0xafa   : > { %7540 = vmatpush3.msra.mxu0 %v6229_v62 }
 0xafb   : > { %7541 = vmatprep.subr.mxu0 %v6227_v55 }
 0xafc   : > { %7542 = vmatpush3.msra.mxu0 %v6227_v55 }
 0xba2   : > { %v7525_v22 = vpop.f32.mrf.mxu1 }
 0xba3   : > { %v5979_v29 = vadd.f32 %v7525_v22, %v8821_v23 }
 0xba4   : > { %v5973_v44 = vpop.f32.mrf.mxu1 }
 0xba5   : > { %v6013_v49 = vadd.f32 %v7784_v46, %v5979_v29  ;;  %v5974_v50 = vadd.f32 %v8821_v23, %v5973_v44 }
 0xba7   : > { %v6027_v20 = vsel %vm213_vm0, %v6013_v49, 0.0  ;;  %v6012_v14 = vadd.f32 %v7785_v57, %v5974_v50  ;;  %v7528_v30 = vpop.f32.mrf.mxu1 }
 0xba8   : > { %v6028_v33 = vrot.slane %v6027_v20, 4  ;;  %v5989_v39 = vadd.f32 %v7528_v30, %v8821_v23 }
 0xba9   : > { %v6020_v43 = vsel %vm213_vm0, %v6012_v14, 0.0  ;;  %v5983_v15 = vpop.f32.mrf.mxu1 }
 0xbaa   : > { %v6029_v16 = vadd.f32 %v6028_v33, %v6027_v20  ;;  %v6021_v17 = vrot.slane %v6020_v43, 4  ;;  %v6015_v45 = vadd.f32 %v7786_v19, %v5989_v39  ;;  %v5984_v63 = vadd.f32 %v8821_v23, %v5983_v15  ;;  %v7791_v20 = vld [vmem:[%s7870_s29 + $0x30] sm:$0xff] }
 0xbac   : > { %v6030_v21 = vrot.slane %v6029_v16, 2  ;;  %v6022_v47 = vadd.f32 %v6021_v17, %v6020_v43  ;;  %v6041_v52 = vsel %vm213_vm0, %v6015_v45, 0.0  ;;  %v8864_v11 = vadd.f32 %v7787_v53, %v5984_v63 }
 0xbad   : > { %v6042_v25 = vrot.slane %v6041_v52, 4 }
 0xbae   : > { %v6031_v28 = vadd.f32 %v6030_v21, %v6029_v16  ;;  %v6023_v32 = vrot.slane %v6022_v47, 2  ;;  %v6034_v34 = vsel %vm213_vm0, %v8864_v11, 0.0 }
 0xbaf   : > { %v6043_v36 = vadd.f32 %v6042_v25, %v6041_v52  ;;  %v6035_v58 = vrot.slane %v6034_v34, 4 }
 0xbb0   : > { %v6032_v35 = vrot.slane %v6031_v28, 1  ;;  %v6024_v54 = vadd.f32 %v6023_v32, %v6022_v47  ;;  %v7531_v2 = vpop.f32.mrf.mxu1 }
 0xbb1   : > { %v6044_v4 = vrot.slane %v6043_v36, 2  ;;  %v6036_v5 = vadd.f32 %v6035_v58, %v6034_v34  ;;  %v5999_v7 = vadd.f32 %v7531_v2, %v8821_v23 }
 0xbb2   : > { %v6033_v42 = vadd.f32 %v6032_v35, %v6031_v28  ;;  %v6025_v18 = vrot.slane %v6024_v54, 1  ;;  %v5993_v51 = vpop.f32.mrf.mxu1 }
 0xbb3   : > { %v6045_v41 = vadd.f32 %v6044_v4, %v6043_v36  ;;  %v6037_v8 = vrot.slane %v6036_v5, 2  ;;  %v8870_v59 = vadd.f32 %v7788_v24, %v5999_v7  ;;  %v5994_v60 = vadd.f32 %v8821_v23, %v5993_v51 }
 0xbb4   : > { %v6078_v27 = vmul.f32 0.125, %v6033_v42  ;;  %v6026_v9 = vadd.f32 %v6025_v18, %v6024_v54  ;;  %v7534_v48 = vpop.f32.mrf.mxu1 }
 0xbb5   : > { %v6046_v26 = vrot.slane %v6045_v41, 1  ;;  %v6038_v37 = vadd.f32 %v6037_v8, %v6036_v5  ;;  %v6055_v31 = vsel %vm213_vm0, %v8870_v59, 0.0  ;;  %v8876_v3 = vadd.f32 %v7789_v1, %v5994_v60 }
 0xbb6   : > { %v8878_v61 = vsub.f32 %v6013_v49, %v6078_v27  ;;  %v6077_v10 = vmul.f32 0.125, %v6026_v9  ;;  %v6056_v40 = vrot.slane %v6055_v31, 4  ;;  %v6009_v56 = vadd.f32 %v7534_v48, %v8821_v23  ;;  %v6003_v62 = vpop.f32.mrf.mxu1  ;;  %v7790_v49 = vld [vmem:[%s7870_s29 + $0x38] sm:$0xff] }
 0xbb7   : > { %v6047_v55 = vadd.f32 %v6046_v26, %v6045_v41  ;;  %v6039_v12 = vrot.slane %v6038_v37, 1  ;;  %v6048_v0 = vsel %vm213_vm0, %v8876_v3, 0.0  ;;  %v6004_v6 = vadd.f32 %v8821_v23, %v6003_v62 }
 0xbb8   : > { %v6094_v13 = vmul.f32 %v8878_v61, %v8878_v61  ;;  %v8886_v38 = vsub.f32 %v6012_v14, %v6077_v10  ;;  %v6057_v22 = vadd.f32 %v6056_v40, %v6055_v31  ;;  %v6049_v29 = vrot.slane %v6048_v0, 4 }
 0xbb9   : > { %v6080_v44 = vmul.f32 0.125, %v6047_v55  ;;  %v6040_v46 = vadd.f32 %v6039_v12, %v6038_v37  ;;  %v8889_v50 = vadd.f32 %v7790_v49, %v6009_v56  ;;  %v8892_v57 = vadd.f32 %v7791_v20, %v6004_v6 }
 0xbba   : > { %v6108_v30 = vsel %vm213_vm0, %v6094_v13, 0.0  ;;  %v6093_v23 = vmul.f32 %v8886_v38, %v8886_v38  ;;  %v6058_v33 = vrot.slane %v6057_v22, 2  ;;  %v6050_v39 = vadd.f32 %v6049_v29, %v6048_v0 }
 0xbbb   : > { %v6109_v43 = vrot.slane %v6108_v30, 4  ;;  %v8897_v14 = vsub.f32 %v6015_v45, %v6080_v44  ;;  %v6079_v15 = vmul.f32 0.125, %v6040_v46  ;;  %v6069_v16 = vsel %vm213_vm0, %v8889_v50, 0.0 }
 0xbbc   : > { %v6101_v17 = vsel %vm213_vm0, %v6093_v23, 0.0  ;;  %v6059_v19 = vadd.f32 %v6058_v33, %v6057_v22  ;;  %v6051_v63 = vrot.slane %v6050_v39, 2  ;;  %v6070_v21 = vrot.slane %v6069_v16, 4 }
 0xbbd   : > { %v6110_v47 = vadd.f32 %v6109_v43, %v6108_v30  ;;  %v6102_v52 = vrot.slane %v6101_v17, 4  ;;  %v6096_v53 = vmul.f32 %v8897_v14, %v8897_v14  ;;  %v8905_v25 = vsub.f32 %v8864_v11, %v6079_v15 }
 0xbbe   : > { %v6060_v28 = vrot.slane %v6059_v19, 1  ;;  %v6052_v45 = vadd.f32 %v6051_v63, %v6050_v39  ;;  %v6071_v32 = vadd.f32 %v6070_v21, %v6069_v16  ;;  %v6062_v34 = vsel %vm213_vm0, %v8892_v57, 0.0 }
 0xbbf   : > { %v6111_v36 = vrot.slane %v6110_v47, 2  ;;  %v6103_v58 = vadd.f32 %v6102_v52, %v6101_v17  ;;  %v6122_v35 = vsel %vm213_vm0, %v6096_v53, 0.0  ;;  %v6095_v54 = vmul.f32 %v8905_v25, %v8905_v25 }
 0xbc0   : > { %v6123_v2 = vrot.slane %v6122_v35, 4  ;;  %v6061_v4 = vadd.f32 %v6060_v28, %v6059_v19  ;;  %v6053_v5 = vrot.slane %v6052_v45, 1  ;;  %v6072_v7 = vrot.slane %v6071_v32, 2 }
 0xbc1   : > { %v6112_v42 = vadd.f32 %v6111_v36, %v6110_v47  ;;  %v6104_v11 = vrot.slane %v6103_v58, 2  ;;  %v6115_v18 = vsel %vm213_vm0, %v6095_v54, 0.0  ;;  %v6063_v51 = vrot.slane %v6062_v34, 4 }
 0xbc2   : > { %v6124_v41 = vadd.f32 %v6123_v2, %v6122_v35  ;;  %v6116_v8 = vrot.slane %v6115_v18, 4  ;;  %v6082_v24 = vmul.f32 0.125, %v6061_v4  ;;  %v6054_v60 = vadd.f32 %v6053_v5, %v6052_v45 }
 0xbc3   : > { %v6113_v27 = vrot.slane %v6112_v42, 1  ;;  %v6105_v9 = vadd.f32 %v6104_v11, %v6103_v58  ;;  %v6073_v48 = vadd.f32 %v6072_v7, %v6071_v32  ;;  %v6064_v26 = vadd.f32 %v6063_v51, %v6062_v34 }
 0xbc4   : > { %v6125_v37 = vrot.slane %v6124_v41, 2  ;;  %v6117_v31 = vadd.f32 %v6116_v8, %v6115_v18  ;;  %v8914_v1 = vsub.f32 %v8870_v59, %v6082_v24  ;;  %v6081_v10 = vmul.f32 0.125, %v6054_v60 }
 0xbc5   : > { %v6114_v40 = vadd.f32 %v6113_v27, %v6112_v42  ;;  %v6106_v56 = vrot.slane %v6105_v9, 1  ;;  %v6074_v62 = vrot.slane %v6073_v48, 1  ;;  %v6065_v55 = vrot.slane %v6064_v26, 2 }
 0xbc6   : > { %v6126_v12 = vadd.f32 %v6125_v37, %v6124_v41  ;;  %v6118_v0 = vrot.slane %v6117_v31, 2  ;;  %v6098_v6 = vmul.f32 %v8914_v1, %v8914_v1  ;;  %v8919_v13 = vsub.f32 %v8876_v3, %v6081_v10  ;;  %v6190_v10 = vpop.permute.xlu0 %6189 }
 0xbc7   : > { %v6158_v22 = vmul.f32 0.125, %v6114_v40  ;;  %v6107_v29 = vadd.f32 %v6106_v56, %v6105_v9  ;;  %v6075_v44 = vadd.f32 %v6074_v62, %v6073_v48  ;;  %v6066_v46 = vadd.f32 %v6065_v55, %v6064_v26 }
 0xbc8   : > { %v6127_v49 = vrot.slane %v6126_v12, 1  ;;  %v6119_v59 = vadd.f32 %v6118_v0, %v6117_v31  ;;  %v6136_v20 = vsel %vm213_vm0, %v6098_v6, 0.0  ;;  %v6097_v30 = vmul.f32 %v8919_v13, %v8919_v13 }
 0xbc9   : > { %v6166_v23 = vadd.f32 1e-05, %v6158_v22  ;;  %v6157_v33 = vmul.f32 0.125, %v6107_v29  ;;  %v6137_v39 = vrot.slane %v6136_v20, 4  ;;  %v6084_v43 = vmul.f32 0.125, %v6075_v44 }
 0xbca   : > { %v6128_v15 = vadd.f32 %v6127_v49, %v6126_v12  ;;  %v6120_v16 = vrot.slane %v6119_v59, 1  ;;  %v6129_v3 = vsel %vm213_vm0, %v6097_v30, 0.0  ;;  %v6067_v17 = vrot.slane %v6066_v46, 1 }
 0xbcb   : > { %7736 = vrsqrt.f32 %v6166_v23  ;;  %v6165_v19 = vadd.f32 1e-05, %v6157_v33  ;;  %v6138_v63 = vadd.f32 %v6137_v39, %v6136_v20  ;;  %v6130_v21 = vrot.slane %v6129_v3, 4 }
 0xbcc   : > { %v6160_v47 = vmul.f32 0.125, %v6128_v15  ;;  %v6121_v52 = vadd.f32 %v6120_v16, %v6119_v59  ;;  %v8926_v53 = vsub.f32 %v8889_v50, %v6084_v43  ;;  %v6068_v28 = vadd.f32 %v6067_v17, %v6066_v46  ;;  %v6201_v59 = vpop.permute.xlu0 %6200 }
 0xbcd   : > { %7738 = vrsqrt.f32 %v6165_v19  ;;  %v6139_v45 = vrot.slane %v6138_v63, 2  ;;  %v6131_v32 = vadd.f32 %v6130_v21, %v6129_v3 }
 0xbce   : > { %v6168_v34 = vadd.f32 1e-05, %v6160_v47  ;;  %v6159_v36 = vmul.f32 0.125, %v6121_v52  ;;  %v6100_v58 = vmul.f32 %v8926_v53, %v8926_v53  ;;  %v6083_v35 = vmul.f32 0.125, %v6068_v28 }
 0xbcf   : > { %v6140_v54 = vadd.f32 %v6139_v45, %v6138_v63  ;;  %v6132_v2 = vrot.slane %v6131_v32, 2 }
 0xbd0   : > { %7740 = vrsqrt.f32 %v6168_v34  ;;  %v6167_v4 = vadd.f32 1e-05, %v6159_v36  ;;  %v6150_v5 = vsel %vm213_vm0, %v6100_v58, 0.0  ;;  %v8932_v7 = vsub.f32 %v8892_v57, %v6083_v35 }
 0xbd1   : > { %v6141_v50 = vrot.slane %v6140_v54, 1  ;;  %v6133_v42 = vadd.f32 %v6132_v2, %v6131_v32  ;;  %v6151_v11 = vrot.slane %v6150_v5, 4 }
 0xbd2   : > { %7742 = vrsqrt.f32 %v6167_v4  ;;  %v6099_v18 = vmul.f32 %v8932_v7, %v8932_v7 }
 0xbd3   : > { %v6142_v51 = vadd.f32 %v6141_v50, %v6140_v54  ;;  %v6134_v41 = vrot.slane %v6133_v42, 1  ;;  %v6152_v8 = vadd.f32 %v6151_v11, %v6150_v5  ;;  %v6452_v5 = vld [vmem:[%s9165_s2 + $0x38] sm:$0xff]  ;;  %v6449_v50 = vld [vmem:[%s9165_s2 + $0x20] sm:$0xff]  ;;  %v6447_v11 = vld [vmem:[%s9165_s2 + $0x10] sm:$0xff] }
 0xbd4   : > { %v6143_v24 = vsel %vm213_vm0, %v6099_v18, 0.0  ;;  %7555 = vmatprep.subr.mxu1 %v6452_v5  ;;  %v6446_v18 = vld [vmem:[%s9165_s2 + $0x8] sm:$0xff] }
 0xbd5   : > { %v6162_v60 = vmul.f32 0.125, %v6142_v51  ;;  %v6135_v27 = vadd.f32 %v6134_v41, %v6133_v42  ;;  %v6153_v9 = vrot.slane %v6152_v8, 2  ;;  %v6144_v48 = vrot.slane %v6143_v24, 4  ;;  %7556 = vmatpush3.msra.mxu1 %v6452_v5  ;;  %v6448_v42 = vld [vmem:[%s9165_s2 + $0x18] sm:$0xff]  ;;  %v6445_v51 = vld [vmem:[%s9165_s2] sm:$0xff] }
 0xbd6   : > { %v6984_v41 = vld [vmem:[%s9166_s3 + $0x1] ss:$0 sm:$0xff] }
 0xbd7   : > { %v6170_v26 = vadd.f32 1e-05, %v6162_v60  ;;  %v6161_v37 = vmul.f32 0.125, %v6135_v27  ;;  %v6154_v57 = vadd.f32 %v6153_v9, %v6152_v8  ;;  %v6145_v31 = vadd.f32 %v6144_v48, %v6143_v24  ;;  %6458 = vrot.lane.b32.xlu0 %v6984_v41, %s7802_s30  ;;  %6767 = vrot.lane.b32.xlu1 %v6984_v41, %s7803_s5  ;;  %v6241_v8 = vpop.permute.xlu1 %6240  ;;  %v6239_v24 = vpop.permute.xlu0 %6238 }
 0xbd8   : > { %v7737_v40 = vpop.eup %7736  ;;  %v6242_v60 = vsel %vm213_vm0, %v6239_v24, %v6241_v8 }
 0xbd9   : > { %v6182_v56 = vmul.f32 %v7737_v40, %v8878_v61  ;;  %7744 = vrsqrt.f32 %v6170_v26  ;;  %v6169_v62 = vadd.f32 1e-05, %v6161_v37  ;;  %v6155_v55 = vrot.slane %v6154_v57, 1 }
 0xbda   : > { %v7739_v12 = vpop.eup %7738  ;;  %v6146_v0 = vrot.slane %v6145_v31, 2 }
 0xbdb   : > { %v6181_v6 = vmul.f32 %v7739_v12, %v8886_v38  ;;  %7746 = vrsqrt.f32 %v6169_v62  ;;  %v6156_v22 = vadd.f32 %v6155_v55, %v6154_v57  ;;  %v6193_v44 = vmul.f32 %v6190_v10, %v6182_v56  ;;  %6778 = vrot.lane.b32.xlu0 %v6984_v41, %s7815_s18  ;;  %s9136_s18 = scalar_lea.vmem %s9167_s4, %s6859_s26 }
 0xbdc   : > { %v6147_v29 = vadd.f32 %v6146_v0, %v6145_v31 }
 0xbdd   : > { %v7741_v46 = vpop.eup %7740  ;;  %v6164_v49 = vmul.f32 0.125, %v6156_v22  ;;  %v6192_v20 = vmul.f32 %v6190_v10, %v6181_v6  ;;  %v8943_v16 = vadd.f32 %v6201_v59, %v6193_v44 }
 0xbde   : > { %v6184_v30 = vmul.f32 %v7741_v46, %v8897_v14  ;;  %v6148_v23 = vrot.slane %v6147_v29, 1 }
 0xbdf   : > { %v7743_v33 = vpop.eup %7742  ;;  %v6172_v61 = vadd.f32 1e-05, %v6164_v49  ;;  %v8940_v39 = vadd.f32 %v6201_v59, %v6192_v20 }
 0xbe0   : > { %v6183_v43 = vmul.f32 %v7743_v33, %v8905_v25  ;;  %v6149_v15 = vadd.f32 %v6148_v23, %v6147_v29  ;;  %v6195_v38 = vmul.f32 %v6190_v10, %v6184_v30 }
 0xbe1   : > { %7748 = vrsqrt.f32 %v6172_v61  ;;  %7543 = vmatprep.mubr.msk.f32.mxu0 %vm213_vm0, %v8940_v39 }
 0xbe2   : > { %v6163_v3 = vmul.f32 0.125, %v6149_v15  ;;  %7544 = vmatmul.mubr.msk.f32.vlgmr.msra.gmra.mxu0 %vm213_vm0, %v8943_v16  ;;  %v6194_v14 = vmul.f32 %v6190_v10, %v6183_v43  ;;  %v8951_v63 = vadd.f32 %v6201_v59, %v6195_v38 }
 0xbe4   : > { %v6171_v17 = vadd.f32 1e-05, %v6163_v3  ;;  %v8949_v19 = vadd.f32 %v6201_v59, %v6194_v14 }
 0xbe6   : > { %v7745_v21 = vpop.eup %7744  ;;  %7750 = vrsqrt.f32 %v6171_v17  ;;  %7546 = vmatprep.mubr.msk.f32.mxu0 %vm213_vm0, %v8949_v19 }
 0xbe7   : > { %v6186_v25 = vmul.f32 %v7745_v21, %v8914_v1  ;;  %7547 = vmatmul.mubr.msk.f32.gmra.mxu0 %vm213_vm0, %v8951_v63 }
 0xbe8   : > { %v7747_v47 = vpop.eup %7746 }
 0xbe9   : > { %v6185_v52 = vmul.f32 %v7747_v47, %v8919_v13  ;;  %v6197_v28 = vmul.f32 %v6190_v10, %v6186_v25 }
 0xbeb   : > { %v6196_v45 = vmul.f32 %v6190_v10, %v6185_v52  ;;  %v8961_v36 = vadd.f32 %v6201_v59, %v6197_v28 }
 0xbed   : > { %v8959_v32 = vadd.f32 %v6201_v59, %v6196_v45 }
 0xbee   : > { %v7749_v34 = vpop.eup %7748 }
 0xbef   : > { %7549 = vmatprep.mubr.msk.f32.mxu0 %vm213_vm0, %v8959_v32  ;;  %v6188_v1 = vmul.f32 %v7749_v34, %v8926_v53  ;;  %v6451_v53 = vld [vmem:[%s9165_s2 + $0x30] sm:$0xff] }
 0xbf0   : > { %7550 = vmatmul.mubr.msk.f32.gmra.mxu0 %vm213_vm0, %v8961_v36  ;;  %7557 = vmatprep.subr.mxu1 %v6451_v53 }
 0xbf1   : > { %v6199_v54 = vmul.f32 %v6190_v10, %v6188_v1  ;;  %7558 = vmatpush3.msra.mxu1 %v6451_v53 }
 0xbf3   : > { %v7751_v58 = vpop.eup %7750  ;;  %v8971_v4 = vadd.f32 %v6201_v59, %v6199_v54 }
 0xbf4   : > { %v6187_v35 = vmul.f32 %v7751_v58, %v8932_v7  ;;  %v6450_v7 = vld [vmem:[%s9165_s2 + $0x28] sm:$0xff] }
 0xbf5   : > { %7559 = vmatprep.subr.mxu1 %v6450_v7 }
 0xbf6   : > { %v6198_v13 = vmul.f32 %v6190_v10, %v6187_v35  ;;  %7560 = vmatpush3.msra.mxu1 %v6450_v7 }
 0xbf7   : > { %7561 = vmatprep.subr.mxu1 %v6449_v50 }
 0xbf8   : > { %v8969_v2 = vadd.f32 %v6201_v59, %v6198_v13  ;;  %7562 = vmatpush3.msra.mxu1 %v6449_v50 }
 0xbf9   : > { %7563 = vmatprep.subr.mxu1 %v6448_v42 }
 0xbfa   : > { %7552 = vmatprep.mubr.msk.f32.mxu0 %vm213_vm0, %v8969_v2  ;;  %7564 = vmatpush3.msra.mxu1 %v6448_v42 }
 0xbfb   : > { %7553 = vmatmul.mubr.msk.f32.gmra.mxu0 %vm213_vm0, %v8971_v4  ;;  %7565 = vmatprep.subr.mxu1 %v6447_v11 }
 0xbfc   : > { %7566 = vmatpush3.msra.mxu1 %v6447_v11 }
 0xbfd   : > { %7567 = vmatprep.subr.mxu1 %v6446_v18 }
 0xbfe   : > { %7568 = vmatpush3.msra.mxu1 %v6446_v18 }
 0xbff   : > { %7569 = vmatprep.subr.mxu1 %v6445_v51 }
 0xc00   : > { %7570 = vmatpush3.msra.mxu1 %v6445_v51 }
 0xca2   : > { %v7545_v27 = vpop.f32.mrf.mxu0 }
 0xca3   : > { %v9008_v9 = vadd.f32 %v7545_v27, %v6242_v60 }
 0xca4   : > { %v6334_v48 = vpop.f32.mrf.mxu0 }
 0xca5   : > { %v6374_v26 = vmul.f32 %v9008_v9, %v9008_v9  ;;  %v9012_v37 = vadd.f32 %v6334_v48, %v6242_v60 }
 0xca7   : > { %v6382_v57 = vmul.f32 %v6374_v26, %v9008_v9  ;;  %v6373_v31 = vmul.f32 %v9012_v37, %v9012_v37  ;;  %v7548_v10 = vpop.f32.mrf.mxu0 }
 0xca8   : > { %v9017_v40 = vadd.f32 %v7548_v10, %v6242_v60 }
 0xca9   : > { %v6390_v56 = vmul.f32 0.044715, %v6382_v57  ;;  %v6381_v62 = vmul.f32 %v6373_v31, %v9012_v37  ;;  %v6344_v55 = vpop.f32.mrf.mxu0 }
 0xcaa   : > { %v6376_v12 = vmul.f32 %v9017_v40, %v9017_v40  ;;  %v9022_v0 = vadd.f32 %v6344_v55, %v6242_v60 }
 0xcab   : > { %v6398_v6 = vadd.f32 %v6390_v56, %v9008_v9  ;;  %v6389_v22 = vmul.f32 0.044715, %v6381_v62 }
 0xcac   : > { %v6384_v29 = vmul.f32 %v6376_v12, %v9017_v40  ;;  %v6375_v44 = vmul.f32 %v9022_v0, %v9022_v0 }
 0xcad   : > { %v6406_v46 = vmul.f32 0.7978846, %v6398_v6  ;;  %v6397_v49 = vadd.f32 %v6389_v22, %v9012_v37 }
 0xcae   : > { %v6392_v59 = vmul.f32 0.044715, %v6384_v29  ;;  %v6383_v20 = vmul.f32 %v6375_v44, %v9022_v0 }
 0xcaf   : > { %7752 = vtanh.f32 %v6406_v46  ;;  %v6405_v30 = vmul.f32 0.7978846, %v6397_v49 }
 0xcb0   : > { %v6400_v23 = vadd.f32 %v6392_v59, %v9017_v40  ;;  %v6391_v33 = vmul.f32 0.044715, %v6383_v20  ;;  %v7551_v61 = vpop.f32.mrf.mxu0 }
 0xcb1   : > { %7754 = vtanh.f32 %v6405_v30  ;;  %v9031_v43 = vadd.f32 %v7551_v61, %v6242_v60 }
 0xcb2   : > { %v6408_v15 = vmul.f32 0.7978846, %v6400_v23  ;;  %v6399_v38 = vadd.f32 %v6391_v33, %v9022_v0  ;;  %v6354_v3 = vpop.f32.mrf.mxu0 }
 0xcb3   : > { %v6378_v14 = vmul.f32 %v9031_v43, %v9031_v43  ;;  %v6355_v17 = vadd.f32 %v6354_v3, %v6242_v60 }
 0xcb4   : > { %7756 = vtanh.f32 %v6408_v15  ;;  %v6407_v21 = vmul.f32 0.7978846, %v6399_v38 }
 0xcb5   : > { %v6386_v25 = vmul.f32 %v6378_v14, %v9031_v43  ;;  %v6377_v47 = vmul.f32 %v6355_v17, %v6355_v17 }
 0xcb6   : > { %7758 = vtanh.f32 %v6407_v21 }
 0xcb7   : > { %v6394_v52 = vmul.f32 0.044715, %v6386_v25  ;;  %v6385_v28 = vmul.f32 %v6377_v47, %v6355_v17  ;;  %v9051_v47 = vpop.permute.xlu0 %6458 }
 0xcb9   : > { %v6402_v45 = vadd.f32 %v6394_v52, %v9031_v43  ;;  %v6393_v34 = vmul.f32 0.044715, %v6385_v28 }
 0xcbb   : > { %v6410_v1 = vmul.f32 0.7978846, %v6402_v45  ;;  %v6401_v58 = vadd.f32 %v6393_v34, %v6355_v17  ;;  %v7554_v35 = vpop.f32.mrf.mxu0 }
 0xcbc   : > { %v7753_v54 = vpop.eup %7752  ;;  %v6370_v13 = vadd.f32 %v7554_v35, %v6242_v60 }
 0xcbd   : > { %v6422_v5 = vadd.f32 1.0, %v7753_v54  ;;  %7760 = vtanh.f32 %v6410_v1  ;;  %v6409_v53 = vmul.f32 0.7978846, %v6401_v58  ;;  %v6364_v7 = vpop.f32.mrf.mxu0 }
 0xcbe   : > { %v7755_v50 = vpop.eup %7754  ;;  %v6380_v42 = vmul.f32 %v6370_v13, %v6370_v13  ;;  %v6365_v11 = vadd.f32 %v6364_v7, %v6242_v60 }
 0xcbf   : > { %7762 = vtanh.f32 %v6409_v53  ;;  %v6421_v18 = vadd.f32 1.0, %v7755_v50  ;;  %v6430_v51 = vmul.f32 0.5, %v6422_v5 }
 0xcc0   : > { %v6388_v41 = vmul.f32 %v6380_v42, %v6370_v13  ;;  %v6379_v8 = vmul.f32 %v6365_v11, %v6365_v11 }
 0xcc1   : > { %v7757_v24 = vpop.eup %7756  ;;  %v6429_v27 = vmul.f32 0.5, %v6421_v18  ;;  %v6438_v56 = vmul.f32 %v6430_v51, %v9008_v9 }
 0xcc2   : > { %v6396_v48 = vmul.f32 0.044715, %v6388_v41  ;;  %v6387_v26 = vmul.f32 %v6379_v8, %v6365_v11  ;;  %v6424_v57 = vadd.f32 1.0, %v7757_v24 }
 0xcc3   : > { %v7759_v31 = vpop.eup %7758  ;;  %v6437_v10 = vmul.f32 %v6429_v27, %v9012_v37 }
 0xcc4   : > { %v6404_v62 = vadd.f32 %v6396_v48, %v6370_v13  ;;  %v6395_v55 = vmul.f32 0.044715, %v6387_v26  ;;  %v6423_v12 = vadd.f32 1.0, %v7759_v31  ;;  %v6432_v60 = vmul.f32 0.5, %v6424_v57 }
 0xcc5   : > { %7571 = vmatprep.mubr.msk.f32.mxu1 %vm6461_vm7, %v6437_v10 }
 0xcc6   : > { %v6412_v6 = vmul.f32 0.7978846, %v6404_v62  ;;  %v6403_v22 = vadd.f32 %v6395_v55, %v6365_v11  ;;  %7572 = vmatmul.mubr.msk.f32.vlgmr.msra.gmra.mxu1 %vm6461_vm7, %v6438_v56  ;;  %v6431_v29 = vmul.f32 0.5, %v6423_v12  ;;  %v6440_v49 = vmul.f32 %v6432_v60, %v9017_v40 }
 0xcc8   : > { %7764 = vtanh.f32 %v6412_v6  ;;  %v6411_v44 = vmul.f32 0.7978846, %v6403_v22  ;;  %v6439_v46 = vmul.f32 %v6431_v29, %v9022_v0 }
 0xcca   : > { %v7761_v37 = vpop.eup %7760  ;;  %7766 = vtanh.f32 %v6411_v44  ;;  %7574 = vmatprep.mubr.msk.f32.mxu1 %vm6461_vm7, %v6439_v46 }
 0xccb   : > { %7575 = vmatmul.mubr.msk.f32.gmra.mxu1 %vm6461_vm7, %v6440_v49  ;;  %v6426_v9 = vadd.f32 1.0, %v7761_v37 }
 0xccc   : > { %v7763_v59 = vpop.eup %7762 }
 0xccd   : > { %v6425_v20 = vadd.f32 1.0, %v7763_v59  ;;  %v6434_v30 = vmul.f32 0.5, %v6426_v9 }
 0xccf   : > { %v6433_v23 = vmul.f32 0.5, %v6425_v20  ;;  %v6442_v61 = vmul.f32 %v6434_v30, %v9031_v43 }
 0xcd1   : > { %v6441_v33 = vmul.f32 %v6433_v23, %v6355_v17 }
 0xcd3   : > { %7577 = vmatprep.mubr.msk.f32.mxu1 %vm6461_vm7, %v6441_v33 }
 0xcd4   : > { %7578 = vmatmul.mubr.msk.f32.gmra.mxu1 %vm6461_vm7, %v6442_v61 }
 0xcd5   : > { %v7765_v0 = vpop.eup %7764 }
 0xcd6   : > { %v6428_v40 = vadd.f32 1.0, %v7765_v0 }
 0xcd7   : > { %v7767_v15 = vpop.eup %7766 }
 0xcd8   : > { %v6427_v38 = vadd.f32 1.0, %v7767_v15  ;;  %v6436_v3 = vmul.f32 0.5, %v6428_v40 }
 0xcda   : > { %v6435_v14 = vmul.f32 0.5, %v6427_v38  ;;  %v6444_v25 = vmul.f32 %v6436_v3, %v6370_v13 }
 0xcdc   : > { %v6443_v21 = vmul.f32 %v6435_v14, %v6365_v11 }
 0xcde   : > { %7580 = vmatprep.mubr.msk.f32.mxu1 %vm6461_vm7, %v6443_v21 }
 0xcdf   : > { %7581 = vmatmul.mubr.msk.f32.gmra.mxu1 %vm6461_vm7, %v6444_v25 }
 0xd86   : > { %v7573_v17 = vpop.f32.mrf.mxu1 }
 0xd87   : > { %v6558_v43 = vadd.f32 %v7573_v17, %v9051_v47 }
 0xd88   : > { %v6552_v52 = vpop.f32.mrf.mxu1 }
 0xd89   : > { %v6592_v28 = vadd.f32 %v6558_v43, %v8943_v16  ;;  %v6553_v45 = vadd.f32 %v6552_v52, %v9051_v47 }
 0xd8b   : > { %v6606_v34 = vsel %vm213_vm0, %v6592_v28, 0.0  ;;  %v6591_v1 = vadd.f32 %v6553_v45, %v8940_v39  ;;  %v7576_v58 = vpop.f32.mrf.mxu1 }
 0xd8c   : > { %v6607_v35 = vrot.slane %v6606_v34, 4  ;;  %v6568_v54 = vadd.f32 %v7576_v58, %v9051_v47 }
 0xd8d   : > { %v6599_v13 = vsel %vm213_vm0, %v6591_v1, 0.0  ;;  %v6562_v5 = vpop.f32.mrf.mxu1 }
 0xd8e   : > { %v6608_v53 = vadd.f32 %v6607_v35, %v6606_v34  ;;  %v6600_v7 = vrot.slane %v6599_v13, 4  ;;  %v6594_v50 = vadd.f32 %v6568_v54, %v8951_v63  ;;  %v6563_v42 = vadd.f32 %v6562_v5, %v9051_v47 }
 0xd90   : > { %v6609_v16 = vrot.slane %v6608_v53, 2  ;;  %v6601_v11 = vadd.f32 %v6600_v7, %v6599_v13  ;;  %v6620_v18 = vsel %vm213_vm0, %v6594_v50, 0.0  ;;  %v6593_v51 = vadd.f32 %v6563_v42, %v8949_v19 }
 0xd91   : > { %v6621_v39 = vrot.slane %v6620_v18, 4 }
 0xd92   : > { %v6610_v41 = vadd.f32 %v6609_v16, %v6608_v53  ;;  %v6602_v8 = vrot.slane %v6601_v11, 2  ;;  %v6613_v24 = vsel %vm213_vm0, %v6593_v51, 0.0 }
 0xd93   : > { %v6622_v27 = vadd.f32 %v6621_v39, %v6620_v18  ;;  %v6614_v48 = vrot.slane %v6613_v24, 4 }
 0xd94   : > { %v6611_v26 = vrot.slane %v6610_v41, 1  ;;  %v6603_v57 = vadd.f32 %v6602_v8, %v6601_v11  ;;  %v7579_v31 = vpop.f32.mrf.mxu1 }
 0xd95   : > { %v6623_v10 = vrot.slane %v6622_v27, 2  ;;  %v6615_v63 = vadd.f32 %v6614_v48, %v6613_v24  ;;  %v6578_v56 = vadd.f32 %v7579_v31, %v9051_v47 }
 0xd96   : > { %v6612_v62 = vadd.f32 %v6611_v26, %v6610_v41  ;;  %v6604_v55 = vrot.slane %v6603_v57, 1  ;;  %v6572_v12 = vpop.f32.mrf.mxu1 }
 0xd97   : > { %v6624_v60 = vadd.f32 %v6623_v10, %v6622_v27  ;;  %v6616_v6 = vrot.slane %v6615_v63, 2  ;;  %v9067_v19 = vadd.f32 %v6578_v56, %v8961_v36  ;;  %v6573_v22 = vadd.f32 %v6572_v12, %v9051_v47 }
 0xd98   : > { %v6656_v29 = vmul.f32 0.125, %v6612_v62  ;;  %v6605_v44 = vadd.f32 %v6604_v55, %v6603_v57 }
 0xd99   : > { %v6625_v46 = vrot.slane %v6624_v60, 1  ;;  %v6617_v49 = vadd.f32 %v6616_v6, %v6615_v63  ;;  %v6634_v37 = vsel %vm213_vm0, %v9067_v19, 0.0  ;;  %v9073_v9 = vadd.f32 %v6573_v22, %v8959_v32 }
 0xd9a   : > { %v9075_v59 = vsub.f32 %v6592_v28, %v6656_v29  ;;  %v6655_v20 = vmul.f32 0.125, %v6605_v44  ;;  %v6635_v30 = vrot.slane %v6634_v37, 4 }
 0xd9b   : > { %v6626_v23 = vadd.f32 %v6625_v46, %v6624_v60  ;;  %v6618_v33 = vrot.slane %v6617_v49, 1  ;;  %v6627_v36 = vsel %vm213_vm0, %v9073_v9, 0.0 }
 0xd9c   : > { %v6672_v61 = vmul.f32 %v9075_v59, %v9075_v59  ;;  %v9081_v0 = vsub.f32 %v6591_v1, %v6655_v20  ;;  %v6636_v40 = vadd.f32 %v6635_v30, %v6634_v37  ;;  %v6628_v15 = vrot.slane %v6627_v36, 4 }
 0xd9d   : > { %v6658_v38 = vmul.f32 0.125, %v6626_v23  ;;  %v6619_v3 = vadd.f32 %v6618_v33, %v6617_v49 }
 0xd9e   : > { %v6686_v32 = vsel %vm213_vm0, %v6672_v61, 0.0  ;;  %v6671_v14 = vmul.f32 %v9081_v0, %v9081_v0  ;;  %v6637_v21 = vrot.slane %v6636_v40, 2  ;;  %v6629_v25 = vadd.f32 %v6628_v15, %v6627_v36 }
 0xd9f   : > { %v6687_v17 = vrot.slane %v6686_v32, 4  ;;  %v9086_v43 = vsub.f32 %v6594_v50, %v6658_v38  ;;  %v6657_v52 = vmul.f32 0.125, %v6619_v3  ;;  %v7582_v28 = vpop.f32.mrf.mxu1 }
 0xda0   : > { %v6679_v45 = vsel %vm213_vm0, %v6671_v14, 0.0  ;;  %v6638_v34 = vadd.f32 %v6637_v21, %v6636_v40  ;;  %v6630_v1 = vrot.slane %v6629_v25, 2  ;;  %v6588_v58 = vadd.f32 %v7582_v28, %v9051_v47 }
 0xda1   : > { %v6688_v35 = vadd.f32 %v6687_v17, %v6686_v32  ;;  %v6680_v54 = vrot.slane %v6679_v45, 4  ;;  %v6674_v13 = vmul.f32 %v9086_v43, %v9086_v43  ;;  %v9092_v5 = vsub.f32 %v6593_v51, %v6657_v52  ;;  %v6582_v53 = vpop.f32.mrf.mxu1 }
 0xda2   : > { %v6639_v7 = vrot.slane %v6638_v34, 1  ;;  %v6631_v42 = vadd.f32 %v6630_v1, %v6629_v25  ;;  %v9095_v50 = vadd.f32 %v6588_v58, %v8971_v4  ;;  %v6583_v16 = vadd.f32 %v6582_v53, %v9051_v47 }
 0xda3   : > { %v6689_v11 = vrot.slane %v6688_v35, 2  ;;  %v6681_v18 = vadd.f32 %v6680_v54, %v6679_v45  ;;  %v6700_v39 = vsel %vm213_vm0, %v6674_v13, 0.0  ;;  %v6673_v41 = vmul.f32 %v9092_v5, %v9092_v5 }
 0xda4   : > { %v6701_v8 = vrot.slane %v6700_v39, 4  ;;  %v6640_v24 = vadd.f32 %v6639_v7, %v6638_v34  ;;  %v6632_v27 = vrot.slane %v6631_v42, 1  ;;  %v6648_v51 = vsel %vm213_vm0, %v9095_v50, 0.0 }
 0xda5   : > { %v6690_v48 = vadd.f32 %v6689_v11, %v6688_v35  ;;  %v6682_v26 = vrot.slane %v6681_v18, 2  ;;  %v6693_v4 = vsel %vm213_vm0, %v6673_v41, 0.0  ;;  %v6649_v57 = vrot.slane %v6648_v51, 4 }
 0xda6   : > { %v6702_v31 = vadd.f32 %v6701_v8, %v6700_v39  ;;  %v6694_v47 = vrot.slane %v6693_v4, 4  ;;  %v6660_v10 = vmul.f32 0.125, %v6640_v24  ;;  %v6633_v63 = vadd.f32 %v6632_v27, %v6631_v42 }
 0xda7   : > { %v6691_v56 = vrot.slane %v6690_v48, 1  ;;  %v6683_v62 = vadd.f32 %v6682_v26, %v6681_v18  ;;  %v6650_v55 = vadd.f32 %v6649_v57, %v6648_v51  ;;  %v6597_v12 = vadd.f32 %v6583_v16, %v8969_v2 }
 0xda8   : > { %v6703_v60 = vrot.slane %v6702_v31, 2  ;;  %v6695_v6 = vadd.f32 %v6694_v47, %v6693_v4  ;;  %v9106_v22 = vsub.f32 %v9067_v19, %v6660_v10  ;;  %v6659_v29 = vmul.f32 0.125, %v6633_v63 }
 0xda9   : > { %v6692_v44 = vadd.f32 %v6691_v56, %v6690_v48  ;;  %v6684_v46 = vrot.slane %v6683_v62, 1  ;;  %v6651_v49 = vrot.slane %v6650_v55, 2  ;;  %v6641_v37 = vsel %vm213_vm0, %v6597_v12, 0.0 }
 0xdaa   : > { %v6704_v20 = vadd.f32 %v6703_v60, %v6702_v31  ;;  %v6696_v30 = vrot.slane %v6695_v6, 2  ;;  %v6676_v23 = vmul.f32 %v9106_v22, %v9106_v22  ;;  %v9112_v33 = vsub.f32 %v9073_v9, %v6659_v29 }
 0xdab   : > { %v6736_v2 = vmul.f32 0.125, %v6692_v44  ;;  %v6685_v36 = vadd.f32 %v6684_v46, %v6683_v62  ;;  %v6652_v61 = vadd.f32 %v6651_v49, %v6650_v55  ;;  %v6642_v40 = vrot.slane %v6641_v37, 4 }
 0xdac   : > { %v6705_v19 = vrot.slane %v6704_v20, 1  ;;  %v6697_v15 = vadd.f32 %v6696_v30, %v6695_v6  ;;  %v6714_v38 = vsel %vm213_vm0, %v6676_v23, 0.0  ;;  %v6675_v3 = vmul.f32 %v9112_v33, %v9112_v33 }
 0xdad   : > { %v6744_v32 = vadd.f32 1e-05, %v6736_v2  ;;  %v6735_v14 = vmul.f32 0.125, %v6685_v36  ;;  %v6715_v21 = vrot.slane %v6714_v38, 4  ;;  %v6653_v25 = vrot.slane %v6652_v61, 1 }
 0xdae   : > { %v6706_v17 = vadd.f32 %v6705_v19, %v6704_v20  ;;  %v6698_v52 = vrot.slane %v6697_v15, 1  ;;  %v6707_v9 = vsel %vm213_vm0, %v6675_v3, 0.0  ;;  %v6643_v28 = vadd.f32 %v6642_v40, %v6641_v37  ;;  %v6768_v20 = vpop.permute.xlu1 %6767 }
 0xdaf   : > { %7768 = vrsqrt.f32 %v6744_v32  ;;  %v6743_v45 = vadd.f32 1e-05, %v6735_v14  ;;  %v6716_v34 = vadd.f32 %v6715_v21, %v6714_v38  ;;  %v6708_v1 = vrot.slane %v6707_v9, 4 }
 0xdb0   : > { %v6738_v58 = vmul.f32 0.125, %v6706_v17  ;;  %v6699_v35 = vadd.f32 %v6698_v52, %v6697_v15  ;;  %v6654_v54 = vadd.f32 %v6653_v25, %v6652_v61  ;;  %v6644_v13 = vrot.slane %v6643_v28, 2  ;;  %v6779_v61 = vpop.permute.xlu0 %6778 }
 0xdb1   : > { %7770 = vrsqrt.f32 %v6743_v45  ;;  %v6717_v53 = vrot.slane %v6716_v34, 2  ;;  %v6709_v7 = vadd.f32 %v6708_v1, %v6707_v9 }
 0xdb2   : > { %v6746_v42 = vadd.f32 1e-05, %v6738_v58  ;;  %v6737_v16 = vmul.f32 0.125, %v6699_v35  ;;  %v6662_v11 = vmul.f32 0.125, %v6654_v54  ;;  %v6645_v18 = vadd.f32 %v6644_v13, %v6643_v28 }
 0xdb3   : > { %v6718_v39 = vadd.f32 %v6717_v53, %v6716_v34  ;;  %v6710_v41 = vrot.slane %v6709_v7, 2 }
 0xdb4   : > { %7772 = vrsqrt.f32 %v6746_v42  ;;  %v6745_v8 = vadd.f32 1e-05, %v6737_v16  ;;  %v9119_v24 = vsub.f32 %v9095_v50, %v6662_v11  ;;  %v6646_v27 = vrot.slane %v6645_v18, 1 }
 0xdb5   : > { %v6719_v51 = vrot.slane %v6718_v39, 1  ;;  %v6711_v48 = vadd.f32 %v6710_v41, %v6709_v7 }
 0xdb6   : > { %7774 = vrsqrt.f32 %v6745_v8  ;;  %v6678_v26 = vmul.f32 %v9119_v24, %v9119_v24  ;;  %v6647_v4 = vadd.f32 %v6646_v27, %v6645_v18 }
 0xdb7   : > { %v6720_v57 = vadd.f32 %v6719_v51, %v6718_v39  ;;  %v6712_v31 = vrot.slane %v6711_v48, 1 }
 0xdb8   : > { %v6728_v47 = vsel %vm213_vm0, %v6678_v26, 0.0  ;;  %v6661_v10 = vmul.f32 0.125, %v6647_v4 }
 0xdb9   : > { %v6740_v63 = vmul.f32 0.125, %v6720_v57  ;;  %v6713_v56 = vadd.f32 %v6712_v31, %v6711_v48  ;;  %v6729_v62 = vrot.slane %v6728_v47, 4 }
 0xdba   : > { %v9124_v55 = vsub.f32 %v6597_v12, %v6661_v10 }
 0xdbb   : > { %v6748_v50 = vadd.f32 1e-05, %v6740_v63  ;;  %v6739_v60 = vmul.f32 0.125, %v6713_v56  ;;  %v6730_v6 = vadd.f32 %v6729_v62, %v6728_v47 }
 0xdbc   : > { %v7769_v29 = vpop.eup %7768  ;;  %v6677_v44 = vmul.f32 %v9124_v55, %v9124_v55 }
 0xdbd   : > { %v6760_v46 = vmul.f32 %v7769_v29, %v9075_v59  ;;  %7776 = vrsqrt.f32 %v6748_v50  ;;  %v6747_v49 = vadd.f32 1e-05, %v6739_v60  ;;  %v6731_v37 = vrot.slane %v6730_v6, 2 }
 0xdbe   : > { %v7771_v30 = vpop.eup %7770  ;;  %v6721_v23 = vsel %vm213_vm0, %v6677_v44, 0.0 }
 0xdbf   : > { %v6759_v12 = vmul.f32 %v7771_v30, %v9081_v0  ;;  %7778 = vrsqrt.f32 %v6747_v49  ;;  %v6732_v2 = vadd.f32 %v6731_v37, %v6730_v6  ;;  %v6722_v36 = vrot.slane %v6721_v23, 4 }
 0xdc0   : > { %v6771_v40 = vmul.f32 %v6768_v20, %v6760_v46 }
 0xdc1   : > { %v7773_v19 = vpop.eup %7772  ;;  %v6733_v59 = vrot.slane %v6732_v2, 1  ;;  %v6723_v15 = vadd.f32 %v6722_v36, %v6721_v23  ;;  %v6770_v38 = vmul.f32 %v6768_v20, %v6759_v12 }
 0xdc2   : > { %v6762_v3 = vmul.f32 %v7773_v19, %v9086_v43  ;;  %v6782_v0 = vadd.f32 %v6779_v61, %v6771_v40 }
 0xdc3   : > { %v7775_v32 = vpop.eup %7774  ;;  %v6734_v14 = vadd.f32 %v6733_v59, %v6732_v2  ;;  %v6724_v21 = vrot.slane %v6723_v15, 2  ;;  %v6781_v25 = vadd.f32 %v6779_v61, %v6770_v38 }
 0xdc4   : > { %v6761_v17 = vmul.f32 %v7775_v32, %v9092_v5  ;;  %v6773_v52 = vmul.f32 %v6768_v20, %v6762_v3  ;;  %6790 = vst.msk [vmem:[%s9136_s18 + $0x8] sm:$0xff] %vm213_vm0, %v6782_v0 }
 0xdc5   : > { %v6742_v9 = vmul.f32 0.125, %v6734_v14  ;;  %v6725_v28 = vadd.f32 %v6724_v21, %v6723_v15  ;;  %6789 = vst.msk [vmem:[%s9136_s18] sm:$0xff] %vm213_vm0, %v6781_v25 }
 0xdc6   : > { %v6772_v45 = vmul.f32 %v6768_v20, %v6761_v17  ;;  %v6784_v34 = vadd.f32 %v6779_v61, %v6773_v52 }
 0xdc7   : > { %v6750_v1 = vadd.f32 1e-05, %v6742_v9  ;;  %v6726_v43 = vrot.slane %v6725_v28, 1 }
 0xdc8   : > { %v6783_v58 = vadd.f32 %v6779_v61, %v6772_v45  ;;  %6792 = vst.msk [vmem:[%s9136_s18 + $0x18] sm:$0xff] %vm213_vm0, %v6784_v34 }
 0xdc9   : > { %7780 = vrsqrt.f32 %v6750_v1  ;;  %v6727_v35 = vadd.f32 %v6726_v43, %v6725_v28 }
 0xdca   : > { %v7777_v54 = vpop.eup %7776  ;;  %6791 = vst.msk [vmem:[%s9136_s18 + $0x10] sm:$0xff] %vm213_vm0, %v6783_v58 }
 0xdcb   : > { %v6764_v5 = vmul.f32 %v7777_v54, %v9106_v22  ;;  %v6741_v13 = vmul.f32 0.125, %v6727_v35 }
 0xdcc   : > { %v7779_v53 = vpop.eup %7778 }
 0xdcd   : > { %v6763_v7 = vmul.f32 %v7779_v53, %v9112_v33  ;;  %v6749_v42 = vadd.f32 1e-05, %v6741_v13  ;;  %v6775_v16 = vmul.f32 %v6768_v20, %v6764_v5 }
 0xdcf   : > { %7782 = vrsqrt.f32 %v6749_v42  ;;  %v6774_v11 = vmul.f32 %v6768_v20, %v6763_v7  ;;  %v6786_v18 = vadd.f32 %v6779_v61, %v6775_v16 }
 0xdd1   : > { %v6785_v39 = vadd.f32 %v6779_v61, %v6774_v11  ;;  %6794 = vst.msk [vmem:[%s9136_s18 + $0x28] sm:$0xff] %vm213_vm0, %v6786_v18 }
 0xdd3   : > { %6793 = vst.msk [vmem:[%s9136_s18 + $0x20] sm:$0xff] %vm213_vm0, %v6785_v39 }
 0xdd6   : > { %v7781_v41 = vpop.eup %7780 }
 0xdd7   : > { %v6766_v8 = vmul.f32 %v7781_v41, %v9119_v24 }
 0xdd9   : > { %v6777_v22 = vmul.f32 %v6768_v20, %v6766_v8 }
 0xddb   : > { %v6788_v27 = vadd.f32 %v6779_v61, %v6777_v22 }
 0xddc   : > { %v7783_v51 = vpop.eup %7782 }
 0xddd   : > { %v6765_v48 = vmul.f32 %v7783_v51, %v9124_v55  ;;  %6796 = vst.msk [vmem:[%s9136_s18 + $0x38] sm:$0xff] %vm213_vm0, %v6788_v27 }
 0xddf   : > { %v6776_v33 = vmul.f32 %v6768_v20, %v6765_v48 }
 0xde1   : > { %v6787_v26 = vadd.f32 %v6779_v61, %v6776_v33 }
 0xde3   : > { %6795 = vst.msk [vmem:[%s9136_s18 + $0x30] sm:$0xff] %vm213_vm0, %v6787_v26 }
 0xde4 PF: > { %s14_s15 = sadd.s32 1, %s7798_s15  }
 0xde5   : > { %p11_p4 = scmp.ge.s32.totalorder %s14_s15, 4  }
 0xde7   :  { %13 = sbr.rel (!%p11_p4) target bundleno = 1 (0x1), region = 66 }

</bundles_post_ra>
